<compile_context>
chip_gen: v5e
topology: v5e:2x2
jax: 0.10.0
libtpu: 0.0.40
codegen_flags: <defaults>
</compile_context>

<pallas_src>
import jax
import jax.numpy as jnp
from jax import lax
from jax.experimental import pallas as pl
from jax.experimental.pallas import tpu as pltpu


def _round_up(x, m):
    return (x + m - 1) // m * m


def _pad_to(a, shape):
    return jnp.pad(a, [(0, s - d) for d, s in zip(a.shape, shape)])


def _lstm_seq_kernel(zx_ref, h0_ref, c0_ref, w_rec_ref,
                     h_out_ref, c_out_ref, h_s, c_s):
    """One grid step == one (batch tile, TT-timestep chunk).

    zx_ref    : (TT, bt, 4*Hp)  streamed x@W_in + bias (gate-blocked, +1 folded)
    h0_ref    : (bt, Hp)        initial hidden state for this batch tile
    c0_ref    : (bt, Hp)        initial cell state for this batch tile
    w_rec_ref : (4, Hp, Hp)     per-gate recurrent weights, resident in VMEM
    h_out_ref : (TT, bt, Hp)    per-step hidden outputs
    c_out_ref : (TT, bt, Hp)    per-step cell outputs
    h_s / c_s : (bt, Hp) f32    state carried across time chunks in VMEM scratch
    """
    tc = pl.program_id(1)

    @pl.when(tc == 0)
    def _():
        h_s[...] = h0_ref[...].astype(jnp.float32)
        c_s[...] = c0_ref[...].astype(jnp.float32)

    TT = zx_ref.shape[0]
    Hp = h_s.shape[-1]
    mxu_dtype = w_rec_ref.dtype

    def step(i, carry):
        h, c = carry
        zx = zx_ref[i].astype(jnp.float32)          # (bt, 4*Hp), lane-aligned slices
        h_mxu = h.astype(mxu_dtype)

        # Per-gate recurrent matmuls; each gate's transcendental is issued right
        # after its block so EUP work overlaps the next gate's MXU push
        # (separate VLIW slots) inside the strictly serial recurrence.
        z_i = zx[:, 0 * Hp:1 * Hp] + jnp.dot(
            h_mxu, w_rec_ref[0], preferred_element_type=jnp.float32)
        i_act = jnp.tanh(z_i)
        z_ig = zx[:, 1 * Hp:2 * Hp] + jnp.dot(
            h_mxu, w_rec_ref[1], preferred_element_type=jnp.float32)
        i_gate = jax.nn.sigmoid(z_ig)
        z_fg = zx[:, 2 * Hp:3 * Hp] + jnp.dot(
            h_mxu, w_rec_ref[2], preferred_element_type=jnp.float32)
        f_gate = jax.nn.sigmoid(z_fg)               # forget +1.0 folded into bias
        z_og = zx[:, 3 * Hp:4 * Hp] + jnp.dot(
            h_mxu, w_rec_ref[3], preferred_element_type=jnp.float32)
        o_gate = jax.nn.sigmoid(z_og)

        new_c = c * f_gate + i_act * i_gate
        new_h = jnp.tanh(new_c) * o_gate

        h_out_ref[i] = new_h.astype(h_out_ref.dtype)
        c_out_ref[i] = new_c.astype(c_out_ref.dtype)
        return new_h, new_c

    h, c = lax.fori_loop(0, TT, step, (h_s[...], c_s[...]), unroll=True)
    h_s[...] = h
    c_s[...] = c


def lstm_sequence(x_seq, h0, c0, w_in_t, b, w_rec_t, *,
                  mxu_dtype=jnp.bfloat16, time_block=16, batch_tile=None,
                  out_dtype=None):
    """Run T fused LSTMCell steps. Returns per-step (h_seq, c_seq), each (T,B,H).

    mxu_dtype : dtype of MXU operands (weights, streamed Zx, per-step h cast).
                Default bf16 (native MXU path on v5e/v6e/v7x); pass jnp.float32
                for bit-tight validation against an f32 reference.
    time_block: timesteps fused per grid step (amortizes per-step pipeline
                overhead; inner unrolled fori_loop).
    batch_tile: rows per batch tile; the batch-tile grid axis is "parallel"
                (v7x 2-TC sharding for large B).  Default = whole padded batch.
    out_dtype : dtype of the stored h/c sequences (pass bf16 on v5e to halve
                the HBM writeback); default = x_seq.dtype.
    """
    T, B, D = x_seq.shape
    H = h0.shape[-1]
    assert w_in_t.shape == (D, 4 * H)
    assert w_rec_t.shape == (H, 4 * H)
    assert b.shape == (4 * H,)

    mxu_dtype = jnp.dtype(mxu_dtype)
    out_dtype = jnp.dtype(x_seq.dtype) if out_dtype is None else jnp.dtype(out_dtype)

    # Lane/sublane-dense padding: batch -> multiple of 8, hidden -> multiple of
    # 128.  Gate-blocked layout keeps every gate slice lane-aligned; zero
    # padding keeps padded state columns exactly zero (no leakage).
    Hp = _round_up(H, 128)
    Bp = _round_up(B, 8)
    bt = Bp if batch_tile is None else _round_up(min(batch_tile, Bp), 8)
    Bp = _round_up(Bp, bt)
    nb = Bp // bt
    TT = max(1, min(time_block, T))
    Tp = _round_up(T, TT)
    ntc = Tp // TT

    # ---- Hoisted input projection (outside the serial recurrence) ----
    b_g = b.reshape(4, H).astype(jnp.float32)
    b_g = b_g.at[2].add(1.0)                         # fold forget-gate +1.0
    zx = jnp.dot(x_seq.reshape(T * B, D).astype(mxu_dtype),
                 w_in_t.astype(mxu_dtype),
                 preferred_element_type=jnp.float32)
    zx = zx.reshape(T, B, 4, H) + b_g
    zx = _pad_to(zx, (Tp, Bp, 4, Hp)).reshape(Tp, Bp, 4 * Hp).astype(mxu_dtype)

    h0_p = _pad_to(h0, (Bp, Hp)).astype(jnp.float32)
    c0_p = _pad_to(c0, (Bp, Hp)).astype(jnp.float32)
    # Per-gate recurrent weights: (4, Hp, Hp), contiguous (Hp, Hp) block per gate.
    w_rec_p = _pad_to(w_rec_t.reshape(H, 4, H), (Hp, 4, Hp))
    w_rec_p = jnp.transpose(w_rec_p, (1, 0, 2)).astype(mxu_dtype)

    # ---- VMEM budget (Pallas double-buffers every in/out block by default) ----
    zx_block = TT * bt * 4 * Hp * mxu_dtype.itemsize
    out_block = 2 * TT * bt * Hp * out_dtype.itemsize
    resident = 4 * Hp * Hp * mxu_dtype.itemsize + 2 * bt * Hp * 4  # W_rec + h0/c0
    scratch = 2 * bt * Hp * 4
    # TODO(synk): once pl.Buffered(1) (pipeline_mode) is verified on the target
    # jax/libtpu build, single-buffer the constant-index residents (W_rec, h0,
    # c0) and drop the 2x factor on `resident` below.
    want = 2 * (zx_block + out_block + resident) + scratch + (4 << 20)
    try:
        vmem_cap = int(pltpu.get_tpu_info().vmem_capacity_bytes)
    except Exception:                                 # conservative: v7x per-TC
        vmem_cap = 64 * 1024 * 1024
    vmem_limit = max(min(want, vmem_cap - (8 << 20)), 16 << 20)

    # Advisory only (padded shapes): in-kernel recurrent matmuls + gate math.
    flops = 2 * Tp * Bp * Hp * 4 * Hp + 10 * Tp * Bp * Hp
    transc = 5 * Tp * Bp * Hp
    bytes_accessed = (zx.nbytes + nb * w_rec_p.nbytes + h0_p.nbytes + c0_p.nbytes
                      + 2 * Tp * Bp * Hp * out_dtype.itemsize)

    h_seq, c_seq = pl.pallas_call(
        _lstm_seq_kernel,
        out_shape=(jax.ShapeDtypeStruct((Tp, Bp, Hp), out_dtype),
                   jax.ShapeDtypeStruct((Tp, Bp, Hp), out_dtype)),
        grid_spec=pltpu.PrefetchScalarGridSpec(
            num_scalar_prefetch=0,
            grid=(nb, ntc),                           # (batch tiles, time chunks)
            in_specs=[
                pl.BlockSpec((TT, bt, 4 * Hp), lambda bi, ti: (ti, bi, 0)),  # Zx
                pl.BlockSpec((bt, Hp), lambda bi, ti: (bi, 0)),              # h0
                pl.BlockSpec((bt, Hp), lambda bi, ti: (bi, 0)),              # c0
                pl.BlockSpec((4, Hp, Hp), lambda bi, ti: (0, 0, 0)),         # W_rec
            ],
            out_specs=(pl.BlockSpec((TT, bt, Hp), lambda bi, ti: (ti, bi, 0)),
                       pl.BlockSpec((TT, bt, Hp), lambda bi, ti: (ti, bi, 0))),
            scratch_shapes=[pltpu.VMEM((bt, Hp), jnp.float32),
                            pltpu.VMEM((bt, Hp), jnp.float32)]),
        compiler_params=pltpu.CompilerParams(
            dimension_semantics=("parallel", "arbitrary"),  # batch ∥, T serial
            vmem_limit_bytes=int(vmem_limit)),
        cost_estimate=pl.CostEstimate(flops=int(flops), transcendentals=int(transc),
                                      bytes_accessed=int(bytes_accessed)),
    )(zx, h0_p, c0_p, w_rec_p)

    # Strip time / batch / hidden padding.
    return h_seq[:T, :B, :H], c_seq[:T, :B, :H]


def lstm_cell(x, h, c, w_in_t, b, w_rec_t, *, mxu_dtype=jnp.bfloat16):
    """Single LSTMCell forward step (exactly the torch module's forward)."""
    h_seq, c_seq = lstm_sequence(x[None], h, c, w_in_t, b, w_rec_t,
                                 mxu_dtype=mxu_dtype)
    return h_seq[0], c_seq[0]


def init_params(key, input_size, hidden_size, dtype=jnp.float32):
    """Mirrors LSTMCell.init_weights shapes:
       input_map.weight (4H, D) xavier-uniform, input_map.bias (4H,) U(-0.1,0.1),
       recurrent_map.weight (4H, H) orthogonal.  Stored transposed for matmuls."""
    k1, k2, k3 = jax.random.split(key, 3)
    w_in = jax.nn.initializers.glorot_uniform()(
        k1, (4 * hidden_size, input_size), dtype)
    b_in = jax.random.uniform(k2, (4 * hidden_size,), dtype, -0.1, 0.1)
    w_rec = jax.nn.initializers.orthogonal()(
        k3, (4 * hidden_size, hidden_size), dtype)
    return w_in.T, b_in, w_rec.T


def lstm_cell_ref(x, h, c, w_in_t, b, w_rec_t):
    """Pure-JAX reference matching the torch forward exactly."""
    H = h.shape[-1]
    z = x @ w_in_t + b + h @ w_rec_t
    i, ig, fg, og = z[:, :H], z[:, H:2 * H], z[:, 2 * H:3 * H], z[:, 3 * H:]
    new_c = c * jax.nn.sigmoid(fg + 1.0) + jnp.tanh(i) * jax.nn.sigmoid(ig)
    new_h = jnp.tanh(new_c) * jax.nn.sigmoid(og)
    return new_h, new_c


def lstm_sequence_ref(x_seq, h0, c0, w_in_t, b, w_rec_t):
    def step(carry, x):
        h, c = carry
        h, c = lstm_cell_ref(x, h, c, w_in_t, b, w_rec_t)
        return (h, c), (h, c)
    _, (hs, cs) = lax.scan(step, (h0, c0), x_seq)
    return hs, cs


if __name__ == "__main__":
    B, D, H, T = 4, 16, 32, 8
    key = jax.random.PRNGKey(0)
    kp, kx, kh, kc = jax.random.split(key, 4)

    w_in_t, b_in, w_rec_t = init_params(kp, D, H)
    x_seq = jax.random.normal(kx, (T, B, D), jnp.float32)
    h0 = jax.random.normal(kh, (B, H), jnp.float32)
    c0 = jax.random.normal(kc, (B, H), jnp.float32)

    ref_hs, ref_cs = lstm_sequence_ref(x_seq, h0, c0, w_in_t, b_in, w_rec_t)

    # f32 validation path (tight check against the f32 reference).
    h_seq, c_seq = lstm_sequence(x_seq, h0, c0, w_in_t, b_in, w_rec_t,
                                 mxu_dtype=jnp.float32)
    jax.block_until_ready((h_seq, c_seq))
    assert jnp.allclose(h_seq, ref_hs, atol=1e-4, rtol=1e-4)
    assert jnp.allclose(c_seq, ref_cs, atol=1e-4, rtol=1e-4)

    # Default fast path: bf16 MXU operands, f32 accumulation / gate math / carry.
    # bf16 re-quantization of h compounds over T, hence the loose tolerance.
    h_bf, c_bf = lstm_sequence(x_seq, h0, c0, w_in_t, b_in, w_rec_t)
    jax.block_until_ready((h_bf, c_bf))
    assert jnp.allclose(h_bf, ref_hs, atol=5e-2, rtol=5e-2)
    assert jnp.allclose(c_bf, ref_cs, atol=5e-2, rtol=5e-2)

    # Single-step forward (the torch module's forward()), f32 path.
    h1, c1 = lstm_cell(x_seq[0], h0, c0, w_in_t, b_in, w_rec_t,
                       mxu_dtype=jnp.float32)
    jax.block_until_ready((h1, c1))
    ref_h1, ref_c1 = lstm_cell_ref(x_seq[0], h0, c0, w_in_t, b_in, w_rec_t)
    assert jnp.allclose(h1, ref_h1, atol=1e-4, rtol=1e-4)
    assert jnp.allclose(c1, ref_c1, atol=1e-4, rtol=1e-4)

    print("KERNEL_OK")
</pallas_src>

<mosaic_0001>
module attributes {stable_mosaic.version = 11 : i64} {
  func.func @_lstm_seq_kernel(%arg0: i32, %arg1: i32, %arg2: memref<8x8x512xf32, #tpu.memory_space<vmem>>, %arg3: memref<8x128xf32, #tpu.memory_space<vmem>>, %arg4: memref<8x128xf32, #tpu.memory_space<vmem>>, %arg5: memref<4x128x128xf32, #tpu.memory_space<vmem>>, %arg6: memref<8x8x128xf32, #tpu.memory_space<vmem>>, %arg7: memref<8x8x128xf32, #tpu.memory_space<vmem>>, %arg8: memref<8x128xf32, #tpu.memory_space<vmem>>, %arg9: memref<8x128xf32, #tpu.memory_space<vmem>>) attributes {dimension_semantics = [#tpu.dimension_semantics<parallel>, #tpu.dimension_semantics<arbitrary>], iteration_bounds = array<i64: 1, 1>, scalar_prefetch = 0 : i64, scratch_operands = 2 : i64, tpu.core_type = #tpu.core_type<tc>, window_params = [{transform_indices = @transform_0, window_bounds = array<i64: 8, 8, 512>}, {transform_indices = @transform_1, window_bounds = array<i64: 8, 128>}, {transform_indices = @transform_2, window_bounds = array<i64: 8, 128>}, {pipeline_mode = #tpu.pipeline_mode<synchronous>, transform_indices = @transform_3, window_bounds = array<i64: 4, 128, 128>}, {transform_indices = @transform_4, window_bounds = array<i64: 8, 8, 128>}, {transform_indices = @transform_5, window_bounds = array<i64: 8, 8, 128>}]} {
    %c0_i32 = arith.constant 0 : i32
    %0 = arith.cmpi eq, %arg1, %c0_i32 : i32
    %1 = arith.extui %0 : i1 to i32
    %c0_i32_0 = arith.constant 0 : i32
    %2 = arith.cmpi ne, %1, %c0_i32_0 : i32
    scf.if %2 {
      %c0_205 = arith.constant 0 : index
      %c0_206 = arith.constant 0 : index
      %423 = vector.load %arg3[%c0_205, %c0_206] : memref<8x128xf32, #tpu.memory_space<vmem>>, vector<8x128xf32>
      %c0_207 = arith.constant 0 : index
      %c0_208 = arith.constant 0 : index
      %424 = vector.load %arg8[%c0_207, %c0_208] : memref<8x128xf32, #tpu.memory_space<vmem>>, vector<8x128xf32>
      tpu.vector_store %arg8[%c0_207, %c0_208], %423 {strides = array<i32>} : memref<8x128xf32, #tpu.memory_space<vmem>>, vector<8x128xf32>,
      %c0_209 = arith.constant 0 : index
      %c0_210 = arith.constant 0 : index
      %425 = vector.load %arg4[%c0_209, %c0_210] : memref<8x128xf32, #tpu.memory_space<vmem>>, vector<8x128xf32>
      %c0_211 = arith.constant 0 : index
      %c0_212 = arith.constant 0 : index
      %426 = vector.load %arg9[%c0_211, %c0_212] : memref<8x128xf32, #tpu.memory_space<vmem>>, vector<8x128xf32>
      tpu.vector_store %arg9[%c0_211, %c0_212], %425 {strides = array<i32>} : memref<8x128xf32, #tpu.memory_space<vmem>>, vector<8x128xf32>,
    } else {
    }
    %c0 = arith.constant 0 : index
    %c0_1 = arith.constant 0 : index
    %3 = vector.load %arg8[%c0, %c0_1] : memref<8x128xf32, #tpu.memory_space<vmem>>, vector<8x128xf32>
    %c0_2 = arith.constant 0 : index
    %c0_3 = arith.constant 0 : index
    %4 = vector.load %arg9[%c0_2, %c0_3] : memref<8x128xf32, #tpu.memory_space<vmem>>, vector<8x128xf32>
    %c0_i32_4 = arith.constant 0 : i32
    %5 = arith.index_cast %c0_i32_4 : i32 to index
    %c0_5 = arith.constant 0 : index
    %c0_6 = arith.constant 0 : index
    %6 = vector.load %arg2[%5, %c0_5, %c0_6] : memref<8x8x512xf32, #tpu.memory_space<vmem>>, vector<1x8x512xf32>
    %7 = vector.shape_cast %6 : vector<1x8x512xf32> to vector<8x512xf32>
    %8 = vector.extract_strided_slice %7 {offsets = [0, 0], sizes = [8, 128], strides = [1, 1]} : vector<8x512xf32> to vector<8x128xf32>
    %c0_7 = arith.constant 0 : index
    %c0_8 = arith.constant 0 : index
    %c0_9 = arith.constant 0 : index
    %9 = vector.load %arg5[%c0_7, %c0_8, %c0_9] : memref<4x128x128xf32, #tpu.memory_space<vmem>>, vector<1x128x128xf32>
    %10 = vector.shape_cast %9 : vector<1x128x128xf32> to vector<128x128xf32>
    %cst = arith.constant dense<0.000000e+00> : vector<8x128xf32>
    %11 = tpu.matmul %3, %10, %cst {dimension_numbers = #tpu.dot_dimension_numbers<[1], [0], [0], [1], [0, 0, 1, 1], [], []>} : vector<8x128xf32>, vector<128x128xf32>, vector<8x128xf32> -> vector<8x128xf32>
    %12 = arith.addf %8, %11 : vector<8x128xf32>
    %13 = math.tanh %12 : vector<8x128xf32>
    %14 = vector.extract_strided_slice %7 {offsets = [0, 128], sizes = [8, 128], strides = [1, 1]} : vector<8x512xf32> to vector<8x128xf32>
    %c1 = arith.constant 1 : index
    %c0_10 = arith.constant 0 : index
    %c0_11 = arith.constant 0 : index
    %15 = vector.load %arg5[%c1, %c0_10, %c0_11] : memref<4x128x128xf32, #tpu.memory_space<vmem>>, vector<1x128x128xf32>
    %16 = vector.shape_cast %15 : vector<1x128x128xf32> to vector<128x128xf32>
    %cst_12 = arith.constant dense<0.000000e+00> : vector<8x128xf32>
    %17 = tpu.matmul %3, %16, %cst_12 {dimension_numbers = #tpu.dot_dimension_numbers<[1], [0], [0], [1], [0, 0, 1, 1], [], []>} : vector<8x128xf32>, vector<128x128xf32>, vector<8x128xf32> -> vector<8x128xf32>
    %18 = arith.addf %14, %17 : vector<8x128xf32>
    %19 = arith.negf %18 : vector<8x128xf32>
    %20 = math.exp %19 : vector<8x128xf32>
    %cst_13 = arith.constant 1.000000e+00 : f32
    %21 = vector.broadcast %cst_13 : f32 to vector<8x128xf32>
    %22 = arith.addf %21, %20 : vector<8x128xf32>
    %23 = arith.divf %21, %22 : vector<8x128xf32>
    %24 = vector.extract_strided_slice %7 {offsets = [0, 256], sizes = [8, 128], strides = [1, 1]} : vector<8x512xf32> to vector<8x128xf32>
    %c2 = arith.constant 2 : index
    %c0_14 = arith.constant 0 : index
    %c0_15 = arith.constant 0 : index
    %25 = vector.load %arg5[%c2, %c0_14, %c0_15] : memref<4x128x128xf32, #tpu.memory_space<vmem>>, vector<1x128x128xf32>
    %26 = vector.shape_cast %25 : vector<1x128x128xf32> to vector<128x128xf32>
    %cst_16 = arith.constant dense<0.000000e+00> : vector<8x128xf32>
    %27 = tpu.matmul %3, %26, %cst_16 {dimension_numbers = #tpu.dot_dimension_numbers<[1], [0], [0], [1], [0, 0, 1, 1], [], []>} : vector<8x128xf32>, vector<128x128xf32>, vector<8x128xf32> -> vector<8x128xf32>
    %28 = arith.addf %24, %27 : vector<8x128xf32>
    %29 = arith.negf %28 : vector<8x128xf32>
    %30 = math.exp %29 : vector<8x128xf32>
    %cst_17 = arith.constant 1.000000e+00 : f32
    %31 = vector.broadcast %cst_17 : f32 to vector<8x128xf32>
    %32 = arith.addf %31, %30 : vector<8x128xf32>
    %33 = arith.divf %31, %32 : vector<8x128xf32>
    %34 = vector.extract_strided_slice %7 {offsets = [0, 384], sizes = [8, 128], strides = [1, 1]} : vector<8x512xf32> to vector<8x128xf32>
    %c3 = arith.constant 3 : index
    %c0_18 = arith.constant 0 : index
    %c0_19 = arith.constant 0 : index
    %35 = vector.load %arg5[%c3, %c0_18, %c0_19] : memref<4x128x128xf32, #tpu.memory_space<vmem>>, vector<1x128x128xf32>
    %36 = vector.shape_cast %35 : vector<1x128x128xf32> to vector<128x128xf32>
    %cst_20 = arith.constant dense<0.000000e+00> : vector<8x128xf32>
    %37 = tpu.matmul %3, %36, %cst_20 {dimension_numbers = #tpu.dot_dimension_numbers<[1], [0], [0], [1], [0, 0, 1, 1], [], []>} : vector<8x128xf32>, vector<128x128xf32>, vector<8x128xf32> -> vector<8x128xf32>
    %38 = arith.addf %34, %37 : vector<8x128xf32>
    %39 = arith.negf %38 : vector<8x128xf32>
    %40 = math.exp %39 : vector<8x128xf32>
    %cst_21 = arith.constant 1.000000e+00 : f32
    %41 = vector.broadcast %cst_21 : f32 to vector<8x128xf32>
    %42 = arith.addf %41, %40 : vector<8x128xf32>
    %43 = arith.divf %41, %42 : vector<8x128xf32>
    %44 = arith.mulf %4, %33 : vector<8x128xf32>
    %45 = arith.mulf %13, %23 : vector<8x128xf32>
    %46 = arith.addf %44, %45 : vector<8x128xf32>
    %47 = math.tanh %46 : vector<8x128xf32>
    %48 = arith.mulf %47, %43 : vector<8x128xf32>
    %49 = arith.index_cast %c0_i32_4 : i32 to index
    %c0_22 = arith.constant 0 : index
    %c0_23 = arith.constant 0 : index
    %50 = vector.load %arg6[%49, %c0_22, %c0_23] : memref<8x8x128xf32, #tpu.memory_space<vmem>>, vector<1x8x128xf32>
    %51 = vector.shape_cast %50 : vector<1x8x128xf32> to vector<8x128xf32>
    %52 = vector.shape_cast %48 : vector<8x128xf32> to vector<1x8x128xf32>
    tpu.vector_store %arg6[%49, %c0_22, %c0_23], %52 {strides = array<i32>} : memref<8x8x128xf32, #tpu.memory_space<vmem>>, vector<1x8x128xf32>,
    %53 = arith.index_cast %c0_i32_4 : i32 to index
    %c0_24 = arith.constant 0 : index
    %c0_25 = arith.constant 0 : index
    %54 = vector.load %arg7[%53, %c0_24, %c0_25] : memref<8x8x128xf32, #tpu.memory_space<vmem>>, vector<1x8x128xf32>
    %55 = vector.shape_cast %54 : vector<1x8x128xf32> to vector<8x128xf32>
    %56 = vector.shape_cast %46 : vector<8x128xf32> to vector<1x8x128xf32>
    tpu.vector_store %arg7[%53, %c0_24, %c0_25], %56 {strides = array<i32>} : memref<8x8x128xf32, #tpu.memory_space<vmem>>, vector<1x8x128xf32>,
    %c1_i32 = arith.constant 1 : i32
    %57 = arith.index_cast %c1_i32 : i32 to index
    %c0_26 = arith.constant 0 : index
    %c0_27 = arith.constant 0 : index
    %58 = vector.load %arg2[%57, %c0_26, %c0_27] : memref<8x8x512xf32, #tpu.memory_space<vmem>>, vector<1x8x512xf32>
    %59 = vector.shape_cast %58 : vector<1x8x512xf32> to vector<8x512xf32>
    %60 = vector.extract_strided_slice %59 {offsets = [0, 0], sizes = [8, 128], strides = [1, 1]} : vector<8x512xf32> to vector<8x128xf32>
    %c0_28 = arith.constant 0 : index
    %c0_29 = arith.constant 0 : index
    %c0_30 = arith.constant 0 : index
    %61 = vector.load %arg5[%c0_28, %c0_29, %c0_30] : memref<4x128x128xf32, #tpu.memory_space<vmem>>, vector<1x128x128xf32>
    %62 = vector.shape_cast %61 : vector<1x128x128xf32> to vector<128x128xf32>
    %cst_31 = arith.constant dense<0.000000e+00> : vector<8x128xf32>
    %63 = tpu.matmul %48, %62, %cst_31 {dimension_numbers = #tpu.dot_dimension_numbers<[1], [0], [0], [1], [0, 0, 1, 1], [], []>} : vector<8x128xf32>, vector<128x128xf32>, vector<8x128xf32> -> vector<8x128xf32>
    %64 = arith.addf %60, %63 : vector<8x128xf32>
    %65 = math.tanh %64 : vector<8x128xf32>
    %66 = vector.extract_strided_slice %59 {offsets = [0, 128], sizes = [8, 128], strides = [1, 1]} : vector<8x512xf32> to vector<8x128xf32>
    %c1_32 = arith.constant 1 : index
    %c0_33 = arith.constant 0 : index
    %c0_34 = arith.constant 0 : index
    %67 = vector.load %arg5[%c1_32, %c0_33, %c0_34] : memref<4x128x128xf32, #tpu.memory_space<vmem>>, vector<1x128x128xf32>
    %68 = vector.shape_cast %67 : vector<1x128x128xf32> to vector<128x128xf32>
    %cst_35 = arith.constant dense<0.000000e+00> : vector<8x128xf32>
    %69 = tpu.matmul %48, %68, %cst_35 {dimension_numbers = #tpu.dot_dimension_numbers<[1], [0], [0], [1], [0, 0, 1, 1], [], []>} : vector<8x128xf32>, vector<128x128xf32>, vector<8x128xf32> -> vector<8x128xf32>
    %70 = arith.addf %66, %69 : vector<8x128xf32>
    %71 = arith.negf %70 : vector<8x128xf32>
    %72 = math.exp %71 : vector<8x128xf32>
    %cst_36 = arith.constant 1.000000e+00 : f32
    %73 = vector.broadcast %cst_36 : f32 to vector<8x128xf32>
    %74 = arith.addf %73, %72 : vector<8x128xf32>
    %75 = arith.divf %73, %74 : vector<8x128xf32>
    %76 = vector.extract_strided_slice %59 {offsets = [0, 256], sizes = [8, 128], strides = [1, 1]} : vector<8x512xf32> to vector<8x128xf32>
    %c2_37 = arith.constant 2 : index
    %c0_38 = arith.constant 0 : index
    %c0_39 = arith.constant 0 : index
    %77 = vector.load %arg5[%c2_37, %c0_38, %c0_39] : memref<4x128x128xf32, #tpu.memory_space<vmem>>, vector<1x128x128xf32>
    %78 = vector.shape_cast %77 : vector<1x128x128xf32> to vector<128x128xf32>
    %cst_40 = arith.constant dense<0.000000e+00> : vector<8x128xf32>
    %79 = tpu.matmul %48, %78, %cst_40 {dimension_numbers = #tpu.dot_dimension_numbers<[1], [0], [0], [1], [0, 0, 1, 1], [], []>} : vector<8x128xf32>, vector<128x128xf32>, vector<8x128xf32> -> vector<8x128xf32>
    %80 = arith.addf %76, %79 : vector<8x128xf32>
    %81 = arith.negf %80 : vector<8x128xf32>
    %82 = math.exp %81 : vector<8x128xf32>
    %cst_41 = arith.constant 1.000000e+00 : f32
    %83 = vector.broadcast %cst_41 : f32 to vector<8x128xf32>
    %84 = arith.addf %83, %82 : vector<8x128xf32>
    %85 = arith.divf %83, %84 : vector<8x128xf32>
    %86 = vector.extract_strided_slice %59 {offsets = [0, 384], sizes = [8, 128], strides = [1, 1]} : vector<8x512xf32> to vector<8x128xf32>
    %c3_42 = arith.constant 3 : index
    %c0_43 = arith.constant 0 : index
    %c0_44 = arith.constant 0 : index
    %87 = vector.load %arg5[%c3_42, %c0_43, %c0_44] : memref<4x128x128xf32, #tpu.memory_space<vmem>>, vector<1x128x128xf32>
    %88 = vector.shape_cast %87 : vector<1x128x128xf32> to vector<128x128xf32>
    %cst_45 = arith.constant dense<0.000000e+00> : vector<8x128xf32>
    %89 = tpu.matmul %48, %88, %cst_45 {dimension_numbers = #tpu.dot_dimension_numbers<[1], [0], [0], [1], [0, 0, 1, 1], [], []>} : vector<8x128xf32>, vector<128x128xf32>, vector<8x128xf32> -> vector<8x128xf32>
    %90 = arith.addf %86, %89 : vector<8x128xf32>
    %91 = arith.negf %90 : vector<8x128xf32>
    %92 = math.exp %91 : vector<8x128xf32>
    %cst_46 = arith.constant 1.000000e+00 : f32
    %93 = vector.broadcast %cst_46 : f32 to vector<8x128xf32>
    %94 = arith.addf %93, %92 : vector<8x128xf32>
    %95 = arith.divf %93, %94 : vector<8x128xf32>
    %96 = arith.mulf %46, %85 : vector<8x128xf32>
    %97 = arith.mulf %65, %75 : vector<8x128xf32>
    %98 = arith.addf %96, %97 : vector<8x128xf32>
    %99 = math.tanh %98 : vector<8x128xf32>
    %100 = arith.mulf %99, %95 : vector<8x128xf32>
    %101 = arith.index_cast %c1_i32 : i32 to index
    %c0_47 = arith.constant 0 : index
    %c0_48 = arith.constant 0 : index
    %102 = vector.load %arg6[%101, %c0_47, %c0_48] : memref<8x8x128xf32, #tpu.memory_space<vmem>>, vector<1x8x128xf32>
    %103 = vector.shape_cast %102 : vector<1x8x128xf32> to vector<8x128xf32>
    %104 = vector.shape_cast %100 : vector<8x128xf32> to vector<1x8x128xf32>
    tpu.vector_store %arg6[%101, %c0_47, %c0_48], %104 {strides = array<i32>} : memref<8x8x128xf32, #tpu.memory_space<vmem>>, vector<1x8x128xf32>,
    %105 = arith.index_cast %c1_i32 : i32 to index
    %c0_49 = arith.constant 0 : index
    %c0_50 = arith.constant 0 : index
    %106 = vector.load %arg7[%105, %c0_49, %c0_50] : memref<8x8x128xf32, #tpu.memory_space<vmem>>, vector<1x8x128xf32>
    %107 = vector.shape_cast %106 : vector<1x8x128xf32> to vector<8x128xf32>
    %108 = vector.shape_cast %98 : vector<8x128xf32> to vector<1x8x128xf32>
    tpu.vector_store %arg7[%105, %c0_49, %c0_50], %108 {strides = array<i32>} : memref<8x8x128xf32, #tpu.memory_space<vmem>>, vector<1x8x128xf32>,
    %c2_i32 = arith.constant 2 : i32
    %109 = arith.index_cast %c2_i32 : i32 to index
    %c0_51 = arith.constant 0 : index
    %c0_52 = arith.constant 0 : index
    %110 = vector.load %arg2[%109, %c0_51, %c0_52] : memref<8x8x512xf32, #tpu.memory_space<vmem>>, vector<1x8x512xf32>
    %111 = vector.shape_cast %110 : vector<1x8x512xf32> to vector<8x512xf32>
    %112 = vector.extract_strided_slice %111 {offsets = [0, 0], sizes = [8, 128], strides = [1, 1]} : vector<8x512xf32> to vector<8x128xf32>
    %c0_53 = arith.constant 0 : index
    %c0_54 = arith.constant 0 : index
    %c0_55 = arith.constant 0 : index
    %113 = vector.load %arg5[%c0_53, %c0_54, %c0_55] : memref<4x128x128xf32, #tpu.memory_space<vmem>>, vector<1x128x128xf32>
    %114 = vector.shape_cast %113 : vector<1x128x128xf32> to vector<128x128xf32>
    %cst_56 = arith.constant dense<0.000000e+00> : vector<8x128xf32>
    %115 = tpu.matmul %100, %114, %cst_56 {dimension_numbers = #tpu.dot_dimension_numbers<[1], [0], [0], [1], [0, 0, 1, 1], [], []>} : vector<8x128xf32>, vector<128x128xf32>, vector<8x128xf32> -> vector<8x128xf32>
    %116 = arith.addf %112, %115 : vector<8x128xf32>
    %117 = math.tanh %116 : vector<8x128xf32>
    %118 = vector.extract_strided_slice %111 {offsets = [0, 128], sizes = [8, 128], strides = [1, 1]} : vector<8x512xf32> to vector<8x128xf32>
    %c1_57 = arith.constant 1 : index
    %c0_58 = arith.constant 0 : index
    %c0_59 = arith.constant 0 : index
    %119 = vector.load %arg5[%c1_57, %c0_58, %c0_59] : memref<4x128x128xf32, #tpu.memory_space<vmem>>, vector<1x128x128xf32>
    %120 = vector.shape_cast %119 : vector<1x128x128xf32> to vector<128x128xf32>
    %cst_60 = arith.constant dense<0.000000e+00> : vector<8x128xf32>
    %121 = tpu.matmul %100, %120, %cst_60 {dimension_numbers = #tpu.dot_dimension_numbers<[1], [0], [0], [1], [0, 0, 1, 1], [], []>} : vector<8x128xf32>, vector<128x128xf32>, vector<8x128xf32> -> vector<8x128xf32>
    %122 = arith.addf %118, %121 : vector<8x128xf32>
    %123 = arith.negf %122 : vector<8x128xf32>
    %124 = math.exp %123 : vector<8x128xf32>
    %cst_61 = arith.constant 1.000000e+00 : f32
    %125 = vector.broadcast %cst_61 : f32 to vector<8x128xf32>
    %126 = arith.addf %125, %124 : vector<8x128xf32>
    %127 = arith.divf %125, %126 : vector<8x128xf32>
    %128 = vector.extract_strided_slice %111 {offsets = [0, 256], sizes = [8, 128], strides = [1, 1]} : vector<8x512xf32> to vector<8x128xf32>
    %c2_62 = arith.constant 2 : index
    %c0_63 = arith.constant 0 : index
    %c0_64 = arith.constant 0 : index
    %129 = vector.load %arg5[%c2_62, %c0_63, %c0_64] : memref<4x128x128xf32, #tpu.memory_space<vmem>>, vector<1x128x128xf32>
    %130 = vector.shape_cast %129 : vector<1x128x128xf32> to vector<128x128xf32>
    %cst_65 = arith.constant dense<0.000000e+00> : vector<8x128xf32>
    %131 = tpu.matmul %100, %130, %cst_65 {dimension_numbers = #tpu.dot_dimension_numbers<[1], [0], [0], [1], [0, 0, 1, 1], [], []>} : vector<8x128xf32>, vector<128x128xf32>, vector<8x128xf32> -> vector<8x128xf32>
    %132 = arith.addf %128, %131 : vector<8x128xf32>
    %133 = arith.negf %132 : vector<8x128xf32>
    %134 = math.exp %133 : vector<8x128xf32>
    %cst_66 = arith.constant 1.000000e+00 : f32
    %135 = vector.broadcast %cst_66 : f32 to vector<8x128xf32>
    %136 = arith.addf %135, %134 : vector<8x128xf32>
    %137 = arith.divf %135, %136 : vector<8x128xf32>
    %138 = vector.extract_strided_slice %111 {offsets = [0, 384], sizes = [8, 128], strides = [1, 1]} : vector<8x512xf32> to vector<8x128xf32>
    %c3_67 = arith.constant 3 : index
    %c0_68 = arith.constant 0 : index
    %c0_69 = arith.constant 0 : index
    %139 = vector.load %arg5[%c3_67, %c0_68, %c0_69] : memref<4x128x128xf32, #tpu.memory_space<vmem>>, vector<1x128x128xf32>
    %140 = vector.shape_cast %139 : vector<1x128x128xf32> to vector<128x128xf32>
    %cst_70 = arith.constant dense<0.000000e+00> : vector<8x128xf32>
    %141 = tpu.matmul %100, %140, %cst_70 {dimension_numbers = #tpu.dot_dimension_numbers<[1], [0], [0], [1], [0, 0, 1, 1], [], []>} : vector<8x128xf32>, vector<128x128xf32>, vector<8x128xf32> -> vector<8x128xf32>
    %142 = arith.addf %138, %141 : vector<8x128xf32>
    %143 = arith.negf %142 : vector<8x128xf32>
    %144 = math.exp %143 : vector<8x128xf32>
    %cst_71 = arith.constant 1.000000e+00 : f32
    %145 = vector.broadcast %cst_71 : f32 to vector<8x128xf32>
    %146 = arith.addf %145, %144 : vector<8x128xf32>
    %147 = arith.divf %145, %146 : vector<8x128xf32>
    %148 = arith.mulf %98, %137 : vector<8x128xf32>
    %149 = arith.mulf %117, %127 : vector<8x128xf32>
    %150 = arith.addf %148, %149 : vector<8x128xf32>
    %151 = math.tanh %150 : vector<8x128xf32>
    %152 = arith.mulf %151, %147 : vector<8x128xf32>
    %153 = arith.index_cast %c2_i32 : i32 to index
    %c0_72 = arith.constant 0 : index
    %c0_73 = arith.constant 0 : index
    %154 = vector.load %arg6[%153, %c0_72, %c0_73] : memref<8x8x128xf32, #tpu.memory_space<vmem>>, vector<1x8x128xf32>
    %155 = vector.shape_cast %154 : vector<1x8x128xf32> to vector<8x128xf32>
    %156 = vector.shape_cast %152 : vector<8x128xf32> to vector<1x8x128xf32>
    tpu.vector_store %arg6[%153, %c0_72, %c0_73], %156 {strides = array<i32>} : memref<8x8x128xf32, #tpu.memory_space<vmem>>, vector<1x8x128xf32>,
    %157 = arith.index_cast %c2_i32 : i32 to index
    %c0_74 = arith.constant 0 : index
    %c0_75 = arith.constant 0 : index
    %158 = vector.load %arg7[%157, %c0_74, %c0_75] : memref<8x8x128xf32, #tpu.memory_space<vmem>>, vector<1x8x128xf32>
    %159 = vector.shape_cast %158 : vector<1x8x128xf32> to vector<8x128xf32>
    %160 = vector.shape_cast %150 : vector<8x128xf32> to vector<1x8x128xf32>
    tpu.vector_store %arg7[%157, %c0_74, %c0_75], %160 {strides = array<i32>} : memref<8x8x128xf32, #tpu.memory_space<vmem>>, vector<1x8x128xf32>,
    %c3_i32 = arith.constant 3 : i32
    %161 = arith.index_cast %c3_i32 : i32 to index
    %c0_76 = arith.constant 0 : index
    %c0_77 = arith.constant 0 : index
    %162 = vector.load %arg2[%161, %c0_76, %c0_77] : memref<8x8x512xf32, #tpu.memory_space<vmem>>, vector<1x8x512xf32>
    %163 = vector.shape_cast %162 : vector<1x8x512xf32> to vector<8x512xf32>
    %164 = vector.extract_strided_slice %163 {offsets = [0, 0], sizes = [8, 128], strides = [1, 1]} : vector<8x512xf32> to vector<8x128xf32>
    %c0_78 = arith.constant 0 : index
    %c0_79 = arith.constant 0 : index
    %c0_80 = arith.constant 0 : index
    %165 = vector.load %arg5[%c0_78, %c0_79, %c0_80] : memref<4x128x128xf32, #tpu.memory_space<vmem>>, vector<1x128x128xf32>
    %166 = vector.shape_cast %165 : vector<1x128x128xf32> to vector<128x128xf32>
    %cst_81 = arith.constant dense<0.000000e+00> : vector<8x128xf32>
    %167 = tpu.matmul %152, %166, %cst_81 {dimension_numbers = #tpu.dot_dimension_numbers<[1], [0], [0], [1], [0, 0, 1, 1], [], []>} : vector<8x128xf32>, vector<128x128xf32>, vector<8x128xf32> -> vector<8x128xf32>
    %168 = arith.addf %164, %167 : vector<8x128xf32>
    %169 = math.tanh %168 : vector<8x128xf32>
    %170 = vector.extract_strided_slice %163 {offsets = [0, 128], sizes = [8, 128], strides = [1, 1]} : vector<8x512xf32> to vector<8x128xf32>
    %c1_82 = arith.constant 1 : index
    %c0_83 = arith.constant 0 : index
    %c0_84 = arith.constant 0 : index
    %171 = vector.load %arg5[%c1_82, %c0_83, %c0_84] : memref<4x128x128xf32, #tpu.memory_space<vmem>>, vector<1x128x128xf32>
    %172 = vector.shape_cast %171 : vector<1x128x128xf32> to vector<128x128xf32>
    %cst_85 = arith.constant dense<0.000000e+00> : vector<8x128xf32>
    %173 = tpu.matmul %152, %172, %cst_85 {dimension_numbers = #tpu.dot_dimension_numbers<[1], [0], [0], [1], [0, 0, 1, 1], [], []>} : vector<8x128xf32>, vector<128x128xf32>, vector<8x128xf32> -> vector<8x128xf32>
    %174 = arith.addf %170, %173 : vector<8x128xf32>
    %175 = arith.negf %174 : vector<8x128xf32>
    %176 = math.exp %175 : vector<8x128xf32>
    %cst_86 = arith.constant 1.000000e+00 : f32
    %177 = vector.broadcast %cst_86 : f32 to vector<8x128xf32>
    %178 = arith.addf %177, %176 : vector<8x128xf32>
    %179 = arith.divf %177, %178 : vector<8x128xf32>
    %180 = vector.extract_strided_slice %163 {offsets = [0, 256], sizes = [8, 128], strides = [1, 1]} : vector<8x512xf32> to vector<8x128xf32>
    %c2_87 = arith.constant 2 : index
    %c0_88 = arith.constant 0 : index
    %c0_89 = arith.constant 0 : index
    %181 = vector.load %arg5[%c2_87, %c0_88, %c0_89] : memref<4x128x128xf32, #tpu.memory_space<vmem>>, vector<1x128x128xf32>
    %182 = vector.shape_cast %181 : vector<1x128x128xf32> to vector<128x128xf32>
    %cst_90 = arith.constant dense<0.000000e+00> : vector<8x128xf32>
    %183 = tpu.matmul %152, %182, %cst_90 {dimension_numbers = #tpu.dot_dimension_numbers<[1], [0], [0], [1], [0, 0, 1, 1], [], []>} : vector<8x128xf32>, vector<128x128xf32>, vector<8x128xf32> -> vector<8x128xf32>
    %184 = arith.addf %180, %183 : vector<8x128xf32>
    %185 = arith.negf %184 : vector<8x128xf32>
    %186 = math.exp %185 : vector<8x128xf32>
    %cst_91 = arith.constant 1.000000e+00 : f32
    %187 = vector.broadcast %cst_91 : f32 to vector<8x128xf32>
    %188 = arith.addf %187, %186 : vector<8x128xf32>
    %189 = arith.divf %187, %188 : vector<8x128xf32>
    %190 = vector.extract_strided_slice %163 {offsets = [0, 384], sizes = [8, 128], strides = [1, 1]} : vector<8x512xf32> to vector<8x128xf32>
    %c3_92 = arith.constant 3 : index
    %c0_93 = arith.constant 0 : index
    %c0_94 = arith.constant 0 : index
    %191 = vector.load %arg5[%c3_92, %c0_93, %c0_94] : memref<4x128x128xf32, #tpu.memory_space<vmem>>, vector<1x128x128xf32>
    %192 = vector.shape_cast %191 : vector<1x128x128xf32> to vector<128x128xf32>
    %cst_95 = arith.constant dense<0.000000e+00> : vector<8x128xf32>
    %193 = tpu.matmul %152, %192, %cst_95 {dimension_numbers = #tpu.dot_dimension_numbers<[1], [0], [0], [1], [0, 0, 1, 1], [], []>} : vector<8x128xf32>, vector<128x128xf32>, vector<8x128xf32> -> vector<8x128xf32>
    %194 = arith.addf %190, %193 : vector<8x128xf32>
    %195 = arith.negf %194 : vector<8x128xf32>
    %196 = math.exp %195 : vector<8x128xf32>
    %cst_96 = arith.constant 1.000000e+00 : f32
    %197 = vector.broadcast %cst_96 : f32 to vector<8x128xf32>
    %198 = arith.addf %197, %196 : vector<8x128xf32>
    %199 = arith.divf %197, %198 : vector<8x128xf32>
    %200 = arith.mulf %150, %189 : vector<8x128xf32>
    %201 = arith.mulf %169, %179 : vector<8x128xf32>
    %202 = arith.addf %200, %201 : vector<8x128xf32>
    %203 = math.tanh %202 : vector<8x128xf32>
    %204 = arith.mulf %203, %199 : vector<8x128xf32>
    %205 = arith.index_cast %c3_i32 : i32 to index
    %c0_97 = arith.constant 0 : index
    %c0_98 = arith.constant 0 : index
    %206 = vector.load %arg6[%205, %c0_97, %c0_98] : memref<8x8x128xf32, #tpu.memory_space<vmem>>, vector<1x8x128xf32>
    %207 = vector.shape_cast %206 : vector<1x8x128xf32> to vector<8x128xf32>
    %208 = vector.shape_cast %204 : vector<8x128xf32> to vector<1x8x128xf32>
    tpu.vector_store %arg6[%205, %c0_97, %c0_98], %208 {strides = array<i32>} : memref<8x8x128xf32, #tpu.memory_space<vmem>>, vector<1x8x128xf32>,
    %209 = arith.index_cast %c3_i32 : i32 to index
    %c0_99 = arith.constant 0 : index
    %c0_100 = arith.constant 0 : index
    %210 = vector.load %arg7[%209, %c0_99, %c0_100] : memref<8x8x128xf32, #tpu.memory_space<vmem>>, vector<1x8x128xf32>
    %211 = vector.shape_cast %210 : vector<1x8x128xf32> to vector<8x128xf32>
    %212 = vector.shape_cast %202 : vector<8x128xf32> to vector<1x8x128xf32>
    tpu.vector_store %arg7[%209, %c0_99, %c0_100], %212 {strides = array<i32>} : memref<8x8x128xf32, #tpu.memory_space<vmem>>, vector<1x8x128xf32>,
    %c4_i32 = arith.constant 4 : i32
    %213 = arith.index_cast %c4_i32 : i32 to index
    %c0_101 = arith.constant 0 : index
    %c0_102 = arith.constant 0 : index
    %214 = vector.load %arg2[%213, %c0_101, %c0_102] : memref<8x8x512xf32, #tpu.memory_space<vmem>>, vector<1x8x512xf32>
    %215 = vector.shape_cast %214 : vector<1x8x512xf32> to vector<8x512xf32>
    %216 = vector.extract_strided_slice %215 {offsets = [0, 0], sizes = [8, 128], strides = [1, 1]} : vector<8x512xf32> to vector<8x128xf32>
    %c0_103 = arith.constant 0 : index
    %c0_104 = arith.constant 0 : index
    %c0_105 = arith.constant 0 : index
    %217 = vector.load %arg5[%c0_103, %c0_104, %c0_105] : memref<4x128x128xf32, #tpu.memory_space<vmem>>, vector<1x128x128xf32>
    %218 = vector.shape_cast %217 : vector<1x128x128xf32> to vector<128x128xf32>
    %cst_106 = arith.constant dense<0.000000e+00> : vector<8x128xf32>
    %219 = tpu.matmul %204, %218, %cst_106 {dimension_numbers = #tpu.dot_dimension_numbers<[1], [0], [0], [1], [0, 0, 1, 1], [], []>} : vector<8x128xf32>, vector<128x128xf32>, vector<8x128xf32> -> vector<8x128xf32>
    %220 = arith.addf %216, %219 : vector<8x128xf32>
    %221 = math.tanh %220 : vector<8x128xf32>
    %222 = vector.extract_strided_slice %215 {offsets = [0, 128], sizes = [8, 128], strides = [1, 1]} : vector<8x512xf32> to vector<8x128xf32>
    %c1_107 = arith.constant 1 : index
    %c0_108 = arith.constant 0 : index
    %c0_109 = arith.constant 0 : index
    %223 = vector.load %arg5[%c1_107, %c0_108, %c0_109] : memref<4x128x128xf32, #tpu.memory_space<vmem>>, vector<1x128x128xf32>
    %224 = vector.shape_cast %223 : vector<1x128x128xf32> to vector<128x128xf32>
    %cst_110 = arith.constant dense<0.000000e+00> : vector<8x128xf32>
    %225 = tpu.matmul %204, %224, %cst_110 {dimension_numbers = #tpu.dot_dimension_numbers<[1], [0], [0], [1], [0, 0, 1, 1], [], []>} : vector<8x128xf32>, vector<128x128xf32>, vector<8x128xf32> -> vector<8x128xf32>
    %226 = arith.addf %222, %225 : vector<8x128xf32>
    %227 = arith.negf %226 : vector<8x128xf32>
    %228 = math.exp %227 : vector<8x128xf32>
    %cst_111 = arith.constant 1.000000e+00 : f32
    %229 = vector.broadcast %cst_111 : f32 to vector<8x128xf32>
    %230 = arith.addf %229, %228 : vector<8x128xf32>
    %231 = arith.divf %229, %230 : vector<8x128xf32>
    %232 = vector.extract_strided_slice %215 {offsets = [0, 256], sizes = [8, 128], strides = [1, 1]} : vector<8x512xf32> to vector<8x128xf32>
    %c2_112 = arith.constant 2 : index
    %c0_113 = arith.constant 0 : index
    %c0_114 = arith.constant 0 : index
    %233 = vector.load %arg5[%c2_112, %c0_113, %c0_114] : memref<4x128x128xf32, #tpu.memory_space<vmem>>, vector<1x128x128xf32>
    %234 = vector.shape_cast %233 : vector<1x128x128xf32> to vector<128x128xf32>
    %cst_115 = arith.constant dense<0.000000e+00> : vector<8x128xf32>
    %235 = tpu.matmul %204, %234, %cst_115 {dimension_numbers = #tpu.dot_dimension_numbers<[1], [0], [0], [1], [0, 0, 1, 1], [], []>} : vector<8x128xf32>, vector<128x128xf32>, vector<8x128xf32> -> vector<8x128xf32>
    %236 = arith.addf %232, %235 : vector<8x128xf32>
    %237 = arith.negf %236 : vector<8x128xf32>
    %238 = math.exp %237 : vector<8x128xf32>
    %cst_116 = arith.constant 1.000000e+00 : f32
    %239 = vector.broadcast %cst_116 : f32 to vector<8x128xf32>
    %240 = arith.addf %239, %238 : vector<8x128xf32>
    %241 = arith.divf %239, %240 : vector<8x128xf32>
    %242 = vector.extract_strided_slice %215 {offsets = [0, 384], sizes = [8, 128], strides = [1, 1]} : vector<8x512xf32> to vector<8x128xf32>
    %c3_117 = arith.constant 3 : index
    %c0_118 = arith.constant 0 : index
    %c0_119 = arith.constant 0 : index
    %243 = vector.load %arg5[%c3_117, %c0_118, %c0_119] : memref<4x128x128xf32, #tpu.memory_space<vmem>>, vector<1x128x128xf32>
    %244 = vector.shape_cast %243 : vector<1x128x128xf32> to vector<128x128xf32>
    %cst_120 = arith.constant dense<0.000000e+00> : vector<8x128xf32>
    %245 = tpu.matmul %204, %244, %cst_120 {dimension_numbers = #tpu.dot_dimension_numbers<[1], [0], [0], [1], [0, 0, 1, 1], [], []>} : vector<8x128xf32>, vector<128x128xf32>, vector<8x128xf32> -> vector<8x128xf32>
    %246 = arith.addf %242, %245 : vector<8x128xf32>
    %247 = arith.negf %246 : vector<8x128xf32>
    %248 = math.exp %247 : vector<8x128xf32>
    %cst_121 = arith.constant 1.000000e+00 : f32
    %249 = vector.broadcast %cst_121 : f32 to vector<8x128xf32>
    %250 = arith.addf %249, %248 : vector<8x128xf32>
    %251 = arith.divf %249, %250 : vector<8x128xf32>
    %252 = arith.mulf %202, %241 : vector<8x128xf32>
    %253 = arith.mulf %221, %231 : vector<8x128xf32>
    %254 = arith.addf %252, %253 : vector<8x128xf32>
    %255 = math.tanh %254 : vector<8x128xf32>
    %256 = arith.mulf %255, %251 : vector<8x128xf32>
    %257 = arith.index_cast %c4_i32 : i32 to index
    %c0_122 = arith.constant 0 : index
    %c0_123 = arith.constant 0 : index
    %258 = vector.load %arg6[%257, %c0_122, %c0_123] : memref<8x8x128xf32, #tpu.memory_space<vmem>>, vector<1x8x128xf32>
    %259 = vector.shape_cast %258 : vector<1x8x128xf32> to vector<8x128xf32>
    %260 = vector.shape_cast %256 : vector<8x128xf32> to vector<1x8x128xf32>
    tpu.vector_store %arg6[%257, %c0_122, %c0_123], %260 {strides = array<i32>} : memref<8x8x128xf32, #tpu.memory_space<vmem>>, vector<1x8x128xf32>,
    %261 = arith.index_cast %c4_i32 : i32 to index
    %c0_124 = arith.constant 0 : index
    %c0_125 = arith.constant 0 : index
    %262 = vector.load %arg7[%261, %c0_124, %c0_125] : memref<8x8x128xf32, #tpu.memory_space<vmem>>, vector<1x8x128xf32>
    %263 = vector.shape_cast %262 : vector<1x8x128xf32> to vector<8x128xf32>
    %264 = vector.shape_cast %254 : vector<8x128xf32> to vector<1x8x128xf32>
    tpu.vector_store %arg7[%261, %c0_124, %c0_125], %264 {strides = array<i32>} : memref<8x8x128xf32, #tpu.memory_space<vmem>>, vector<1x8x128xf32>,
    %c5_i32 = arith.constant 5 : i32
    %265 = arith.index_cast %c5_i32 : i32 to index
    %c0_126 = arith.constant 0 : index
    %c0_127 = arith.constant 0 : index
    %266 = vector.load %arg2[%265, %c0_126, %c0_127] : memref<8x8x512xf32, #tpu.memory_space<vmem>>, vector<1x8x512xf32>
    %267 = vector.shape_cast %266 : vector<1x8x512xf32> to vector<8x512xf32>
    %268 = vector.extract_strided_slice %267 {offsets = [0, 0], sizes = [8, 128], strides = [1, 1]} : vector<8x512xf32> to vector<8x128xf32>
    %c0_128 = arith.constant 0 : index
    %c0_129 = arith.constant 0 : index
    %c0_130 = arith.constant 0 : index
    %269 = vector.load %arg5[%c0_128, %c0_129, %c0_130] : memref<4x128x128xf32, #tpu.memory_space<vmem>>, vector<1x128x128xf32>
    %270 = vector.shape_cast %269 : vector<1x128x128xf32> to vector<128x128xf32>
    %cst_131 = arith.constant dense<0.000000e+00> : vector<8x128xf32>
    %271 = tpu.matmul %256, %270, %cst_131 {dimension_numbers = #tpu.dot_dimension_numbers<[1], [0], [0], [1], [0, 0, 1, 1], [], []>} : vector<8x128xf32>, vector<128x128xf32>, vector<8x128xf32> -> vector<8x128xf32>
    %272 = arith.addf %268, %271 : vector<8x128xf32>
    %273 = math.tanh %272 : vector<8x128xf32>
    %274 = vector.extract_strided_slice %267 {offsets = [0, 128], sizes = [8, 128], strides = [1, 1]} : vector<8x512xf32> to vector<8x128xf32>
    %c1_132 = arith.constant 1 : index
    %c0_133 = arith.constant 0 : index
    %c0_134 = arith.constant 0 : index
    %275 = vector.load %arg5[%c1_132, %c0_133, %c0_134] : memref<4x128x128xf32, #tpu.memory_space<vmem>>, vector<1x128x128xf32>
    %276 = vector.shape_cast %275 : vector<1x128x128xf32> to vector<128x128xf32>
    %cst_135 = arith.constant dense<0.000000e+00> : vector<8x128xf32>
    %277 = tpu.matmul %256, %276, %cst_135 {dimension_numbers = #tpu.dot_dimension_numbers<[1], [0], [0], [1], [0, 0, 1, 1], [], []>} : vector<8x128xf32>, vector<128x128xf32>, vector<8x128xf32> -> vector<8x128xf32>
    %278 = arith.addf %274, %277 : vector<8x128xf32>
    %279 = arith.negf %278 : vector<8x128xf32>
    %280 = math.exp %279 : vector<8x128xf32>
    %cst_136 = arith.constant 1.000000e+00 : f32
    %281 = vector.broadcast %cst_136 : f32 to vector<8x128xf32>
    %282 = arith.addf %281, %280 : vector<8x128xf32>
    %283 = arith.divf %281, %282 : vector<8x128xf32>
    %284 = vector.extract_strided_slice %267 {offsets = [0, 256], sizes = [8, 128], strides = [1, 1]} : vector<8x512xf32> to vector<8x128xf32>
    %c2_137 = arith.constant 2 : index
    %c0_138 = arith.constant 0 : index
    %c0_139 = arith.constant 0 : index
    %285 = vector.load %arg5[%c2_137, %c0_138, %c0_139] : memref<4x128x128xf32, #tpu.memory_space<vmem>>, vector<1x128x128xf32>
    %286 = vector.shape_cast %285 : vector<1x128x128xf32> to vector<128x128xf32>
    %cst_140 = arith.constant dense<0.000000e+00> : vector<8x128xf32>
    %287 = tpu.matmul %256, %286, %cst_140 {dimension_numbers = #tpu.dot_dimension_numbers<[1], [0], [0], [1], [0, 0, 1, 1], [], []>} : vector<8x128xf32>, vector<128x128xf32>, vector<8x128xf32> -> vector<8x128xf32>
    %288 = arith.addf %284, %287 : vector<8x128xf32>
    %289 = arith.negf %288 : vector<8x128xf32>
    %290 = math.exp %289 : vector<8x128xf32>
    %cst_141 = arith.constant 1.000000e+00 : f32
    %291 = vector.broadcast %cst_141 : f32 to vector<8x128xf32>
    %292 = arith.addf %291, %290 : vector<8x128xf32>
    %293 = arith.divf %291, %292 : vector<8x128xf32>
    %294 = vector.extract_strided_slice %267 {offsets = [0, 384], sizes = [8, 128], strides = [1, 1]} : vector<8x512xf32> to vector<8x128xf32>
    %c3_142 = arith.constant 3 : index
    %c0_143 = arith.constant 0 : index
    %c0_144 = arith.constant 0 : index
    %295 = vector.load %arg5[%c3_142, %c0_143, %c0_144] : memref<4x128x128xf32, #tpu.memory_space<vmem>>, vector<1x128x128xf32>
    %296 = vector.shape_cast %295 : vector<1x128x128xf32> to vector<128x128xf32>
    %cst_145 = arith.constant dense<0.000000e+00> : vector<8x128xf32>
    %297 = tpu.matmul %256, %296, %cst_145 {dimension_numbers = #tpu.dot_dimension_numbers<[1], [0], [0], [1], [0, 0, 1, 1], [], []>} : vector<8x128xf32>, vector<128x128xf32>, vector<8x128xf32> -> vector<8x128xf32>
    %298 = arith.addf %294, %297 : vector<8x128xf32>
    %299 = arith.negf %298 : vector<8x128xf32>
    %300 = math.exp %299 : vector<8x128xf32>
    %cst_146 = arith.constant 1.000000e+00 : f32
    %301 = vector.broadcast %cst_146 : f32 to vector<8x128xf32>
    %302 = arith.addf %301, %300 : vector<8x128xf32>
    %303 = arith.divf %301, %302 : vector<8x128xf32>
    %304 = arith.mulf %254, %293 : vector<8x128xf32>
    %305 = arith.mulf %273, %283 : vector<8x128xf32>
    %306 = arith.addf %304, %305 : vector<8x128xf32>
    %307 = math.tanh %306 : vector<8x128xf32>
    %308 = arith.mulf %307, %303 : vector<8x128xf32>
    %309 = arith.index_cast %c5_i32 : i32 to index
    %c0_147 = arith.constant 0 : index
    %c0_148 = arith.constant 0 : index
    %310 = vector.load %arg6[%309, %c0_147, %c0_148] : memref<8x8x128xf32, #tpu.memory_space<vmem>>, vector<1x8x128xf32>
    %311 = vector.shape_cast %310 : vector<1x8x128xf32> to vector<8x128xf32>
    %312 = vector.shape_cast %308 : vector<8x128xf32> to vector<1x8x128xf32>
    tpu.vector_store %arg6[%309, %c0_147, %c0_148], %312 {strides = array<i32>} : memref<8x8x128xf32, #tpu.memory_space<vmem>>, vector<1x8x128xf32>,
    %313 = arith.index_cast %c5_i32 : i32 to index
    %c0_149 = arith.constant 0 : index
    %c0_150 = arith.constant 0 : index
    %314 = vector.load %arg7[%313, %c0_149, %c0_150] : memref<8x8x128xf32, #tpu.memory_space<vmem>>, vector<1x8x128xf32>
    %315 = vector.shape_cast %314 : vector<1x8x128xf32> to vector<8x128xf32>
    %316 = vector.shape_cast %306 : vector<8x128xf32> to vector<1x8x128xf32>
    tpu.vector_store %arg7[%313, %c0_149, %c0_150], %316 {strides = array<i32>} : memref<8x8x128xf32, #tpu.memory_space<vmem>>, vector<1x8x128xf32>,
    %c6_i32 = arith.constant 6 : i32
    %317 = arith.index_cast %c6_i32 : i32 to index
    %c0_151 = arith.constant 0 : index
    %c0_152 = arith.constant 0 : index
    %318 = vector.load %arg2[%317, %c0_151, %c0_152] : memref<8x8x512xf32, #tpu.memory_space<vmem>>, vector<1x8x512xf32>
    %319 = vector.shape_cast %318 : vector<1x8x512xf32> to vector<8x512xf32>
    %320 = vector.extract_strided_slice %319 {offsets = [0, 0], sizes = [8, 128], strides = [1, 1]} : vector<8x512xf32> to vector<8x128xf32>
    %c0_153 = arith.constant 0 : index
    %c0_154 = arith.constant 0 : index
    %c0_155 = arith.constant 0 : index
    %321 = vector.load %arg5[%c0_153, %c0_154, %c0_155] : memref<4x128x128xf32, #tpu.memory_space<vmem>>, vector<1x128x128xf32>
    %322 = vector.shape_cast %321 : vector<1x128x128xf32> to vector<128x128xf32>
    %cst_156 = arith.constant dense<0.000000e+00> : vector<8x128xf32>
    %323 = tpu.matmul %308, %322, %cst_156 {dimension_numbers = #tpu.dot_dimension_numbers<[1], [0], [0], [1], [0, 0, 1, 1], [], []>} : vector<8x128xf32>, vector<128x128xf32>, vector<8x128xf32> -> vector<8x128xf32>
    %324 = arith.addf %320, %323 : vector<8x128xf32>
    %325 = math.tanh %324 : vector<8x128xf32>
    %326 = vector.extract_strided_slice %319 {offsets = [0, 128], sizes = [8, 128], strides = [1, 1]} : vector<8x512xf32> to vector<8x128xf32>
    %c1_157 = arith.constant 1 : index
    %c0_158 = arith.constant 0 : index
    %c0_159 = arith.constant 0 : index
    %327 = vector.load %arg5[%c1_157, %c0_158, %c0_159] : memref<4x128x128xf32, #tpu.memory_space<vmem>>, vector<1x128x128xf32>
    %328 = vector.shape_cast %327 : vector<1x128x128xf32> to vector<128x128xf32>
    %cst_160 = arith.constant dense<0.000000e+00> : vector<8x128xf32>
    %329 = tpu.matmul %308, %328, %cst_160 {dimension_numbers = #tpu.dot_dimension_numbers<[1], [0], [0], [1], [0, 0, 1, 1], [], []>} : vector<8x128xf32>, vector<128x128xf32>, vector<8x128xf32> -> vector<8x128xf32>
    %330 = arith.addf %326, %329 : vector<8x128xf32>
    %331 = arith.negf %330 : vector<8x128xf32>
    %332 = math.exp %331 : vector<8x128xf32>
    %cst_161 = arith.constant 1.000000e+00 : f32
    %333 = vector.broadcast %cst_161 : f32 to vector<8x128xf32>
    %334 = arith.addf %333, %332 : vector<8x128xf32>
    %335 = arith.divf %333, %334 : vector<8x128xf32>
    %336 = vector.extract_strided_slice %319 {offsets = [0, 256], sizes = [8, 128], strides = [1, 1]} : vector<8x512xf32> to vector<8x128xf32>
    %c2_162 = arith.constant 2 : index
    %c0_163 = arith.constant 0 : index
    %c0_164 = arith.constant 0 : index
    %337 = vector.load %arg5[%c2_162, %c0_163, %c0_164] : memref<4x128x128xf32, #tpu.memory_space<vmem>>, vector<1x128x128xf32>
    %338 = vector.shape_cast %337 : vector<1x128x128xf32> to vector<128x128xf32>
    %cst_165 = arith.constant dense<0.000000e+00> : vector<8x128xf32>
    %339 = tpu.matmul %308, %338, %cst_165 {dimension_numbers = #tpu.dot_dimension_numbers<[1], [0], [0], [1], [0, 0, 1, 1], [], []>} : vector<8x128xf32>, vector<128x128xf32>, vector<8x128xf32> -> vector<8x128xf32>
    %340 = arith.addf %336, %339 : vector<8x128xf32>
    %341 = arith.negf %340 : vector<8x128xf32>
    %342 = math.exp %341 : vector<8x128xf32>
    %cst_166 = arith.constant 1.000000e+00 : f32
    %343 = vector.broadcast %cst_166 : f32 to vector<8x128xf32>
    %344 = arith.addf %343, %342 : vector<8x128xf32>
    %345 = arith.divf %343, %344 : vector<8x128xf32>
    %346 = vector.extract_strided_slice %319 {offsets = [0, 384], sizes = [8, 128], strides = [1, 1]} : vector<8x512xf32> to vector<8x128xf32>
    %c3_167 = arith.constant 3 : index
    %c0_168 = arith.constant 0 : index
    %c0_169 = arith.constant 0 : index
    %347 = vector.load %arg5[%c3_167, %c0_168, %c0_169] : memref<4x128x128xf32, #tpu.memory_space<vmem>>, vector<1x128x128xf32>
    %348 = vector.shape_cast %347 : vector<1x128x128xf32> to vector<128x128xf32>
    %cst_170 = arith.constant dense<0.000000e+00> : vector<8x128xf32>
    %349 = tpu.matmul %308, %348, %cst_170 {dimension_numbers = #tpu.dot_dimension_numbers<[1], [0], [0], [1], [0, 0, 1, 1], [], []>} : vector<8x128xf32>, vector<128x128xf32>, vector<8x128xf32> -> vector<8x128xf32>
    %350 = arith.addf %346, %349 : vector<8x128xf32>
    %351 = arith.negf %350 : vector<8x128xf32>
    %352 = math.exp %351 : vector<8x128xf32>
    %cst_171 = arith.constant 1.000000e+00 : f32
    %353 = vector.broadcast %cst_171 : f32 to vector<8x128xf32>
    %354 = arith.addf %353, %352 : vector<8x128xf32>
    %355 = arith.divf %353, %354 : vector<8x128xf32>
    %356 = arith.mulf %306, %345 : vector<8x128xf32>
    %357 = arith.mulf %325, %335 : vector<8x128xf32>
    %358 = arith.addf %356, %357 : vector<8x128xf32>
    %359 = math.tanh %358 : vector<8x128xf32>
    %360 = arith.mulf %359, %355 : vector<8x128xf32>
    %361 = arith.index_cast %c6_i32 : i32 to index
    %c0_172 = arith.constant 0 : index
    %c0_173 = arith.constant 0 : index
    %362 = vector.load %arg6[%361, %c0_172, %c0_173] : memref<8x8x128xf32, #tpu.memory_space<vmem>>, vector<1x8x128xf32>
    %363 = vector.shape_cast %362 : vector<1x8x128xf32> to vector<8x128xf32>
    %364 = vector.shape_cast %360 : vector<8x128xf32> to vector<1x8x128xf32>
    tpu.vector_store %arg6[%361, %c0_172, %c0_173], %364 {strides = array<i32>} : memref<8x8x128xf32, #tpu.memory_space<vmem>>, vector<1x8x128xf32>,
    %365 = arith.index_cast %c6_i32 : i32 to index
    %c0_174 = arith.constant 0 : index
    %c0_175 = arith.constant 0 : index
    %366 = vector.load %arg7[%365, %c0_174, %c0_175] : memref<8x8x128xf32, #tpu.memory_space<vmem>>, vector<1x8x128xf32>
    %367 = vector.shape_cast %366 : vector<1x8x128xf32> to vector<8x128xf32>
    %368 = vector.shape_cast %358 : vector<8x128xf32> to vector<1x8x128xf32>
    tpu.vector_store %arg7[%365, %c0_174, %c0_175], %368 {strides = array<i32>} : memref<8x8x128xf32, #tpu.memory_space<vmem>>, vector<1x8x128xf32>,
    %c7_i32 = arith.constant 7 : i32
    %369 = arith.index_cast %c7_i32 : i32 to index
    %c0_176 = arith.constant 0 : index
    %c0_177 = arith.constant 0 : index
    %370 = vector.load %arg2[%369, %c0_176, %c0_177] : memref<8x8x512xf32, #tpu.memory_space<vmem>>, vector<1x8x512xf32>
    %371 = vector.shape_cast %370 : vector<1x8x512xf32> to vector<8x512xf32>
    %372 = vector.extract_strided_slice %371 {offsets = [0, 0], sizes = [8, 128], strides = [1, 1]} : vector<8x512xf32> to vector<8x128xf32>
    %c0_178 = arith.constant 0 : index
    %c0_179 = arith.constant 0 : index
    %c0_180 = arith.constant 0 : index
    %373 = vector.load %arg5[%c0_178, %c0_179, %c0_180] : memref<4x128x128xf32, #tpu.memory_space<vmem>>, vector<1x128x128xf32>
    %374 = vector.shape_cast %373 : vector<1x128x128xf32> to vector<128x128xf32>
    %cst_181 = arith.constant dense<0.000000e+00> : vector<8x128xf32>
    %375 = tpu.matmul %360, %374, %cst_181 {dimension_numbers = #tpu.dot_dimension_numbers<[1], [0], [0], [1], [0, 0, 1, 1], [], []>} : vector<8x128xf32>, vector<128x128xf32>, vector<8x128xf32> -> vector<8x128xf32>
    %376 = arith.addf %372, %375 : vector<8x128xf32>
    %377 = math.tanh %376 : vector<8x128xf32>
    %378 = vector.extract_strided_slice %371 {offsets = [0, 128], sizes = [8, 128], strides = [1, 1]} : vector<8x512xf32> to vector<8x128xf32>
    %c1_182 = arith.constant 1 : index
    %c0_183 = arith.constant 0 : index
    %c0_184 = arith.constant 0 : index
    %379 = vector.load %arg5[%c1_182, %c0_183, %c0_184] : memref<4x128x128xf32, #tpu.memory_space<vmem>>, vector<1x128x128xf32>
    %380 = vector.shape_cast %379 : vector<1x128x128xf32> to vector<128x128xf32>
    %cst_185 = arith.constant dense<0.000000e+00> : vector<8x128xf32>
    %381 = tpu.matmul %360, %380, %cst_185 {dimension_numbers = #tpu.dot_dimension_numbers<[1], [0], [0], [1], [0, 0, 1, 1], [], []>} : vector<8x128xf32>, vector<128x128xf32>, vector<8x128xf32> -> vector<8x128xf32>
    %382 = arith.addf %378, %381 : vector<8x128xf32>
    %383 = arith.negf %382 : vector<8x128xf32>
    %384 = math.exp %383 : vector<8x128xf32>
    %cst_186 = arith.constant 1.000000e+00 : f32
    %385 = vector.broadcast %cst_186 : f32 to vector<8x128xf32>
    %386 = arith.addf %385, %384 : vector<8x128xf32>
    %387 = arith.divf %385, %386 : vector<8x128xf32>
    %388 = vector.extract_strided_slice %371 {offsets = [0, 256], sizes = [8, 128], strides = [1, 1]} : vector<8x512xf32> to vector<8x128xf32>
    %c2_187 = arith.constant 2 : index
    %c0_188 = arith.constant 0 : index
    %c0_189 = arith.constant 0 : index
    %389 = vector.load %arg5[%c2_187, %c0_188, %c0_189] : memref<4x128x128xf32, #tpu.memory_space<vmem>>, vector<1x128x128xf32>
    %390 = vector.shape_cast %389 : vector<1x128x128xf32> to vector<128x128xf32>
    %cst_190 = arith.constant dense<0.000000e+00> : vector<8x128xf32>
    %391 = tpu.matmul %360, %390, %cst_190 {dimension_numbers = #tpu.dot_dimension_numbers<[1], [0], [0], [1], [0, 0, 1, 1], [], []>} : vector<8x128xf32>, vector<128x128xf32>, vector<8x128xf32> -> vector<8x128xf32>
    %392 = arith.addf %388, %391 : vector<8x128xf32>
    %393 = arith.negf %392 : vector<8x128xf32>
    %394 = math.exp %393 : vector<8x128xf32>
    %cst_191 = arith.constant 1.000000e+00 : f32
    %395 = vector.broadcast %cst_191 : f32 to vector<8x128xf32>
    %396 = arith.addf %395, %394 : vector<8x128xf32>
    %397 = arith.divf %395, %396 : vector<8x128xf32>
    %398 = vector.extract_strided_slice %371 {offsets = [0, 384], sizes = [8, 128], strides = [1, 1]} : vector<8x512xf32> to vector<8x128xf32>
    %c3_192 = arith.constant 3 : index
    %c0_193 = arith.constant 0 : index
    %c0_194 = arith.constant 0 : index
    %399 = vector.load %arg5[%c3_192, %c0_193, %c0_194] : memref<4x128x128xf32, #tpu.memory_space<vmem>>, vector<1x128x128xf32>
    %400 = vector.shape_cast %399 : vector<1x128x128xf32> to vector<128x128xf32>
    %cst_195 = arith.constant dense<0.000000e+00> : vector<8x128xf32>
    %401 = tpu.matmul %360, %400, %cst_195 {dimension_numbers = #tpu.dot_dimension_numbers<[1], [0], [0], [1], [0, 0, 1, 1], [], []>} : vector<8x128xf32>, vector<128x128xf32>, vector<8x128xf32> -> vector<8x128xf32>
    %402 = arith.addf %398, %401 : vector<8x128xf32>
    %403 = arith.negf %402 : vector<8x128xf32>
    %404 = math.exp %403 : vector<8x128xf32>
    %cst_196 = arith.constant 1.000000e+00 : f32
    %405 = vector.broadcast %cst_196 : f32 to vector<8x128xf32>
    %406 = arith.addf %405, %404 : vector<8x128xf32>
    %407 = arith.divf %405, %406 : vector<8x128xf32>
    %408 = arith.mulf %358, %397 : vector<8x128xf32>
    %409 = arith.mulf %377, %387 : vector<8x128xf32>
    %410 = arith.addf %408, %409 : vector<8x128xf32>
    %411 = math.tanh %410 : vector<8x128xf32>
    %412 = arith.mulf %411, %407 : vector<8x128xf32>
    %413 = arith.index_cast %c7_i32 : i32 to index
    %c0_197 = arith.constant 0 : index
    %c0_198 = arith.constant 0 : index
    %414 = vector.load %arg6[%413, %c0_197, %c0_198] : memref<8x8x128xf32, #tpu.memory_space<vmem>>, vector<1x8x128xf32>
    %415 = vector.shape_cast %414 : vector<1x8x128xf32> to vector<8x128xf32>
    %416 = vector.shape_cast %412 : vector<8x128xf32> to vector<1x8x128xf32>
    tpu.vector_store %arg6[%413, %c0_197, %c0_198], %416 {strides = array<i32>} : memref<8x8x128xf32, #tpu.memory_space<vmem>>, vector<1x8x128xf32>,
    %417 = arith.index_cast %c7_i32 : i32 to index
    %c0_199 = arith.constant 0 : index
    %c0_200 = arith.constant 0 : index
    %418 = vector.load %arg7[%417, %c0_199, %c0_200] : memref<8x8x128xf32, #tpu.memory_space<vmem>>, vector<1x8x128xf32>
    %419 = vector.shape_cast %418 : vector<1x8x128xf32> to vector<8x128xf32>
    %420 = vector.shape_cast %410 : vector<8x128xf32> to vector<1x8x128xf32>
    tpu.vector_store %arg7[%417, %c0_199, %c0_200], %420 {strides = array<i32>} : memref<8x8x128xf32, #tpu.memory_space<vmem>>, vector<1x8x128xf32>,
    %c8_i32 = arith.constant 8 : i32
    %c0_201 = arith.constant 0 : index
    %c0_202 = arith.constant 0 : index
    %421 = vector.load %arg8[%c0_201, %c0_202] : memref<8x128xf32, #tpu.memory_space<vmem>>, vector<8x128xf32>
    tpu.vector_store %arg8[%c0_201, %c0_202], %412 {strides = array<i32>} : memref<8x128xf32, #tpu.memory_space<vmem>>, vector<8x128xf32>,
    %c0_203 = arith.constant 0 : index
    %c0_204 = arith.constant 0 : index
    %422 = vector.load %arg9[%c0_203, %c0_204] : memref<8x128xf32, #tpu.memory_space<vmem>>, vector<8x128xf32>
    tpu.vector_store %arg9[%c0_203, %c0_204], %410 {strides = array<i32>} : memref<8x128xf32, #tpu.memory_space<vmem>>, vector<8x128xf32>,
    return
  }
  func.func @transform_0(%arg0: i32, %arg1: i32) -> (i32, i32, i32) {
    %c0_i32 = arith.constant 0 : i32
    %c0_i32_0 = arith.constant 0 : i32
    return %arg1, %arg0, %c0_i32 : i32, i32, i32
  }
  func.func @transform_1(%arg0: i32, %arg1: i32) -> (i32, i32) {
    %c0_i32 = arith.constant 0 : i32
    %c0_i32_0 = arith.constant 0 : i32
    return %arg0, %c0_i32 : i32, i32
  }
  func.func @transform_2(%arg0: i32, %arg1: i32) -> (i32, i32) {
    %c0_i32 = arith.constant 0 : i32
    %c0_i32_0 = arith.constant 0 : i32
    return %arg0, %c0_i32 : i32, i32
  }
  func.func @transform_3(%arg0: i32, %arg1: i32) -> (i32, i32, i32) {
    %c0_i32 = arith.constant 0 : i32
    %c0_i32_0 = arith.constant 0 : i32
    %c0_i32_1 = arith.constant 0 : i32
    %c0_i32_2 = arith.constant 0 : i32
    return %c0_i32, %c0_i32_0, %c0_i32_1 : i32, i32, i32
  }
  func.func @transform_4(%arg0: i32, %arg1: i32) -> (i32, i32, i32) {
    %c0_i32 = arith.constant 0 : i32
    %c0_i32_0 = arith.constant 0 : i32
    return %arg1, %arg0, %c0_i32 : i32, i32, i32
  }
  func.func @transform_5(%arg0: i32, %arg1: i32) -> (i32, i32, i32) {
    %c0_i32 = arith.constant 0 : i32
    %c0_i32_0 = arith.constant 0 : i32
    return %arg1, %arg0, %c0_i32 : i32, i32, i32
  }
}

</mosaic_0001>

<bundles_post_ra>
// kernel: tpu_custom_call.1
= control target key start
LH: loop header
LB: loop body
LE: loop exit
PB: predicated region body
PF: predicated region fallthrough
CT: control target
= control target key end

     0   :  { %11 = vsyncpa [#allocation5], 0  ;;  %s3287_s0 = inlined_call_operand.hbm [shape: f32[8,8,512], index: 0, kind: input, shape index: {}]   ;;  %s3288_s1 = inlined_call_operand.hbm [shape: f32[8,128], index: 1, kind: input, shape index: {}]   ;;  %s3289_s2 = inlined_call_operand.hbm [shape: f32[8,128], index: 2, kind: input, shape index: {}]   ;;  %s3290_s3 = inlined_call_operand.hbm [shape: f32[4,128,128], index: 3, kind: input, shape index: {}]   ;;  %s3291_s4 = inlined_call_operand.hbm [shape: f32[8,8,128], index: 4, kind: output, shape index: {0}]   ;;  %s3292_s5 = inlined_call_operand.hbm [shape: f32[8,8,128], index: 5, kind: output, shape index: {1}]  }
   0x1   :  { %12 = vsyncpa [#allocation8], 0 }
   0x2   :  { %13 = vsyncpa [#allocation11], 0 }
   0x3   :  { %14 = vsyncpa [#allocation6], 0  ;;  %s34_s20 = sshll.u32 %s3288_s1, 4  ;;  %s35_s20 = int_to_ptr.hbm [resolvable:$true] %s34_s20 }
   0x4   :  { %15 = vsyncpa [#allocation14], 0  ;;  %s2207_s21 = smov [#allocation7]   ;;  %s20_s25 = sshll.u32 %s3287_s0, 4  ;;  %s21_s25 = int_to_ptr.hbm [resolvable:$true] %s20_s25 }
   0x5   :  { %s36_s22 = sshll.u32 %s2207_s21, 4  ;;  %s2208_s26 = smov [#allocation4]   ;;  %s37_s22 = int_to_ptr.vmem [resolvable:$true] %s36_s22 }
   0x6   :  { %39 = dma.hbm_to_vmem [thread:$0]  %s35_s20, 128, %s37_s22, [#allocation8]  }
   0x7   :  { %s22_s27 = sshll.u32 %s2208_s26, 4  ;;  %s2209_s28 = smov 512   ;;  %s23_s27 = int_to_ptr.vmem [resolvable:$true] %s22_s27 }
   0x8   :  { %s2210_s29 = smov 32   ;;  %s45_s1 = sshll.u32 %s3289_s2, 4  ;;  %s46_s1 = int_to_ptr.hbm [resolvable:$true] %s45_s1 }
   0x9   :  { %28 = dma.hbm_to_vmem [thread:$0]  %s21_s25, 4096, %s23_s27, [#allocation5], %s2209_s28, %s2209_s28, %s2210_s29  }
   0xa   :  { %s2211_s7 = smov [#allocation9]   ;;  %s55_s0 = sshll.u32 %s3290_s3, 4  ;;  %s56_s0 = int_to_ptr.hbm [resolvable:$true] %s55_s0 }
   0xb   :  { %s47_s8 = sshll.u32 %s2211_s7, 4  ;;  %s2212_s11 = smov [#allocation10]   ;;  %s48_s8 = int_to_ptr.vmem [resolvable:$true] %s47_s8 }
   0xc   :  { %50 = dma.hbm_to_vmem [thread:$0]  %s46_s1, 128, %s48_s8, [#allocation8]  }
   0xd   :  { %s57_s12 = sshll.u32 %s2212_s11, 4  ;;  %s2213_s13 = smov 128   ;;  %s58_s12 = int_to_ptr.vmem [resolvable:$true] %s57_s12 }
   0xe   :  { %s2214_s14 = smov 8  }
   0xf   :  { %63 = dma.hbm_to_vmem [thread:$0]  %s56_s0, 8192, %s58_s12, [#allocation11], %s2213_s13, %s2213_s13, %s2214_s14  }
  0x10   :  { %2197 = dma.done.wait [#allocation5], 4096  }
  0x11   :  { %2198 = vsyncadd [#allocation5], 4294963200 }
  0x12   :  { %2199 = dma.done.wait [#allocation8], 256  }
  0x13   :  { %2200 = vsyncadd [#allocation8], 4294967040 }
  0x14   :  { %2201 = dma.done.wait [#allocation11], 8192  }
  0x15   :  { %2202 = vsyncadd [#allocation11], 4294959104  ;;  %v2262_v0 = vld [vmem:[#allocation10 + $0xf8] sm:$0xff]  ;;  %v2270_v3 = vld [vmem:[#allocation10 + $0xf0] sm:$0xff]  ;;  %s2215_s2 = smov [#allocation13]   ;;  %s1871_s17 = sshll.u32 %s3292_s5, 4  ;;  %s1872_s17 = int_to_ptr.hbm [resolvable:$true] %s1871_s17 }
  0x16   :  { %v2264_v1 = vld [vmem:[#allocation10 + $0x178] sm:$0xff]  ;;  %149 = vmatpush.msra.mxu1 %v2262_v0  ;;  %3333 = vst [vmem:[#allocation20_spill] sm:$0xff] %v2270_v3  ;;  %v2272_v4 = vld [vmem:[#allocation10 + $0x170] sm:$0xff]  ;;  %v2277_v6 = vld [vmem:[#allocation10 + $0xe8] sm:$0xff]  ;;  %s1869_s3 = sshll.u32 %s2215_s2, 4  ;;  %s2216_s5 = smov [#allocation12]   ;;  %s1870_s3 = int_to_ptr.vmem [resolvable:$true] %s1869_s3 }
  0x17   :  { %v2266_v2 = vld [vmem:[#allocation10 + $0x1f8] sm:$0xff]  ;;  %206 = vmatpush.msra.mxu2 %v2264_v1  ;;  %v2274_v5 = vld [vmem:[#allocation10 + $0x1f0] sm:$0xff]  ;;  %v2279_v7 = vld [vmem:[#allocation10 + $0x168] sm:$0xff]  ;;  %s1856_s18 = sshll.u32 %s2216_s5, 4  ;;  %s1858_s21 = sshll.u32 %s3291_s4, 4  ;;  %s1857_s18 = int_to_ptr.vmem [resolvable:$true] %s1856_s18  ;;  %s1859_s21 = int_to_ptr.hbm [resolvable:$true] %s1858_s21 }
  0x18   :  { %263 = vmatpush.msra.mxu3 %v2266_v2  ;;  %150 = vmatpush.msra.mxu1 %v2270_v3  ;;  %v2283_v8 = vld [vmem:[#allocation10 + $0x1e8] sm:$0xff]  ;;  %v2286_v9 = vld [vmem:[#allocation10 + $0xe0] sm:$0xff]  ;;  %v2295_v12 = vld [vmem:[#allocation10 + $0xd8] sm:$0xff] }
  0x19   :  { %207 = vmatpush.msra.mxu2 %v2272_v4  ;;  %v2288_v10 = vld [vmem:[#allocation10 + $0x160] sm:$0xff]  ;;  %v2297_v13 = vld [vmem:[#allocation10 + $0x158] sm:$0xff]  ;;  %v2304_v15 = vld [vmem:[#allocation10 + $0xd0] sm:$0xff] }
  0x1a   :  { %264 = vmatpush.msra.mxu3 %v2274_v5  ;;  %151 = vmatpush.msra.mxu1 %v2277_v6  ;;  %v2292_v11 = vld [vmem:[#allocation10 + $0x1e0] sm:$0xff]  ;;  %v2301_v14 = vld [vmem:[#allocation10 + $0x1d8] sm:$0xff]  ;;  %v2306_v16 = vld [vmem:[#allocation10 + $0x150] sm:$0xff] }
  0x1b   :  { %208 = vmatpush.msra.mxu2 %v2279_v7  ;;  %v2310_v17 = vld [vmem:[#allocation10 + $0x1d0] sm:$0xff]  ;;  %v2313_v18 = vld [vmem:[#allocation10 + $0xc8] sm:$0xff]  ;;  %v2321_v21 = vld [vmem:[#allocation10 + $0x78] sm:$0xff] }
  0x1c   :  { %265 = vmatpush.msra.mxu3 %v2283_v8  ;;  %152 = vmatpush.msra.mxu1 %v2286_v9  ;;  %v2315_v19 = vld [vmem:[#allocation10 + $0x148] sm:$0xff]  ;;  %v2324_v22 = vld [vmem:[#allocation10 + $0xc0] sm:$0xff]  ;;  %v2329_v24 = vld [vmem:[#allocation10 + $0x70] sm:$0xff] }
  0x1d   :  { %209 = vmatpush.msra.mxu2 %v2288_v10  ;;  %v2319_v20 = vld [vmem:[#allocation10 + $0x1c8] sm:$0xff]  ;;  %v2326_v23 = vld [vmem:[#allocation10 + $0x140] sm:$0xff]  ;;  %110 = vmatpush.msra.mxu0 %v2321_v21  ;;  %v2338_v27 = vld [vmem:[#allocation10 + $0xb8] sm:$0xff] }
  0x1e   :  { %266 = vmatpush.msra.mxu3 %v2292_v11  ;;  %153 = vmatpush.msra.mxu1 %v2295_v12  ;;  %v2333_v25 = vld [vmem:[#allocation10 + $0x1c0] sm:$0xff]  ;;  %v2335_v26 = vld [vmem:[#allocation10 + $0x68] sm:$0xff]  ;;  %v2340_v28 = vld [vmem:[#allocation10 + $0x138] sm:$0xff] }
  0x1f   :  { %210 = vmatpush.msra.mxu2 %v2297_v13  ;;  %111 = vmatpush.msra.mxu0 %v2329_v24  ;;  %v2345_v29 = vld [vmem:[#allocation10 + $0x1b8] sm:$0xff]  ;;  %v2347_v30 = vld [vmem:[#allocation10 + $0x60] sm:$0xff]  ;;  %v2350_v31 = vld [vmem:[#allocation10 + $0xb0] sm:$0xff] }
  0x20   :  { %267 = vmatpush.msra.mxu3 %v2301_v14  ;;  %154 = vmatpush.msra.mxu1 %v2304_v15  ;;  %v2352_v32 = vld [vmem:[#allocation10 + $0x130] sm:$0xff]  ;;  %v2359_v34 = vld [vmem:[#allocation10 + $0x58] sm:$0xff]  ;;  %v2362_v35 = vld [vmem:[#allocation10 + $0xa8] sm:$0xff] }
  0x21   :  { %211 = vmatpush.msra.mxu2 %v2306_v16  ;;  %112 = vmatpush.msra.mxu0 %v2335_v26  ;;  %v2357_v33 = vld [vmem:[#allocation10 + $0x1b0] sm:$0xff]  ;;  %v2364_v36 = vld [vmem:[#allocation10 + $0x128] sm:$0xff]  ;;  %v2374_v39 = vld [vmem:[#allocation10 + $0xa0] sm:$0xff] }
  0x22   :  { %268 = vmatpush.msra.mxu3 %v2310_v17  ;;  %155 = vmatpush.msra.mxu1 %v2313_v18  ;;  %v2369_v37 = vld [vmem:[#allocation10 + $0x1a8] sm:$0xff]  ;;  %v2371_v38 = vld [vmem:[#allocation10 + $0x50] sm:$0xff]  ;;  %v2376_v40 = vld [vmem:[#allocation10 + $0x120] sm:$0xff] }
  0x23   :  { %212 = vmatpush.msra.mxu2 %v2315_v19  ;;  %113 = vmatpush.msra.mxu0 %v2347_v30  ;;  %v2381_v41 = vld [vmem:[#allocation10 + $0x1a0] sm:$0xff]  ;;  %v2383_v42 = vld [vmem:[#allocation10 + $0x48] sm:$0xff]  ;;  %v2386_v43 = vld [vmem:[#allocation10 + $0x98] sm:$0xff] }
  0x24   :  { %269 = vmatpush.msra.mxu3 %v2319_v20  ;;  %156 = vmatpush.msra.mxu1 %v2324_v22  ;;  %v2388_v44 = vld [vmem:[#allocation10 + $0x118] sm:$0xff]  ;;  %v2395_v46 = vld [vmem:[#allocation10 + $0x40] sm:$0xff]  ;;  %v2398_v47 = vld [vmem:[#allocation10 + $0x90] sm:$0xff] }
  0x25   :  { %213 = vmatpush.msra.mxu2 %v2326_v23  ;;  %114 = vmatpush.msra.mxu0 %v2359_v34  ;;  %v2393_v45 = vld [vmem:[#allocation10 + $0x198] sm:$0xff]  ;;  %v2400_v48 = vld [vmem:[#allocation10 + $0x110] sm:$0xff]  ;;  %v2410_v51 = vld [vmem:[#allocation10 + $0x88] sm:$0xff] }
  0x26   :  { %270 = vmatpush.msra.mxu3 %v2333_v25  ;;  %157 = vmatpush.msra.mxu1 %v2338_v27  ;;  %v2405_v49 = vld [vmem:[#allocation10 + $0x190] sm:$0xff]  ;;  %v2407_v50 = vld [vmem:[#allocation10 + $0x38] sm:$0xff]  ;;  %v2412_v52 = vld [vmem:[#allocation10 + $0x108] sm:$0xff] }
  0x27   :  { %214 = vmatpush.msra.mxu2 %v2340_v28  ;;  %115 = vmatpush.msra.mxu0 %v2371_v38  ;;  %v2417_v53 = vld [vmem:[#allocation10 + $0x188] sm:$0xff]  ;;  %v2419_v54 = vld [vmem:[#allocation10 + $0x30] sm:$0xff]  ;;  %v2422_v55 = vld [vmem:[#allocation10 + $0x80] sm:$0xff] }
  0x28   :  { %271 = vmatpush.msra.mxu3 %v2345_v29  ;;  %158 = vmatpush.msra.mxu1 %v2350_v31  ;;  %v2424_v56 = vld [vmem:[#allocation10 + $0x100] sm:$0xff]  ;;  %v84_v58 = vld [vmem:[#allocation7] sm:$0xff]  ;;  %v2435_v59 = vld [vmem:[#allocation10 + $0x28] sm:$0xff] }
  0x29   :  { %215 = vmatpush.msra.mxu2 %v2352_v32  ;;  %116 = vmatpush.msra.mxu0 %v2383_v42  ;;  %v2429_v57 = vld [vmem:[#allocation10 + $0x180] sm:$0xff]  ;;  %v2442_v61 = vld [vmem:[#allocation10 + $0x18] sm:$0xff]  ;;  %v2448_v62 = vld [vmem:[#allocation10 + $0x10] sm:$0xff] }
  0x2a   :  { %272 = vmatpush.msra.mxu3 %v2357_v33  ;;  %159 = vmatpush.msra.mxu1 %v2362_v35  ;;  %v2438_v60 = vld [vmem:[#allocation10 + $0x20] sm:$0xff]  ;;  %v2454_v63 = vld [vmem:[#allocation10 + $0x8] sm:$0xff] }
  0x2b   :  { %216 = vmatpush.msra.mxu2 %v2364_v36  ;;  %117 = vmatpush.msra.mxu0 %v2395_v46 }
  0x2c   :  { %273 = vmatpush.msra.mxu3 %v2369_v37  ;;  %160 = vmatpush.msra.mxu1 %v2374_v39 }
  0x2d   :  { %217 = vmatpush.msra.mxu2 %v2376_v40  ;;  %118 = vmatpush.msra.mxu0 %v2407_v50 }
  0x2e   :  { %274 = vmatpush.msra.mxu3 %v2381_v41  ;;  %161 = vmatpush.msra.mxu1 %v2386_v43 }
  0x2f   :  { %218 = vmatpush.msra.mxu2 %v2388_v44  ;;  %119 = vmatpush.msra.mxu0 %v2419_v54 }
  0x30   :  { %275 = vmatpush.msra.mxu3 %v2393_v45  ;;  %162 = vmatpush.msra.mxu1 %v2398_v47 }
  0x31   :  { %219 = vmatpush.msra.mxu2 %v2400_v48  ;;  %120 = vmatpush.msra.mxu0 %v2435_v59 }
  0x32   :  { %276 = vmatpush.msra.mxu3 %v2405_v49  ;;  %163 = vmatpush.msra.mxu1 %v2410_v51 }
  0x33   :  { %220 = vmatpush.msra.mxu2 %v2412_v52  ;;  %121 = vmatpush.msra.mxu0 %v2438_v60 }
  0x34   :  { %277 = vmatpush.msra.mxu3 %v2417_v53  ;;  %164 = vmatpush.msra.mxu1 %v2422_v55 }
  0x35   :  { %221 = vmatpush.msra.mxu2 %v2424_v56  ;;  %165 = vmatmul.f32.vlgmr.msra.gmra.mxu1 %v84_v58 }
  0x36   :  { %278 = vmatpush.msra.mxu3 %v2429_v57  ;;  %222 = vmatmul.f32.vlgmr.msra.gmra.mxu2 %v84_v58 }
  0x37   :  { %279 = vmatmul.f32.vlgmr.msra.gmra.mxu3 %v84_v58  ;;  %369 = vmatpush.msrb.mxu1 %v2262_v0 }
  0x38   :  { %425 = vmatpush.msrb.mxu2 %v2264_v1  ;;  %481 = vmatpush.msrb.mxu3 %v2266_v2 }
  0x39   :  { %370 = vmatpush.msrb.mxu1 %v2270_v3  ;;  %122 = vmatpush.msra.mxu0 %v2442_v61  ;;  %v2460_v3 = vld [vmem:[#allocation10] sm:$0xff] }
  0x3a   :  { %426 = vmatpush.msrb.mxu2 %v2272_v4  ;;  %482 = vmatpush.msrb.mxu3 %v2274_v5 }
  0x3b   :  { %371 = vmatpush.msrb.mxu1 %v2277_v6  ;;  %123 = vmatpush.msra.mxu0 %v2448_v62 }
  0x3c   :  { %427 = vmatpush.msrb.mxu2 %v2279_v7  ;;  %483 = vmatpush.msrb.mxu3 %v2283_v8 }
  0x3d   :  { %372 = vmatpush.msrb.mxu1 %v2286_v9  ;;  %124 = vmatpush.msra.mxu0 %v2454_v63 }
  0x3e   :  { %428 = vmatpush.msrb.mxu2 %v2288_v10  ;;  %484 = vmatpush.msrb.mxu3 %v2292_v11 }
  0x3f   :  { %373 = vmatpush.msrb.mxu1 %v2295_v12  ;;  %125 = vmatpush.msra.mxu0 %v2460_v3 }
  0x40   :  { %429 = vmatpush.msrb.mxu2 %v2297_v13  ;;  %485 = vmatpush.msrb.mxu3 %v2301_v14 }
  0x41   :  { %374 = vmatpush.msrb.mxu1 %v2304_v15  ;;  %126 = vmatmul.f32.vlgmr.msra.gmra.mxu0 %v84_v58  ;;  %v3334_v58 = vld [vmem:[#allocation20_spill] sm:$0xff] }
  0x42   :  { %430 = vmatpush.msrb.mxu2 %v2306_v16  ;;  %331 = vmatpush.msrb.mxu0 %v2321_v21 }
  0x43   :  { %486 = vmatpush.msrb.mxu3 %v2310_v17  ;;  %375 = vmatpush.msrb.mxu1 %v2313_v18 }
  0x44   :  { %431 = vmatpush.msrb.mxu2 %v2315_v19  ;;  %332 = vmatpush.msrb.mxu0 %v2329_v24 }
  0x45   :  { %487 = vmatpush.msrb.mxu3 %v2319_v20  ;;  %376 = vmatpush.msrb.mxu1 %v2324_v22 }
  0x46   :  { %432 = vmatpush.msrb.mxu2 %v2326_v23  ;;  %333 = vmatpush.msrb.mxu0 %v2335_v26 }
  0x47   :  { %488 = vmatpush.msrb.mxu3 %v2333_v25  ;;  %377 = vmatpush.msrb.mxu1 %v2338_v27 }
  0x48   :  { %433 = vmatpush.msrb.mxu2 %v2340_v28  ;;  %334 = vmatpush.msrb.mxu0 %v2347_v30 }
  0x49   :  { %489 = vmatpush.msrb.mxu3 %v2345_v29  ;;  %378 = vmatpush.msrb.mxu1 %v2350_v31 }
  0x4a   :  { %434 = vmatpush.msrb.mxu2 %v2352_v32  ;;  %335 = vmatpush.msrb.mxu0 %v2359_v34 }
  0x4b   :  { %490 = vmatpush.msrb.mxu3 %v2357_v33  ;;  %379 = vmatpush.msrb.mxu1 %v2362_v35 }
  0x4c   :  { %435 = vmatpush.msrb.mxu2 %v2364_v36  ;;  %336 = vmatpush.msrb.mxu0 %v2371_v38 }
  0x4d   :  { %491 = vmatpush.msrb.mxu3 %v2369_v37  ;;  %380 = vmatpush.msrb.mxu1 %v2374_v39 }
  0x4e   :  { %436 = vmatpush.msrb.mxu2 %v2376_v40  ;;  %337 = vmatpush.msrb.mxu0 %v2383_v42 }
  0x4f   :  { %492 = vmatpush.msrb.mxu3 %v2381_v41  ;;  %381 = vmatpush.msrb.mxu1 %v2386_v43 }
  0x50   :  { %437 = vmatpush.msrb.mxu2 %v2388_v44  ;;  %338 = vmatpush.msrb.mxu0 %v2395_v46 }
  0x51   :  { %493 = vmatpush.msrb.mxu3 %v2393_v45  ;;  %382 = vmatpush.msrb.mxu1 %v2398_v47 }
  0x52   :  { %438 = vmatpush.msrb.mxu2 %v2400_v48  ;;  %339 = vmatpush.msrb.mxu0 %v2407_v50 }
  0x53   :  { %494 = vmatpush.msrb.mxu3 %v2405_v49  ;;  %383 = vmatpush.msrb.mxu1 %v2410_v51 }
  0x54   :  { %439 = vmatpush.msrb.mxu2 %v2412_v52  ;;  %340 = vmatpush.msrb.mxu0 %v2419_v54 }
  0x55   :  { %495 = vmatpush.msrb.mxu3 %v2417_v53  ;;  %384 = vmatpush.msrb.mxu1 %v2422_v55 }
  0x56   :  { %440 = vmatpush.msrb.mxu2 %v2424_v56  ;;  %341 = vmatpush.msrb.mxu0 %v2435_v59 }
  0x57   :  { %496 = vmatpush.msrb.mxu3 %v2429_v57  ;;  %589 = vmatpush.msra.mxu1 %v2262_v0  ;;  %v91_v0 = vld [vmem:[#allocation4 + $0x8] sm:$0xff] }
  0x58   :  { %645 = vmatpush.msra.mxu2 %v2264_v1  ;;  %342 = vmatpush.msrb.mxu0 %v2438_v60 }
  0x59   :  { %701 = vmatpush.msra.mxu3 %v2266_v2  ;;  %590 = vmatpush.msra.mxu1 %v3334_v58  ;;  %v314_v58 = vld [vmem:[#allocation4 + $0x38] sm:$0xff] }
  0x5a   :  { %646 = vmatpush.msra.mxu2 %v2272_v4  ;;  %343 = vmatpush.msrb.mxu0 %v2442_v61 }
  0x5b   :  { %702 = vmatpush.msra.mxu3 %v2274_v5  ;;  %591 = vmatpush.msra.mxu1 %v2277_v6  ;;  %v92_v5 = vld [vmem:[#allocation4 + $0x10] sm:$0xff]  ;;  %v93_v6 = vld [vmem:[#allocation4 + $0x18] sm:$0xff] }
  0x5c   :  { %647 = vmatpush.msra.mxu2 %v2279_v7  ;;  %344 = vmatpush.msrb.mxu0 %v2448_v62 }
  0x5d   :  { %703 = vmatpush.msra.mxu3 %v2283_v8  ;;  %592 = vmatpush.msra.mxu1 %v2286_v9 }
  0x5e   :  { %648 = vmatpush.msra.mxu2 %v2288_v10  ;;  %345 = vmatpush.msrb.mxu0 %v2454_v63 }
  0x5f   :  { %704 = vmatpush.msra.mxu3 %v2292_v11  ;;  %593 = vmatpush.msra.mxu1 %v2295_v12 }
  0x60   :  { %649 = vmatpush.msra.mxu2 %v2297_v13  ;;  %346 = vmatpush.msrb.mxu0 %v2460_v3 }
  0x61   :  { %705 = vmatpush.msra.mxu3 %v2301_v14  ;;  %594 = vmatpush.msra.mxu1 %v2304_v15 }
  0x62   :  { %551 = vmatpush.msra.mxu0 %v2321_v21  ;;  %650 = vmatpush.msra.mxu2 %v2306_v16 }
  0x63   :  { %706 = vmatpush.msra.mxu3 %v2310_v17  ;;  %595 = vmatpush.msra.mxu1 %v2313_v18 }
  0x64   :  { %552 = vmatpush.msra.mxu0 %v2329_v24  ;;  %651 = vmatpush.msra.mxu2 %v2315_v19 }
  0x65   :  { %707 = vmatpush.msra.mxu3 %v2319_v20  ;;  %596 = vmatpush.msra.mxu1 %v2324_v22  ;;  %v90_v20 = vld [vmem:[#allocation4] sm:$0xff] }
  0x66   :  { %553 = vmatpush.msra.mxu0 %v2335_v26  ;;  %652 = vmatpush.msra.mxu2 %v2326_v23 }
  0x67   :  { %708 = vmatpush.msra.mxu3 %v2333_v25  ;;  %597 = vmatpush.msra.mxu1 %v2338_v27 }
  0x68   :  { %554 = vmatpush.msra.mxu0 %v2347_v30  ;;  %653 = vmatpush.msra.mxu2 %v2340_v28 }
  0x69   :  { %709 = vmatpush.msra.mxu3 %v2345_v29  ;;  %598 = vmatpush.msra.mxu1 %v2350_v31 }
  0x6a   :  { %555 = vmatpush.msra.mxu0 %v2359_v34  ;;  %654 = vmatpush.msra.mxu2 %v2352_v32 }
  0x6b   :  { %710 = vmatpush.msra.mxu3 %v2357_v33  ;;  %599 = vmatpush.msra.mxu1 %v2362_v35 }
  0x6c   :  { %556 = vmatpush.msra.mxu0 %v2371_v38  ;;  %655 = vmatpush.msra.mxu2 %v2364_v36 }
  0x6d   :  { %711 = vmatpush.msra.mxu3 %v2369_v37  ;;  %600 = vmatpush.msra.mxu1 %v2374_v39 }
  0x6e   :  { %557 = vmatpush.msra.mxu0 %v2383_v42  ;;  %656 = vmatpush.msra.mxu2 %v2376_v40  ;;  %v86_v42 = vld [vmem:[#allocation9] sm:$0xff] }
  0x6f   :  { %712 = vmatpush.msra.mxu3 %v2381_v41  ;;  %601 = vmatpush.msra.mxu1 %v2386_v43 }
  0x70   :  { %558 = vmatpush.msra.mxu0 %v2395_v46  ;;  %657 = vmatpush.msra.mxu2 %v2388_v44 }
  0x71   :  { %713 = vmatpush.msra.mxu3 %v2393_v45  ;;  %602 = vmatpush.msra.mxu1 %v2398_v47 }
  0x72   :  { %559 = vmatpush.msra.mxu0 %v2407_v50  ;;  %658 = vmatpush.msra.mxu2 %v2400_v48 }
  0x73   :  { %714 = vmatpush.msra.mxu3 %v2405_v49  ;;  %603 = vmatpush.msra.mxu1 %v2410_v51 }
  0x74   :  { %560 = vmatpush.msra.mxu0 %v2419_v54  ;;  %659 = vmatpush.msra.mxu2 %v2412_v52 }
  0x75   :  { %715 = vmatpush.msra.mxu3 %v2417_v53  ;;  %604 = vmatpush.msra.mxu1 %v2422_v55 }
  0x76   :  { %561 = vmatpush.msra.mxu0 %v2435_v59  ;;  %660 = vmatpush.msra.mxu2 %v2424_v56  ;;  %v312_v59 = vld [vmem:[#allocation4 + $0x28] sm:$0xff] }
  0x77   :  { %716 = vmatpush.msra.mxu3 %v2429_v57 }
  0x78   :  { %562 = vmatpush.msra.mxu0 %v2438_v60 }
  0x7a   :  { %563 = vmatpush.msra.mxu0 %v2442_v61 }
  0x7c   :  { %564 = vmatpush.msra.mxu0 %v2448_v62 }
  0x7e   :  { %565 = vmatpush.msra.mxu0 %v2454_v63  ;;  %v313_v63 = vld [vmem:[#allocation4 + $0x30] sm:$0xff] }
  0x80   :  { %566 = vmatpush.msra.mxu0 %v2460_v3 }
  0xb2   :  { %v166_v1 = vpop.f32.mrf.mxu1 }
  0xb3   :  { %v169_v2 = vadd.f32 %v166_v1, %v91_v0 }
  0xb5   :  { %v1891_v4 = vmul.f32 -1.442695, %v169_v2 }
  0xb7   :  { %1925 = vpow2.f32 %v1891_v4 }
  0xb9   :  { %v223_v7 = vpop.f32.mrf.mxu2 }
  0xba   :  { %v280_v8 = vpop.f32.mrf.mxu3  ;;  %v226_v9 = vadd.f32 %v223_v7, %v92_v5 }
  0xbb   :  { %v283_v10 = vadd.f32 %v280_v8, %v93_v6 }
  0xbc   :  { %v1892_v11 = vmul.f32 -1.442695, %v226_v9 }
  0xbd   :  { %v1893_v12 = vmul.f32 -1.442695, %v283_v10  ;;  %v1926_v13 = vpop.eup %1925 }
  0xbe   :  { %v173_v14 = vadd.f32 1.0, %v1926_v13  ;;  %1927 = vpow2.f32 %v1892_v11  ;;  %v127_v21 = vpop.f32.mrf.mxu0 }
  0xbf   :  { %1929 = vpow2.f32 %v1893_v12  ;;  %v130_v23 = vadd.f32 %v127_v21, %v90_v20 }
  0xc0   :  { %1931 = vrcp.f32 %v173_v14  ;;  %vm179_vm0 = vweird.f32 %v173_v14  ;;  %v185_v30 = vand.u32 2147483648, %v173_v14  ;;  %v183_v32 = vand.u32 2147483647, %v173_v14 }
  0xc2   :  { %v186_v38 = vor.u32 1.1754944e-38, %v185_v30  ;;  %vm184_vm5 = vcmp.eq.f32.partialorder %v183_v32, 8.507059e+37 }
  0xc4   :  { %v1928_v15 = vpop.eup %1927 }
  0xc5   :  { %v1930_v3 = vpop.eup %1929  ;;  %v230_v16 = vadd.f32 1.0, %v1928_v15 }
  0xc6   :  { %v1932_v17 = vpop.eup %1931  ;;  %v287_v18 = vadd.f32 1.0, %v1930_v3  ;;  %v311_v3 = vld [vmem:[#allocation4 + $0x20] sm:$0xff] }
  0xc7   :  { %v175_v19 = vmul.f32 %v1932_v17, %v173_v14  ;;  %1933 = vrcp.f32 %v230_v16  ;;  %vm180_vm1 = vweird.f32 %v1932_v17  ;;  %v242_v33 = vand.u32 2147483648, %v230_v16 }
  0xc8   :  { %1935 = vrcp.f32 %v287_v18  ;;  %vm181_vm2 = vmor %vm179_vm0, %vm180_vm1  ;;  %v240_v36 = vand.u32 2147483647, %v230_v16  ;;  %vm236_vm4 = vweird.f32 %v230_v16  ;;  %v299_v49 = vand.u32 2147483648, %v287_v18 }
  0xc9   :  { %v176_v22 = vsub.f32 1.0, %v175_v19  ;;  %1937 = vtanh.f32 %v130_v23  ;;  %v243_v41 = vor.u32 1.1754944e-38, %v242_v33  ;;  %vm293_vm8 = vweird.f32 %v287_v18 }
  0xca   :  { %vm241_vm7 = vcmp.eq.f32.partialorder %v240_v36, 8.507059e+37  ;;  %v297_v52 = vand.u32 2147483647, %v287_v18  ;;  %v300_v53 = vor.u32 1.1754944e-38, %v299_v49 }
  0xcb   :  { %v177_v24 = vmul.f32 %v1932_v17, %v176_v22 }
  0xcc   :  { %vm298_vm11 = vcmp.eq.f32.partialorder %v297_v52, 8.507059e+37  ;;  %v2593_v52 = vld [vmem:[#allocation10 + $0xf8] sm:$0xff] }
  0xcd   :  { %v1934_v25 = vpop.eup %1933  ;;  %v178_v28 = vadd.f32 %v1932_v17, %v177_v24 }
  0xce   :  { %v1936_v26 = vpop.eup %1935  ;;  %v232_v27 = vmul.f32 %v1934_v25, %v230_v16  ;;  %vm237_vm3 = vweird.f32 %v1934_v25 }
  0xcf   :  { %v289_v29 = vmul.f32 %v1936_v26, %v287_v18  ;;  %v182_v35 = vsel %vm181_vm2, %v1932_v17, %v178_v28  ;;  %v1938_v40 = vpop.eup %1937  ;;  %vm238_vm6 = vmor %vm236_vm4, %vm237_vm3  ;;  %vm294_vm9 = vweird.f32 %v1936_v26 }
  0xd0   :  { %v233_v31 = vsub.f32 1.0, %v232_v27  ;;  %v187_v43 = vsel %vm184_vm5, %v186_v38, %v182_v35  ;;  %vm295_vm10 = vmor %vm293_vm8, %vm294_vm9 }
  0xd1   :  { %v290_v37 = vsub.f32 1.0, %v289_v29  ;;  %v304_v48 = vmul.f32 %v1938_v40, %v187_v43 }
  0xd2   :  { %v234_v34 = vmul.f32 %v1934_v25, %v233_v31 }
  0xd3   :  { %v291_v45 = vmul.f32 %v1936_v26, %v290_v37 }
  0xd4   :  { %v235_v39 = vadd.f32 %v1934_v25, %v234_v34 }
  0xd5   :  { %v292_v51 = vadd.f32 %v1936_v26, %v291_v45 }
  0xd6   :  { %v239_v44 = vsel %vm238_vm6, %v1934_v25, %v235_v39 }
  0xd7   :  { %v244_v46 = vsel %vm241_vm7, %v243_v41, %v239_v44  ;;  %v296_v54 = vsel %vm295_vm10, %v1936_v26, %v292_v51 }
  0xd8   :  { %v303_v47 = vmul.f32 %v244_v46, %v86_v42  ;;  %v301_v56 = vsel %vm298_vm11, %v300_v53, %v296_v54  ;;  %v2595_v53 = vld [vmem:[#allocation10 + $0x178] sm:$0xff] }
  0xd9   :  { %3335 = vst [vmem:[#allocation20_spill] sm:$0xff] %v2595_v53  ;;  %v2599_v54 = vld [vmem:[#allocation10 + $0x1f8] sm:$0xff] }
  0xda   :  { %v2582_v50 = vadd.f32 %v304_v48, %v303_v47  ;;  %3336 = vst [vmem:[#allocation21_spill] sm:$0xff] %v2599_v54 }
  0xdc   :  { %1939 = vtanh.f32 %v2582_v50  ;;  %309 = vst [vmem:[#allocation13] sm:$0xff] %v2582_v50 }
  0xe2   :  { %v1940_v55 = vpop.eup %1939 }
  0xe3   :  { %v307_v57 = vmul.f32 %v1940_v55, %v301_v56  ;;  %v2603_v55 = vld [vmem:[#allocation10 + $0x70] sm:$0xff] }
  0xe4   :  { %v2605_v56 = vld [vmem:[#allocation10 + $0xf0] sm:$0xff] }
  0xe5   :  { %308 = vst [vmem:[#allocation12] sm:$0xff] %v307_v57  ;;  %347 = vmatmul.f32.vlgmr.msrb.gmra.mxu0 %v307_v57  ;;  %385 = vmatmul.f32.vlgmr.msrb.gmra.mxu1 %v307_v57 }
  0xe6   :  { %441 = vmatmul.f32.vlgmr.msrb.gmra.mxu2 %v307_v57  ;;  %497 = vmatmul.f32.vlgmr.msrb.gmra.mxu3 %v307_v57  ;;  %3337 = vst [vmem:[#allocation22_spill] sm:$0xff] %v2605_v56  ;;  %v2607_v57 = vld [vmem:[#allocation10 + $0x170] sm:$0xff] }
  0xe7   :  { %809 = vmatpush.msrb.mxu1 %v2593_v52  ;;  %865 = vmatpush.msrb.mxu2 %v2595_v53 }
  0xe8   :  { %921 = vmatpush.msrb.mxu3 %v2599_v54 }
  0xe9   :  { %810 = vmatpush.msrb.mxu1 %v2605_v56  ;;  %866 = vmatpush.msrb.mxu2 %v2607_v57 }
 0x162   :  { %v386_v60 = vpop.f32.mrf.mxu1  ;;  %v348_v16 = vpop.f32.mrf.mxu0 }
 0x163   :  { %v389_v61 = vadd.f32 %v386_v60, %v312_v59  ;;  %v351_v19 = vadd.f32 %v348_v16, %v311_v3  ;;  %v2611_v59 = vld [vmem:[#allocation10 + $0x1f0] sm:$0xff]  ;;  %v2615_v60 = vld [vmem:[#allocation10 + $0x68] sm:$0xff] }
 0x164   :  { %922 = vmatpush.msrb.mxu3 %v2611_v59  ;;  %v2665_v3 = vld [vmem:[#allocation10 + $0xc8] sm:$0xff] }
 0x165   :  { %v1894_v62 = vmul.f32 -1.442695, %v389_v61  ;;  %v2617_v61 = vld [vmem:[#allocation10 + $0xe8] sm:$0xff] }
 0x166   :  { %3338 = vst [vmem:[#allocation23_spill] sm:$0xff] %v2617_v61  ;;  %811 = vmatpush.msrb.mxu1 %v2617_v61  ;;  %v2667_v16 = vld [vmem:[#allocation10 + $0x148] sm:$0xff] }
 0x167   :  { %1941 = vpow2.f32 %v1894_v62  ;;  %v2619_v62 = vld [vmem:[#allocation10 + $0x168] sm:$0xff] }
 0x168   :  { %867 = vmatpush.msrb.mxu2 %v2619_v62 }
 0x169   :  { %v442_v0 = vpop.f32.mrf.mxu2  ;;  %v498_v1 = vpop.f32.mrf.mxu3 }
 0x16a   :  { %v445_v2 = vadd.f32 %v442_v0, %v313_v63  ;;  %v501_v4 = vadd.f32 %v498_v1, %v314_v58  ;;  %v2623_v63 = vld [vmem:[#allocation10 + $0x1e8] sm:$0xff]  ;;  %v2627_v58 = vld [vmem:[#allocation10 + $0x60] sm:$0xff] }
 0x16b   :  { %923 = vmatpush.msrb.mxu3 %v2623_v63  ;;  %3339 = vst [vmem:[#allocation24_spill] sm:$0xff] %v2627_v58  ;;  %v2629_v0 = vld [vmem:[#allocation10 + $0xe0] sm:$0xff] }
 0x16c   :  { %v1895_v5 = vmul.f32 -1.442695, %v445_v2  ;;  %v1896_v6 = vmul.f32 -1.442695, %v501_v4  ;;  %3340 = vst [vmem:[#allocation25_spill] sm:$0xff] %v2629_v0  ;;  %v2631_v1 = vld [vmem:[#allocation10 + $0x160] sm:$0xff]  ;;  %812 = vmatpush.msrb.mxu1 %v2629_v0 }
 0x16d   :  { %v1942_v7 = vpop.eup %1941  ;;  %v2635_v2 = vld [vmem:[#allocation10 + $0x1e0] sm:$0xff]  ;;  %868 = vmatpush.msrb.mxu2 %v2631_v1  ;;  %v2639_v4 = vld [vmem:[#allocation10 + $0x58] sm:$0xff] }
 0x16e   :  { %v393_v8 = vadd.f32 1.0, %v1942_v7  ;;  %1943 = vpow2.f32 %v1895_v5  ;;  %924 = vmatpush.msrb.mxu3 %v2635_v2  ;;  %3341 = vst [vmem:[#allocation26_spill] sm:$0xff] %v2639_v4  ;;  %v2641_v5 = vld [vmem:[#allocation10 + $0xd8] sm:$0xff] }
 0x16f   :  { %1945 = vpow2.f32 %v1896_v6  ;;  %3342 = vst [vmem:[#allocation27_spill] sm:$0xff] %v2641_v5  ;;  %v2643_v6 = vld [vmem:[#allocation10 + $0x158] sm:$0xff]  ;;  %813 = vmatpush.msrb.mxu1 %v2641_v5 }
 0x170   :  { %1947 = vrcp.f32 %v393_v8  ;;  %v405_v23 = vand.u32 2147483648, %v393_v8  ;;  %vm399_vm13 = vweird.f32 %v393_v8  ;;  %v403_v25 = vand.u32 2147483647, %v393_v8  ;;  %v532_v7 = vld [vmem:[#allocation4 + $0x48] sm:$0xff]  ;;  %869 = vmatpush.msrb.mxu2 %v2643_v6 }
 0x172   :  { %v406_v31 = vor.u32 1.1754944e-38, %v405_v23  ;;  %vm404_vm0 = vcmp.eq.f32.partialorder %v403_v25, 8.507059e+37  ;;  %v534_v23 = vld [vmem:[#allocation4 + $0x58] sm:$0xff]  ;;  %v2687_v25 = vld [vmem:[#allocation10 + $0x38] sm:$0xff] }
 0x174   :  { %v1944_v9 = vpop.eup %1943 }
 0x175   :  { %v1946_v10 = vpop.eup %1945  ;;  %v449_v11 = vadd.f32 1.0, %v1944_v9  ;;  %v2651_v9 = vld [vmem:[#allocation10 + $0x50] sm:$0xff] }
 0x176   :  { %v1948_v12 = vpop.eup %1947  ;;  %v505_v13 = vadd.f32 1.0, %v1946_v10  ;;  %v2653_v10 = vld [vmem:[#allocation10 + $0xd0] sm:$0xff] }
 0x177   :  { %v395_v14 = vmul.f32 %v1948_v12, %v393_v8  ;;  %1949 = vrcp.f32 %v449_v11  ;;  %vm400_vm12 = vweird.f32 %v1948_v12  ;;  %v461_v27 = vand.u32 2147483648, %v449_v11  ;;  %v2647_v8 = vld [vmem:[#allocation10 + $0x1d8] sm:$0xff]  ;;  %814 = vmatpush.msrb.mxu1 %v2653_v10 }
 0x178   :  { %1951 = vrcp.f32 %v505_v13  ;;  %vm401_vm14 = vmor %vm399_vm13, %vm400_vm12  ;;  %v459_v30 = vand.u32 2147483647, %v449_v11  ;;  %vm455_vm1 = vweird.f32 %v449_v11  ;;  %v517_v44 = vand.u32 2147483648, %v505_v13  ;;  %3343 = vst [vmem:[#allocation28_spill] sm:$0xff] %v2647_v8  ;;  %925 = vmatpush.msrb.mxu3 %v2647_v8 }
 0x179   :  { %v396_v15 = vsub.f32 1.0, %v395_v14  ;;  %1953 = vtanh.f32 %v351_v19  ;;  %v462_v35 = vor.u32 1.1754944e-38, %v461_v27  ;;  %vm511_vm5 = vweird.f32 %v505_v13  ;;  %815 = vmatpush.msrb.mxu1 %v2665_v3  ;;  %v2675_v19 = vld [vmem:[#allocation10 + $0x40] sm:$0xff]  ;;  %v2691_v27 = vld [vmem:[#allocation10 + $0x138] sm:$0xff] }
 0x17a   :  { %vm460_vm3 = vcmp.eq.f32.partialorder %v459_v30, 8.507059e+37  ;;  %v515_v45 = vand.u32 2147483647, %v505_v13  ;;  %v518_v47 = vor.u32 1.1754944e-38, %v517_v44  ;;  %v2721_v44 = vld [vmem:[#allocation10 + $0x20] sm:$0xff] }
 0x17b   :  { %v397_v17 = vmul.f32 %v1948_v12, %v396_v15  ;;  %v2663_v15 = vld [vmem:[#allocation10 + $0x48] sm:$0xff] }
 0x17c   :  { %vm516_vm7 = vcmp.eq.f32.partialorder %v515_v45, 8.507059e+37 }
 0x17d   :  { %v1950_v18 = vpop.eup %1949  ;;  %v398_v21 = vadd.f32 %v1948_v12, %v397_v17  ;;  %v2671_v17 = vld [vmem:[#allocation10 + $0x1c8] sm:$0xff] }
 0x17e   :  { %v1952_v20 = vpop.eup %1951  ;;  %v451_v22 = vmul.f32 %v1950_v18, %v449_v11  ;;  %vm456_vm15 = vweird.f32 %v1950_v18  ;;  %v2655_v11 = vld [vmem:[#allocation10 + $0x150] sm:$0xff] }
 0x17f   :  { %v507_v24 = vmul.f32 %v1952_v20, %v505_v13  ;;  %v402_v28 = vsel %vm401_vm14, %v1948_v12, %v398_v21  ;;  %vm457_vm2 = vmor %vm455_vm1, %vm456_vm15  ;;  %v1954_v37 = vpop.eup %1953  ;;  %vm512_vm4 = vweird.f32 %v1952_v20  ;;  %v2659_v13 = vld [vmem:[#allocation10 + $0x1d0] sm:$0xff]  ;;  %870 = vmatpush.msrb.mxu2 %v2655_v11  ;;  %v2679_v21 = vld [vmem:[#allocation10 + $0x140] sm:$0xff] }
 0x180   :  { %v452_v26 = vsub.f32 1.0, %v451_v22  ;;  %v407_v34 = vsel %vm404_vm0, %v406_v31, %v402_v28  ;;  %vm513_vm6 = vmor %vm511_vm5, %vm512_vm4  ;;  %926 = vmatpush.msrb.mxu3 %v2659_v13  ;;  %v533_v22 = vld [vmem:[#allocation4 + $0x50] sm:$0xff]  ;;  %v2695_v28 = vld [vmem:[#allocation10 + $0x1b8] sm:$0xff] }
 0x181   :  { %v508_v32 = vsub.f32 1.0, %v507_v24  ;;  %v522_v40 = vmul.f32 %v1954_v37, %v407_v34  ;;  %871 = vmatpush.msrb.mxu2 %v2667_v16  ;;  %v2683_v24 = vld [vmem:[#allocation10 + $0x1c0] sm:$0xff]  ;;  %v2699_v31 = vld [vmem:[#allocation10 + $0x30] sm:$0xff]  ;;  %v2711_v37 = vld [vmem:[#allocation10 + $0x28] sm:$0xff] }
 0x182   :  { %v453_v29 = vmul.f32 %v1950_v18, %v452_v26  ;;  %927 = vmatpush.msrb.mxu3 %v2671_v17  ;;  %v2689_v26 = vld [vmem:[#allocation10 + $0xb8] sm:$0xff] }
 0x183   :  { %v509_v39 = vmul.f32 %v1952_v20, %v508_v32  ;;  %872 = vmatpush.msrb.mxu2 %v2679_v21  ;;  %v2701_v32 = vld [vmem:[#allocation10 + $0xb0] sm:$0xff] }
 0x184   :  { %v454_v33 = vadd.f32 %v1950_v18, %v453_v29  ;;  %928 = vmatpush.msrb.mxu3 %v2683_v24 }
 0x185   :  { %v510_v43 = vadd.f32 %v1952_v20, %v509_v39  ;;  %873 = vmatpush.msrb.mxu2 %v2691_v27  ;;  %v2715_v39 = vld [vmem:[#allocation10 + $0x128] sm:$0xff] }
 0x186   :  { %v458_v36 = vsel %vm457_vm2, %v1950_v18, %v454_v33  ;;  %929 = vmatpush.msrb.mxu3 %v2695_v28  ;;  %v2703_v33 = vld [vmem:[#allocation10 + $0x130] sm:$0xff] }
 0x187   :  { %v463_v38 = vsel %vm460_vm3, %v462_v35, %v458_v36  ;;  %v514_v46 = vsel %vm513_vm6, %v1952_v20, %v510_v43  ;;  %v2677_v20 = vld [vmem:[#allocation10 + $0xc0] sm:$0xff]  ;;  %v2707_v36 = vld [vmem:[#allocation10 + $0x1b0] sm:$0xff]  ;;  %874 = vmatpush.msrb.mxu2 %v2703_v33  ;;  %v2719_v43 = vld [vmem:[#allocation10 + $0x1a8] sm:$0xff] }
 0x188   :  { %v521_v41 = vmul.f32 %v463_v38, %v2582_v50  ;;  %v519_v49 = vsel %vm516_vm7, %v518_v47, %v514_v46  ;;  %v2591_v50 = vld [vmem:[#allocation10 + $0x78] sm:$0xff]  ;;  %816 = vmatpush.msrb.mxu1 %v2677_v20  ;;  %930 = vmatpush.msrb.mxu3 %v2707_v36  ;;  %v2713_v38 = vld [vmem:[#allocation10 + $0xa8] sm:$0xff]  ;;  %v2725_v46 = vld [vmem:[#allocation10 + $0xa0] sm:$0xff] }
 0x189   :  { %771 = vmatpush.msrb.mxu0 %v2591_v50  ;;  %875 = vmatpush.msrb.mxu2 %v2715_v39  ;;  %v2727_v47 = vld [vmem:[#allocation10 + $0x120] sm:$0xff] }
 0x18a   :  { %v2587_v42 = vadd.f32 %v522_v40, %v521_v41  ;;  %817 = vmatpush.msrb.mxu1 %v2689_v26  ;;  %931 = vmatpush.msrb.mxu3 %v2719_v43 }
 0x18b   :  { %772 = vmatpush.msrb.mxu0 %v2603_v55  ;;  %876 = vmatpush.msrb.mxu2 %v2727_v47 }
 0x18c   :  { %529 = vst [vmem:[#allocation13 + $0x8] sm:$0xff] %v2587_v42  ;;  %1955 = vtanh.f32 %v2587_v42  ;;  %818 = vmatpush.msrb.mxu1 %v2701_v32 }
 0x18d   :  { %773 = vmatpush.msrb.mxu0 %v2615_v60 }
 0x18e   :  { %819 = vmatpush.msrb.mxu1 %v2713_v38 }
 0x18f   :  { %774 = vmatpush.msrb.mxu0 %v2627_v58 }
 0x190   :  { %820 = vmatpush.msrb.mxu1 %v2725_v46 }
 0x191   :  { %775 = vmatpush.msrb.mxu0 %v2639_v4 }
 0x192   :  { %v1956_v48 = vpop.eup %1955 }
 0x193   :  { %v525_v51 = vmul.f32 %v1956_v48, %v519_v49  ;;  %776 = vmatpush.msrb.mxu0 %v2651_v9  ;;  %v2729_v48 = vld [vmem:[#allocation10 + $0x1a0] sm:$0xff] }
 0x194   :  { %932 = vmatpush.msrb.mxu3 %v2729_v48 }
 0x195   :  { %527 = vst [vmem:[#allocation12 + $0x8] sm:$0xff] %v525_v51  ;;  %567 = vmatmul.f32.vlgmr.msra.gmra.mxu0 %v525_v51  ;;  %605 = vmatmul.f32.vlgmr.msra.gmra.mxu1 %v525_v51 }
 0x196   :  { %661 = vmatmul.f32.vlgmr.msra.gmra.mxu2 %v525_v51  ;;  %717 = vmatmul.f32.vlgmr.msra.gmra.mxu3 %v525_v51  ;;  %v2735_v51 = vld [vmem:[#allocation10 + $0x18] sm:$0xff] }
 0x197   :  { %777 = vmatpush.msrb.mxu0 %v2663_v15 }
 0x199   :  { %778 = vmatpush.msrb.mxu0 %v2675_v19 }
 0x19b   :  { %779 = vmatpush.msrb.mxu0 %v2687_v25 }
 0x19d   :  { %780 = vmatpush.msrb.mxu0 %v2699_v31 }
 0x19f   :  { %781 = vmatpush.msrb.mxu0 %v2711_v37 }
 0x1a1   :  { %782 = vmatpush.msrb.mxu0 %v2721_v44 }
 0x1a3   :  { %783 = vmatpush.msrb.mxu0 %v2735_v51 }
 0x212   :  { %v606_v12 = vpop.f32.mrf.mxu1 }
 0x213   :  { %v609_v14 = vadd.f32 %v606_v12, %v532_v7  ;;  %v2737_v7 = vld [vmem:[#allocation10 + $0x98] sm:$0xff] }
 0x214   :  { %3344 = vst [vmem:[#allocation29_spill] sm:$0xff] %v2737_v7  ;;  %v2739_v12 = vld [vmem:[#allocation10 + $0x118] sm:$0xff]  ;;  %821 = vmatpush.msrb.mxu1 %v2737_v7 }
 0x215   :  { %v1897_v18 = vmul.f32 -1.442695, %v609_v14  ;;  %3345 = vst [vmem:[#allocation30_spill] sm:$0xff] %v2739_v12  ;;  %v2743_v14 = vld [vmem:[#allocation10 + $0x198] sm:$0xff]  ;;  %877 = vmatpush.msrb.mxu2 %v2739_v12 }
 0x216   :  { %3346 = vst [vmem:[#allocation31_spill] sm:$0xff] %v2743_v14  ;;  %933 = vmatpush.msrb.mxu3 %v2743_v14 }
 0x217   :  { %1957 = vpow2.f32 %v1897_v18  ;;  %v2745_v18 = vld [vmem:[#allocation10 + $0x10] sm:$0xff] }
 0x218   :  { %3347 = vst [vmem:[#allocation32_spill] sm:$0xff] %v2745_v18  ;;  %784 = vmatpush.msrb.mxu0 %v2745_v18  ;;  %v2776_v18 = vld [vmem:[#allocation10 + $0x100] sm:$0xff] }
 0x219   :  { %v662_v29 = vpop.f32.mrf.mxu2  ;;  %v718_v30 = vpop.f32.mrf.mxu3  ;;  %3353 = vst [vmem:[#allocation38_spill] sm:$0xff] %v2776_v18 }
 0x21a   :  { %v665_v34 = vadd.f32 %v662_v29, %v533_v22  ;;  %v721_v35 = vadd.f32 %v718_v30, %v534_v23  ;;  %v2747_v22 = vld [vmem:[#allocation10 + $0x90] sm:$0xff]  ;;  %v2758_v30 = vld [vmem:[#allocation10 + $0x8] sm:$0xff] }
 0x21b   :  { %3348 = vst [vmem:[#allocation33_spill] sm:$0xff] %v2747_v22  ;;  %v2752_v23 = vld [vmem:[#allocation10 + $0x110] sm:$0xff]  ;;  %822 = vmatpush.msrb.mxu1 %v2747_v22  ;;  %785 = vmatpush.msrb.mxu0 %v2758_v30  ;;  %v2778_v22 = vld [vmem:[#allocation10 + $0x180] sm:$0xff] }
 0x21c   :  { %v1898_v40 = vmul.f32 -1.442695, %v665_v34  ;;  %v1899_v41 = vmul.f32 -1.442695, %v721_v35  ;;  %3349 = vst [vmem:[#allocation34_spill] sm:$0xff] %v2752_v23  ;;  %v2754_v29 = vld [vmem:[#allocation10 + $0x190] sm:$0xff]  ;;  %878 = vmatpush.msrb.mxu2 %v2752_v23 }
 0x21d   :  { %v1958_v45 = vpop.eup %1957  ;;  %3350 = vst [vmem:[#allocation35_spill] sm:$0xff] %v2754_v29  ;;  %v2760_v34 = vld [vmem:[#allocation10 + $0x88] sm:$0xff]  ;;  %934 = vmatpush.msrb.mxu3 %v2754_v29 }
 0x21e   :  { %v2731_v49 = vadd.f32 1.0, %v1958_v45  ;;  %1959 = vpow2.f32 %v1898_v40  ;;  %3351 = vst [vmem:[#allocation36_spill] sm:$0xff] %v2760_v34  ;;  %v2764_v35 = vld [vmem:[#allocation10 + $0x108] sm:$0xff]  ;;  %v2772_v45 = vld [vmem:[#allocation10 + $0x80] sm:$0xff]  ;;  %823 = vmatpush.msrb.mxu1 %v2760_v34 }
 0x21f   :  { %1961 = vpow2.f32 %v1899_v41  ;;  %v2766_v40 = vld [vmem:[#allocation10 + $0x188] sm:$0xff]  ;;  %v2770_v41 = vld [vmem:[#allocation10] sm:$0xff]  ;;  %3352 = vst [vmem:[#allocation37_spill] sm:$0xff] %v2772_v45  ;;  %879 = vmatpush.msrb.mxu2 %v2764_v35 }
 0x220   :  { %1963 = vrcp.f32 %v2731_v49  ;;  %935 = vmatpush.msrb.mxu3 %v2766_v40  ;;  %786 = vmatpush.msrb.mxu0 %v2770_v41  ;;  %vm619_vm9 = vweird.f32 %v2731_v49 }
 0x221   :  { %824 = vmatpush.msrb.mxu1 %v2772_v45  ;;  %880 = vmatpush.msrb.mxu2 %v2776_v18  ;;  %v568_v45 = vpop.f32.mrf.mxu0 }
 0x222   :  { %936 = vmatpush.msrb.mxu3 %v2778_v22  ;;  %991 = vmatpush.msra.mxu0 %v2591_v50 }
 0x223   :  { %1029 = vmatpush.msra.mxu1 %v2593_v52  ;;  %1085 = vmatpush.msra.mxu2 %v2595_v53 }
 0x224   :  { %v1960_v14 = vpop.eup %1959  ;;  %1141 = vmatpush.msra.mxu3 %v2599_v54  ;;  %992 = vmatpush.msra.mxu0 %v2603_v55 }
 0x225   :  { %v1962_v12 = vpop.eup %1961  ;;  %v2780_v7 = vadd.f32 1.0, %v1960_v14  ;;  %v531_v14 = vld [vmem:[#allocation4 + $0x40] sm:$0xff]  ;;  %1030 = vmatpush.msra.mxu1 %v2605_v56  ;;  %1086 = vmatpush.msra.mxu2 %v2607_v57 }
 0x226   :  { %v2784_v29 = vpop.eup %1963  ;;  %v2786_v23 = vadd.f32 1.0, %v1962_v12  ;;  %1142 = vmatpush.msra.mxu3 %v2611_v59  ;;  %993 = vmatpush.msra.mxu0 %v2615_v60  ;;  %v571_v53 = vadd.f32 %v568_v45, %v531_v14 }
 0x227   :  { %v615_v34 = vmul.f32 %v2784_v29, %v2731_v49  ;;  %1965 = vrcp.f32 %v2780_v7  ;;  %1031 = vmatpush.msra.mxu1 %v2617_v61  ;;  %1087 = vmatpush.msra.mxu2 %v2619_v62  ;;  %vm620_vm8 = vweird.f32 %v2784_v29  ;;  %v625_v61 = vand.u32 2147483648, %v2731_v49 }
 0x228   :  { %1967 = vrcp.f32 %v2786_v23  ;;  %1143 = vmatpush.msra.mxu3 %v2623_v63  ;;  %994 = vmatpush.msra.mxu0 %v2627_v58  ;;  %vm2825_vm10 = vmor %vm619_vm9, %vm620_vm8  ;;  %v681_v58 = vand.u32 2147483648, %v2780_v7  ;;  %vm675_vm13 = vweird.f32 %v2780_v7  ;;  %vm731_vm1 = vweird.f32 %v2786_v23 }
 0x229   :  { %v616_v12 = vsub.f32 1.0, %v615_v34  ;;  %1032 = vmatpush.msra.mxu1 %v2629_v0  ;;  %1088 = vmatpush.msra.mxu2 %v2631_v1  ;;  %1969 = vtanh.f32 %v571_v53  ;;  %v626_v53 = vor.u32 1.1754944e-38, %v625_v61 }
 0x22a   :  { %1144 = vmatpush.msra.mxu3 %v2635_v2  ;;  %995 = vmatpush.msra.mxu0 %v2639_v4  ;;  %v679_v4 = vand.u32 2147483647, %v2780_v7  ;;  %v682_v0 = vor.u32 1.1754944e-38, %v681_v58 }
 0x22b   :  { %v617_v18 = vmul.f32 %v2784_v29, %v616_v12  ;;  %1033 = vmatpush.msra.mxu1 %v2641_v5  ;;  %1089 = vmatpush.msra.mxu2 %v2643_v6 }
 0x22c   :  { %1145 = vmatpush.msra.mxu3 %v2647_v8  ;;  %996 = vmatpush.msra.mxu0 %v2651_v9  ;;  %vm680_vm15 = vcmp.eq.f32.partialorder %v679_v4, 8.507059e+37 }
 0x22d   :  { %v1966_v34 = vpop.eup %1965  ;;  %v618_v56 = vadd.f32 %v2784_v29, %v617_v18  ;;  %v623_v18 = vand.u32 2147483647, %v2731_v49  ;;  %1034 = vmatpush.msra.mxu1 %v2653_v10  ;;  %1090 = vmatpush.msra.mxu2 %v2655_v11 }
 0x22e   :  { %v2809_v54 = vpop.eup %1967  ;;  %v671_v12 = vmul.f32 %v1966_v34, %v2780_v7  ;;  %vm676_vm11 = vweird.f32 %v1966_v34  ;;  %1146 = vmatpush.msra.mxu3 %v2659_v13  ;;  %997 = vmatpush.msra.mxu0 %v2663_v15 }
 0x22f   :  { %v727_v45 = vmul.f32 %v2809_v54, %v2786_v23  ;;  %v622_v49 = vsel %vm2825_vm10, %v2784_v29, %v618_v56  ;;  %vm624_vm12 = vcmp.eq.f32.partialorder %v623_v18, 8.507059e+37  ;;  %1035 = vmatpush.msra.mxu1 %v2665_v3  ;;  %vm677_vm14 = vmor %vm675_vm13, %vm676_vm11  ;;  %1091 = vmatpush.msra.mxu2 %v2667_v16  ;;  %v1970_v29 = vpop.eup %1969  ;;  %vm732_vm0 = vweird.f32 %v2809_v54 }
 0x230   :  { %v672_v14 = vsub.f32 1.0, %v671_v12  ;;  %v627_v56 = vsel %vm624_vm12, %v626_v53, %v622_v49  ;;  %1147 = vmatpush.msra.mxu3 %v2671_v17  ;;  %998 = vmatpush.msra.mxu0 %v2675_v19  ;;  %vm733_vm2 = vmor %vm731_vm1, %vm732_vm0  ;;  %v3356_v49 = vld [vmem:[#allocation29_spill] sm:$0xff] }
 0x231   :  { %v728_v5 = vsub.f32 1.0, %v727_v45  ;;  %1036 = vmatpush.msra.mxu1 %v2677_v20  ;;  %1092 = vmatpush.msra.mxu2 %v2679_v21  ;;  %v742_v18 = vmul.f32 %v1970_v29, %v627_v56  ;;  %v3361_v29 = vld [vmem:[#allocation34_spill] sm:$0xff] }
 0x232   :  { %v673_v12 = vmul.f32 %v1966_v34, %v672_v14  ;;  %1148 = vmatpush.msra.mxu3 %v2683_v24  ;;  %999 = vmatpush.msra.mxu0 %v2687_v25 }
 0x233   :  { %v729_v7 = vmul.f32 %v2809_v54, %v728_v5  ;;  %1037 = vmatpush.msra.mxu1 %v2689_v26  ;;  %1093 = vmatpush.msra.mxu2 %v2691_v27 }
 0x234   :  { %v674_v8 = vadd.f32 %v1966_v34, %v673_v12  ;;  %1149 = vmatpush.msra.mxu3 %v2695_v28  ;;  %1000 = vmatpush.msra.mxu0 %v2699_v31  ;;  %v3358_v12 = vld [vmem:[#allocation31_spill] sm:$0xff] }
 0x235   :  { %1038 = vmatpush.msra.mxu1 %v2701_v32  ;;  %v730_v5 = vadd.f32 %v2809_v54, %v729_v7  ;;  %1094 = vmatpush.msra.mxu2 %v2703_v33  ;;  %v3363_v7 = vld [vmem:[#allocation36_spill] sm:$0xff] }
 0x236   :  { %v678_v61 = vsel %vm677_vm14, %v1966_v34, %v674_v8  ;;  %1150 = vmatpush.msra.mxu3 %v2707_v36  ;;  %1001 = vmatpush.msra.mxu0 %v2711_v37  ;;  %v735_v8 = vand.u32 2147483647, %v2786_v23 }
 0x237   :  { %v683_v45 = vsel %vm680_vm15, %v682_v0, %v678_v61  ;;  %1039 = vmatpush.msra.mxu1 %v2713_v38  ;;  %1095 = vmatpush.msra.mxu2 %v2715_v39  ;;  %v734_v34 = vsel %vm733_vm2, %v2809_v54, %v730_v5  ;;  %v3359_v0 = vld [vmem:[#allocation32_spill] sm:$0xff]  ;;  %v3360_v61 = vld [vmem:[#allocation33_spill] sm:$0xff] }
 0x238   :  { %v741_v58 = vmul.f32 %v683_v45, %v2587_v42  ;;  %v737_v42 = vand.u32 2147483648, %v2786_v23  ;;  %1151 = vmatpush.msra.mxu3 %v2719_v43  ;;  %1002 = vmatpush.msra.mxu0 %v2721_v44  ;;  %vm736_vm3 = vcmp.eq.f32.partialorder %v735_v8, 8.507059e+37  ;;  %v3357_v23 = vld [vmem:[#allocation30_spill] sm:$0xff]  ;;  %v3362_v45 = vld [vmem:[#allocation35_spill] sm:$0xff]  ;;  %v3366_v5 = vld [vmem:[#allocation20_spill] sm:$0xff] }
 0x239   :  { %1040 = vmatpush.msra.mxu1 %v2725_v46  ;;  %1096 = vmatpush.msra.mxu2 %v2727_v47  ;;  %v3368_v8 = vld [vmem:[#allocation22_spill] sm:$0xff] }
 0x23a   :  { %v2855_v4 = vadd.f32 %v742_v18, %v741_v58  ;;  %1152 = vmatpush.msra.mxu3 %v2729_v48  ;;  %v738_v14 = vor.u32 1.1754944e-38, %v737_v42  ;;  %1003 = vmatpush.msra.mxu0 %v2735_v51  ;;  %v3364_v18 = vld [vmem:[#allocation37_spill] sm:$0xff]  ;;  %v3365_v58 = vld [vmem:[#allocation38_spill] sm:$0xff] }
 0x23b   :  { %1041 = vmatpush.msra.mxu1 %v3356_v49  ;;  %1097 = vmatpush.msra.mxu2 %v3357_v23  ;;  %v3367_v42 = vld [vmem:[#allocation21_spill] sm:$0xff] }
 0x23c   :  { %749 = vst [vmem:[#allocation13 + $0x10] sm:$0xff] %v2855_v4  ;;  %1971 = vtanh.f32 %v2855_v4  ;;  %1153 = vmatpush.msra.mxu3 %v3358_v12  ;;  %v739_v56 = vsel %vm736_vm3, %v738_v14, %v734_v34  ;;  %1004 = vmatpush.msra.mxu0 %v3359_v0  ;;  %v3369_v34 = vld [vmem:[#allocation23_spill] sm:$0xff] }
 0x23d   :  { %1042 = vmatpush.msra.mxu1 %v3360_v61  ;;  %1098 = vmatpush.msra.mxu2 %v3361_v29 }
 0x23e   :  { %1154 = vmatpush.msra.mxu3 %v3362_v45  ;;  %1005 = vmatpush.msra.mxu0 %v2758_v30 }
 0x23f   :  { %1043 = vmatpush.msra.mxu1 %v3363_v7  ;;  %1099 = vmatpush.msra.mxu2 %v2764_v35 }
 0x240   :  { %1155 = vmatpush.msra.mxu3 %v2766_v40  ;;  %1006 = vmatpush.msra.mxu0 %v2770_v41 }
 0x241   :  { %1044 = vmatpush.msra.mxu1 %v3364_v18  ;;  %1100 = vmatpush.msra.mxu2 %v3365_v58 }
 0x242   :  { %v1972_v53 = vpop.eup %1971  ;;  %1156 = vmatpush.msra.mxu3 %v2778_v22 }
 0x243   :  { %v745_v54 = vmul.f32 %v1972_v53, %v739_v56 }
 0x245   :  { %747 = vst [vmem:[#allocation12 + $0x10] sm:$0xff] %v745_v54  ;;  %787 = vmatmul.f32.vlgmr.msrb.gmra.mxu0 %v745_v54  ;;  %825 = vmatmul.f32.vlgmr.msrb.gmra.mxu1 %v745_v54 }
 0x246   :  { %881 = vmatmul.f32.vlgmr.msrb.gmra.mxu2 %v745_v54  ;;  %937 = vmatmul.f32.vlgmr.msrb.gmra.mxu3 %v745_v54 }
 0x247   :  { %1211 = vmatpush.msrb.mxu0 %v2591_v50  ;;  %1249 = vmatpush.msrb.mxu1 %v2593_v52  ;;  %v3370_v50 = vld [vmem:[#allocation24_spill] sm:$0xff]  ;;  %v3371_v52 = vld [vmem:[#allocation25_spill] sm:$0xff] }
 0x248   :  { %1305 = vmatpush.msrb.mxu2 %v3366_v5  ;;  %1361 = vmatpush.msrb.mxu3 %v3367_v42 }
 0x249   :  { %1212 = vmatpush.msrb.mxu0 %v2603_v55  ;;  %1250 = vmatpush.msrb.mxu1 %v3368_v8  ;;  %v3372_v55 = vld [vmem:[#allocation26_spill] sm:$0xff] }
 0x24a   :  { %1306 = vmatpush.msrb.mxu2 %v2607_v57  ;;  %1362 = vmatpush.msrb.mxu3 %v2611_v59  ;;  %v3373_v57 = vld [vmem:[#allocation27_spill] sm:$0xff]  ;;  %v3374_v59 = vld [vmem:[#allocation28_spill] sm:$0xff] }
 0x24b   :  { %1213 = vmatpush.msrb.mxu0 %v2615_v60  ;;  %1251 = vmatpush.msrb.mxu1 %v3369_v34  ;;  %v752_v60 = vld [vmem:[#allocation4 + $0x68] sm:$0xff] }
 0x24c   :  { %1307 = vmatpush.msrb.mxu2 %v2619_v62  ;;  %1363 = vmatpush.msrb.mxu3 %v2623_v63 }
 0x24d   :  { %1214 = vmatpush.msrb.mxu0 %v3370_v50  ;;  %1252 = vmatpush.msrb.mxu1 %v3371_v52 }
 0x24e   :  { %1308 = vmatpush.msrb.mxu2 %v2631_v1  ;;  %1364 = vmatpush.msrb.mxu3 %v2635_v2  ;;  %v753_v2 = vld [vmem:[#allocation4 + $0x70] sm:$0xff] }
 0x24f   :  { %1215 = vmatpush.msrb.mxu0 %v3372_v55  ;;  %1253 = vmatpush.msrb.mxu1 %v3373_v57  ;;  %v973_v55 = vld [vmem:[#allocation4 + $0x90] sm:$0xff]  ;;  %v974_v57 = vld [vmem:[#allocation4 + $0x98] sm:$0xff] }
 0x250   :  { %1309 = vmatpush.msrb.mxu2 %v2643_v6  ;;  %1365 = vmatpush.msrb.mxu3 %v3374_v59  ;;  %v754_v6 = vld [vmem:[#allocation4 + $0x78] sm:$0xff] }
 0x251   :  { %1216 = vmatpush.msrb.mxu0 %v2651_v9  ;;  %1254 = vmatpush.msrb.mxu1 %v2653_v10 }
 0x252   :  { %1310 = vmatpush.msrb.mxu2 %v2655_v11  ;;  %1366 = vmatpush.msrb.mxu3 %v2659_v13 }
 0x253   :  { %1217 = vmatpush.msrb.mxu0 %v2663_v15  ;;  %1255 = vmatpush.msrb.mxu1 %v2665_v3 }
 0x254   :  { %1311 = vmatpush.msrb.mxu2 %v2667_v16  ;;  %1367 = vmatpush.msrb.mxu3 %v2671_v17 }
 0x255   :  { %1218 = vmatpush.msrb.mxu0 %v2675_v19  ;;  %1256 = vmatpush.msrb.mxu1 %v2677_v20 }
 0x256   :  { %1312 = vmatpush.msrb.mxu2 %v2679_v21  ;;  %1368 = vmatpush.msrb.mxu3 %v2683_v24 }
 0x257   :  { %1219 = vmatpush.msrb.mxu0 %v2687_v25  ;;  %1257 = vmatpush.msrb.mxu1 %v2689_v26 }
 0x258   :  { %1313 = vmatpush.msrb.mxu2 %v2691_v27  ;;  %1369 = vmatpush.msrb.mxu3 %v2695_v28  ;;  %v751_v28 = vld [vmem:[#allocation4 + $0x60] sm:$0xff] }
 0x259   :  { %1220 = vmatpush.msrb.mxu0 %v2699_v31  ;;  %1258 = vmatpush.msrb.mxu1 %v2701_v32 }
 0x25a   :  { %1314 = vmatpush.msrb.mxu2 %v2703_v33  ;;  %1370 = vmatpush.msrb.mxu3 %v2707_v36 }
 0x25b   :  { %1221 = vmatpush.msrb.mxu0 %v2711_v37  ;;  %1259 = vmatpush.msrb.mxu1 %v2713_v38 }
 0x25c   :  { %1315 = vmatpush.msrb.mxu2 %v2715_v39  ;;  %1371 = vmatpush.msrb.mxu3 %v2719_v43 }
 0x25d   :  { %1222 = vmatpush.msrb.mxu0 %v2721_v44  ;;  %1260 = vmatpush.msrb.mxu1 %v2725_v46 }
 0x25e   :  { %1316 = vmatpush.msrb.mxu2 %v2727_v47  ;;  %1372 = vmatpush.msrb.mxu3 %v2729_v48 }
 0x25f   :  { %1223 = vmatpush.msrb.mxu0 %v2735_v51  ;;  %1261 = vmatpush.msrb.mxu1 %v3356_v49 }
 0x260   :  { %1317 = vmatpush.msrb.mxu2 %v3357_v23  ;;  %1373 = vmatpush.msrb.mxu3 %v3358_v12 }
 0x261   :  { %1224 = vmatpush.msrb.mxu0 %v3359_v0  ;;  %1262 = vmatpush.msrb.mxu1 %v3360_v61 }
 0x262   :  { %1318 = vmatpush.msrb.mxu2 %v3361_v29  ;;  %1374 = vmatpush.msrb.mxu3 %v3362_v45 }
 0x263   :  { %1225 = vmatpush.msrb.mxu0 %v2758_v30  ;;  %1263 = vmatpush.msrb.mxu1 %v3363_v7 }
 0x264   :  { %1319 = vmatpush.msrb.mxu2 %v2764_v35  ;;  %1375 = vmatpush.msrb.mxu3 %v2766_v40 }
 0x265   :  { %1226 = vmatpush.msrb.mxu0 %v2770_v41  ;;  %1264 = vmatpush.msrb.mxu1 %v3364_v18 }
 0x266   :  { %1320 = vmatpush.msrb.mxu2 %v3365_v58  ;;  %1376 = vmatpush.msrb.mxu3 %v2778_v22 }
 0x2c2   :  { %v826_v62 = vpop.f32.mrf.mxu1  ;;  %v788_v31 = vpop.f32.mrf.mxu0 }
 0x2c3   :  { %v829_v63 = vadd.f32 %v826_v62, %v752_v60  ;;  %v791_v36 = vadd.f32 %v788_v31, %v751_v28 }
 0x2c5   :  { %v1900_v1 = vmul.f32 -1.442695, %v829_v63 }
 0x2c7   :  { %1973 = vpow2.f32 %v1900_v1 }
 0x2c9   :  { %v882_v9 = vpop.f32.mrf.mxu2  ;;  %v938_v10 = vpop.f32.mrf.mxu3 }
 0x2ca   :  { %v885_v11 = vadd.f32 %v882_v9, %v753_v2  ;;  %v941_v13 = vadd.f32 %v938_v10, %v754_v6 }
 0x2cc   :  { %v1901_v15 = vmul.f32 -1.442695, %v885_v11  ;;  %v1902_v3 = vmul.f32 -1.442695, %v941_v13 }
 0x2cd   :  { %v1974_v16 = vpop.eup %1973 }
 0x2ce   :  { %v833_v17 = vadd.f32 1.0, %v1974_v16  ;;  %1975 = vpow2.f32 %v1901_v15 }
 0x2cf   :  { %1977 = vpow2.f32 %v1902_v3 }
 0x2d0   :  { %1979 = vrcp.f32 %v833_v17  ;;  %v845_v43 = vand.u32 2147483648, %v833_v17  ;;  %vm839_vm5 = vweird.f32 %v833_v17  ;;  %v843_v46 = vand.u32 2147483647, %v833_v17 }
 0x2d2   :  { %v846_v35 = vor.u32 1.1754944e-38, %v845_v43  ;;  %vm844_vm8 = vcmp.eq.f32.partialorder %v843_v46, 8.507059e+37 }
 0x2d4   :  { %v1976_v19 = vpop.eup %1975 }
 0x2d5   :  { %v1978_v20 = vpop.eup %1977  ;;  %v889_v21 = vadd.f32 1.0, %v1976_v19  ;;  %v971_v19 = vld [vmem:[#allocation4 + $0x80] sm:$0xff] }
 0x2d6   :  { %v1980_v24 = vpop.eup %1979  ;;  %v945_v25 = vadd.f32 1.0, %v1978_v20 }
 0x2d7   :  { %v835_v26 = vmul.f32 %v1980_v24, %v833_v17  ;;  %1981 = vrcp.f32 %v889_v21  ;;  %vm840_vm4 = vweird.f32 %v1980_v24  ;;  %v901_v48 = vand.u32 2147483648, %v889_v21 }
 0x2d8   :  { %1983 = vrcp.f32 %v945_v25  ;;  %vm841_vm6 = vmor %vm839_vm5, %vm840_vm4  ;;  %v899_v30 = vand.u32 2147483647, %v889_v21  ;;  %vm895_vm9 = vweird.f32 %v889_v21  ;;  %v957_v45 = vand.u32 2147483648, %v945_v25 }
 0x2d9   :  { %v836_v27 = vsub.f32 1.0, %v835_v26  ;;  %1985 = vtanh.f32 %v791_v36  ;;  %v902_v49 = vor.u32 1.1754944e-38, %v901_v48  ;;  %vm951_vm13 = vweird.f32 %v945_v25 }
 0x2da   :  { %vm900_vm11 = vcmp.eq.f32.partialorder %v899_v30, 8.507059e+37  ;;  %v955_v7 = vand.u32 2147483647, %v945_v25  ;;  %v958_v58 = vor.u32 1.1754944e-38, %v957_v45 }
 0x2db   :  { %v837_v32 = vmul.f32 %v1980_v24, %v836_v27 }
 0x2dc   :  { %vm956_vm15 = vcmp.eq.f32.partialorder %v955_v7, 8.507059e+37  ;;  %v2969_v7 = vld [vmem:[#allocation10 + $0xf8] sm:$0xff] }
 0x2dd   :  { %v1982_v33 = vpop.eup %1981  ;;  %v838_v38 = vadd.f32 %v1980_v24, %v837_v32 }
 0x2de   :  { %v1984_v37 = vpop.eup %1983  ;;  %v891_v39 = vmul.f32 %v1982_v33, %v889_v21  ;;  %vm896_vm7 = vweird.f32 %v1982_v33 }
 0x2df   :  { %v947_v44 = vmul.f32 %v1984_v37, %v945_v25  ;;  %v842_v51 = vsel %vm841_vm6, %v1980_v24, %v838_v38  ;;  %vm897_vm10 = vmor %vm895_vm9, %vm896_vm7  ;;  %v1986_v12 = vpop.eup %1985  ;;  %vm952_vm12 = vweird.f32 %v1984_v37 }
 0x2e0   :  { %v892_v47 = vsub.f32 1.0, %v891_v39  ;;  %v847_v14 = vsel %vm844_vm8, %v846_v35, %v842_v51  ;;  %vm953_vm14 = vmor %vm951_vm13, %vm952_vm12 }
 0x2e1   :  { %v948_v40 = vsub.f32 1.0, %v947_v44  ;;  %v962_v0 = vmul.f32 %v1986_v12, %v847_v14 }
 0x2e2   :  { %v893_v22 = vmul.f32 %v1982_v33, %v892_v47 }
 0x2e3   :  { %v949_v56 = vmul.f32 %v1984_v37, %v948_v40 }
 0x2e4   :  { %v894_v41 = vadd.f32 %v1982_v33, %v893_v22 }
 0x2e5   :  { %v950_v29 = vadd.f32 %v1984_v37, %v949_v56 }
 0x2e6   :  { %v898_v23 = vsel %vm897_vm10, %v1982_v33, %v894_v41 }
 0x2e7   :  { %v903_v53 = vsel %vm900_vm11, %v902_v49, %v898_v23  ;;  %v954_v18 = vsel %vm953_vm14, %v1984_v37, %v950_v29 }
 0x2e8   :  { %v961_v61 = vmul.f32 %v903_v53, %v2855_v4  ;;  %v959_v42 = vsel %vm956_vm15, %v958_v58, %v954_v18  ;;  %v972_v4 = vld [vmem:[#allocation4 + $0x88] sm:$0xff] }
 0x2e9   :  { %v2971_v18 = vld [vmem:[#allocation10 + $0x178] sm:$0xff] }
 0x2ea   :  { %v2958_v54 = vadd.f32 %v962_v0, %v961_v61  ;;  %v2975_v58 = vld [vmem:[#allocation10 + $0x1f8] sm:$0xff] }
 0x2ec   :  { %969 = vst [vmem:[#allocation13 + $0x18] sm:$0xff] %v2958_v54  ;;  %1987 = vtanh.f32 %v2958_v54 }
 0x2f2   :  { %v1988_v5 = vpop.eup %1987 }
 0x2f3   :  { %v965_v8 = vmul.f32 %v1988_v5, %v959_v42  ;;  %v2979_v5 = vld [vmem:[#allocation10 + $0x70] sm:$0xff] }
 0x2f4   :  { %v2981_v42 = vld [vmem:[#allocation10 + $0xf0] sm:$0xff] }
 0x2f5   :  { %967 = vst [vmem:[#allocation12 + $0x18] sm:$0xff] %v965_v8  ;;  %1007 = vmatmul.f32.vlgmr.msra.gmra.mxu0 %v965_v8  ;;  %1045 = vmatmul.f32.vlgmr.msra.gmra.mxu1 %v965_v8 }
 0x2f6   :  { %1101 = vmatmul.f32.vlgmr.msra.gmra.mxu2 %v965_v8  ;;  %1157 = vmatmul.f32.vlgmr.msra.gmra.mxu3 %v965_v8  ;;  %v2983_v8 = vld [vmem:[#allocation10 + $0x170] sm:$0xff] }
 0x2f7   :  { %1469 = vmatpush.msra.mxu1 %v2969_v7  ;;  %1525 = vmatpush.msra.mxu2 %v2971_v18 }
 0x2f8   :  { %1581 = vmatpush.msra.mxu3 %v2975_v58 }
 0x2f9   :  { %1470 = vmatpush.msra.mxu1 %v2981_v42  ;;  %1526 = vmatpush.msra.mxu2 %v2983_v8 }
 0x372   :  { %v1046_v34 = vpop.f32.mrf.mxu1  ;;  %v1008_v20 = vpop.f32.mrf.mxu0 }
 0x373   :  { %v1049_v50 = vadd.f32 %v1046_v34, %v972_v4  ;;  %v1011_v25 = vadd.f32 %v1008_v20, %v971_v19  ;;  %v2987_v4 = vld [vmem:[#allocation10 + $0x1f0] sm:$0xff]  ;;  %v2991_v34 = vld [vmem:[#allocation10 + $0x68] sm:$0xff] }
 0x374   :  { %1582 = vmatpush.msra.mxu3 %v2987_v4  ;;  %v3041_v19 = vld [vmem:[#allocation10 + $0xc8] sm:$0xff] }
 0x375   :  { %v1903_v52 = vmul.f32 -1.442695, %v1049_v50  ;;  %v2993_v50 = vld [vmem:[#allocation10 + $0xe8] sm:$0xff] }
 0x376   :  { %1471 = vmatpush.msra.mxu1 %v2993_v50  ;;  %v3043_v20 = vld [vmem:[#allocation10 + $0x148] sm:$0xff] }
 0x377   :  { %1989 = vpow2.f32 %v1903_v52  ;;  %v2995_v52 = vld [vmem:[#allocation10 + $0x168] sm:$0xff] }
 0x378   :  { %1527 = vmatpush.msra.mxu2 %v2995_v52 }
 0x379   :  { %v1102_v59 = vpop.f32.mrf.mxu2  ;;  %v1158_v60 = vpop.f32.mrf.mxu3 }
 0x37a   :  { %v1105_v62 = vadd.f32 %v1102_v59, %v973_v55  ;;  %v1161_v63 = vadd.f32 %v1158_v60, %v974_v57  ;;  %v2999_v55 = vld [vmem:[#allocation10 + $0x1e8] sm:$0xff]  ;;  %v3003_v57 = vld [vmem:[#allocation10 + $0x60] sm:$0xff] }
 0x37b   :  { %1583 = vmatpush.msra.mxu3 %v2999_v55  ;;  %v3005_v59 = vld [vmem:[#allocation10 + $0xe0] sm:$0xff] }
 0x37c   :  { %v1904_v1 = vmul.f32 -1.442695, %v1105_v62  ;;  %v1905_v2 = vmul.f32 -1.442695, %v1161_v63  ;;  %v3007_v60 = vld [vmem:[#allocation10 + $0x160] sm:$0xff]  ;;  %1472 = vmatpush.msra.mxu1 %v3005_v59  ;;  %v3015_v63 = vld [vmem:[#allocation10 + $0x58] sm:$0xff] }
 0x37d   :  { %v1990_v6 = vpop.eup %1989  ;;  %v3011_v62 = vld [vmem:[#allocation10 + $0x1e0] sm:$0xff]  ;;  %1528 = vmatpush.msra.mxu2 %v3007_v60 }
 0x37e   :  { %v1053_v9 = vadd.f32 1.0, %v1990_v6  ;;  %1991 = vpow2.f32 %v1904_v1  ;;  %1584 = vmatpush.msra.mxu3 %v3011_v62  ;;  %v3017_v1 = vld [vmem:[#allocation10 + $0xd8] sm:$0xff] }
 0x37f   :  { %1993 = vpow2.f32 %v1905_v2  ;;  %v3019_v2 = vld [vmem:[#allocation10 + $0x158] sm:$0xff]  ;;  %1473 = vmatpush.msra.mxu1 %v3017_v1 }
 0x380   :  { %1995 = vrcp.f32 %v1053_v9  ;;  %v1065_v31 = vand.u32 2147483648, %v1053_v9  ;;  %vm1059_vm1 = vweird.f32 %v1053_v9  ;;  %v1063_v33 = vand.u32 2147483647, %v1053_v9  ;;  %v1192_v6 = vld [vmem:[#allocation4 + $0xa8] sm:$0xff]  ;;  %1529 = vmatpush.msra.mxu2 %v3019_v2 }
 0x382   :  { %v1066_v44 = vor.u32 1.1754944e-38, %v1065_v31  ;;  %vm1064_vm4 = vcmp.eq.f32.partialorder %v1063_v33, 8.507059e+37  ;;  %v1194_v31 = vld [vmem:[#allocation4 + $0xb8] sm:$0xff]  ;;  %v3063_v33 = vld [vmem:[#allocation10 + $0x38] sm:$0xff] }
 0x384   :  { %v1992_v10 = vpop.eup %1991 }
 0x385   :  { %v1994_v11 = vpop.eup %1993  ;;  %v1109_v13 = vadd.f32 1.0, %v1992_v10  ;;  %v3027_v10 = vld [vmem:[#allocation10 + $0x50] sm:$0xff] }
 0x386   :  { %v1996_v15 = vpop.eup %1995  ;;  %v1165_v3 = vadd.f32 1.0, %v1994_v11  ;;  %v3029_v11 = vld [vmem:[#allocation10 + $0xd0] sm:$0xff] }
 0x387   :  { %v1055_v16 = vmul.f32 %v1996_v15, %v1053_v9  ;;  %1997 = vrcp.f32 %v1109_v13  ;;  %vm1060_vm0 = vweird.f32 %v1996_v15  ;;  %v1121_v37 = vand.u32 2147483648, %v1109_v13  ;;  %v3023_v9 = vld [vmem:[#allocation10 + $0x1d8] sm:$0xff]  ;;  %1474 = vmatpush.msra.mxu1 %v3029_v11 }
 0x388   :  { %1999 = vrcp.f32 %v1165_v3  ;;  %vm1061_vm2 = vmor %vm1059_vm1, %vm1060_vm0  ;;  %v1119_v43 = vand.u32 2147483647, %v1109_v13  ;;  %vm1115_vm5 = vweird.f32 %v1109_v13  ;;  %v1177_v12 = vand.u32 2147483648, %v1165_v3  ;;  %1585 = vmatpush.msra.mxu3 %v3023_v9 }
 0x389   :  { %v1056_v17 = vsub.f32 1.0, %v1055_v16  ;;  %2001 = vtanh.f32 %v1011_v25  ;;  %v1122_v51 = vor.u32 1.1754944e-38, %v1121_v37  ;;  %vm1171_vm9 = vweird.f32 %v1165_v3  ;;  %1475 = vmatpush.msra.mxu1 %v3041_v19  ;;  %v3051_v25 = vld [vmem:[#allocation10 + $0x40] sm:$0xff]  ;;  %v3067_v37 = vld [vmem:[#allocation10 + $0x138] sm:$0xff] }
 0x38a   :  { %vm1120_vm7 = vcmp.eq.f32.partialorder %v1119_v43, 8.507059e+37  ;;  %v1175_v53 = vand.u32 2147483647, %v1165_v3  ;;  %v1178_v0 = vor.u32 1.1754944e-38, %v1177_v12  ;;  %v3097_v12 = vld [vmem:[#allocation10 + $0x20] sm:$0xff] }
 0x38b   :  { %v1057_v21 = vmul.f32 %v1996_v15, %v1056_v17  ;;  %v3039_v17 = vld [vmem:[#allocation10 + $0x48] sm:$0xff] }
 0x38c   :  { %vm1176_vm11 = vcmp.eq.f32.partialorder %v1175_v53, 8.507059e+37 }
 0x38d   :  { %v1998_v24 = vpop.eup %1997  ;;  %v1058_v27 = vadd.f32 %v1996_v15, %v1057_v21  ;;  %v3047_v21 = vld [vmem:[#allocation10 + $0x1c8] sm:$0xff] }
 0x38e   :  { %v2000_v26 = vpop.eup %1999  ;;  %v1111_v28 = vmul.f32 %v1998_v24, %v1109_v13  ;;  %vm1116_vm3 = vweird.f32 %v1998_v24  ;;  %v3031_v13 = vld [vmem:[#allocation10 + $0x150] sm:$0xff] }
 0x38f   :  { %v1167_v32 = vmul.f32 %v2000_v26, %v1165_v3  ;;  %v1062_v38 = vsel %vm1061_vm2, %v1996_v15, %v1058_v27  ;;  %vm1117_vm6 = vmor %vm1115_vm5, %vm1116_vm3  ;;  %v2002_v30 = vpop.eup %2001  ;;  %vm1172_vm8 = vweird.f32 %v2000_v26  ;;  %v3035_v3 = vld [vmem:[#allocation10 + $0x1d0] sm:$0xff]  ;;  %1530 = vmatpush.msra.mxu2 %v3031_v13  ;;  %v3055_v27 = vld [vmem:[#allocation10 + $0x140] sm:$0xff] }
 0x390   :  { %v1112_v36 = vsub.f32 1.0, %v1111_v28  ;;  %v1067_v48 = vsel %vm1064_vm4, %v1066_v44, %v1062_v38  ;;  %vm1173_vm10 = vmor %vm1171_vm9, %vm1172_vm8  ;;  %1586 = vmatpush.msra.mxu3 %v3035_v3  ;;  %v1193_v28 = vld [vmem:[#allocation4 + $0xb0] sm:$0xff]  ;;  %v3071_v38 = vld [vmem:[#allocation10 + $0x1b8] sm:$0xff] }
 0x391   :  { %v1168_v46 = vsub.f32 1.0, %v1167_v32  ;;  %v1182_v41 = vmul.f32 %v2002_v30, %v1067_v48  ;;  %1531 = vmatpush.msra.mxu2 %v3043_v20  ;;  %v3059_v32 = vld [vmem:[#allocation10 + $0x1c0] sm:$0xff]  ;;  %v3075_v44 = vld [vmem:[#allocation10 + $0x30] sm:$0xff]  ;;  %v3087_v30 = vld [vmem:[#allocation10 + $0x28] sm:$0xff] }
 0x392   :  { %v1113_v39 = vmul.f32 %v1998_v24, %v1112_v36  ;;  %1587 = vmatpush.msra.mxu3 %v3047_v21  ;;  %v3065_v36 = vld [vmem:[#allocation10 + $0xb8] sm:$0xff] }
 0x393   :  { %v1169_v40 = vmul.f32 %v2000_v26, %v1168_v46  ;;  %1532 = vmatpush.msra.mxu2 %v3055_v27  ;;  %v3077_v46 = vld [vmem:[#allocation10 + $0xb0] sm:$0xff] }
 0x394   :  { %v1114_v47 = vadd.f32 %v1998_v24, %v1113_v39  ;;  %1588 = vmatpush.msra.mxu3 %v3059_v32 }
 0x395   :  { %v1170_v23 = vadd.f32 %v2000_v26, %v1169_v40  ;;  %1533 = vmatpush.msra.mxu2 %v3067_v37  ;;  %v3091_v40 = vld [vmem:[#allocation10 + $0x128] sm:$0xff] }
 0x396   :  { %v1118_v22 = vsel %vm1117_vm6, %v1998_v24, %v1114_v47  ;;  %1589 = vmatpush.msra.mxu3 %v3071_v38  ;;  %v3079_v47 = vld [vmem:[#allocation10 + $0x130] sm:$0xff] }
 0x397   :  { %v1123_v35 = vsel %vm1120_vm7, %v1122_v51, %v1118_v22  ;;  %v1174_v56 = vsel %vm1173_vm10, %v2000_v26, %v1170_v23  ;;  %v3053_v26 = vld [vmem:[#allocation10 + $0xc0] sm:$0xff]  ;;  %v3083_v22 = vld [vmem:[#allocation10 + $0x1b0] sm:$0xff]  ;;  %1534 = vmatpush.msra.mxu2 %v3079_v47  ;;  %v3095_v23 = vld [vmem:[#allocation10 + $0x1a8] sm:$0xff] }
 0x398   :  { %v1181_v14 = vmul.f32 %v1123_v35, %v2958_v54  ;;  %v1179_v29 = vsel %vm1176_vm11, %v1178_v0, %v1174_v56  ;;  %v2967_v54 = vld [vmem:[#allocation10 + $0x78] sm:$0xff]  ;;  %1476 = vmatpush.msra.mxu1 %v3053_v26  ;;  %1590 = vmatpush.msra.mxu3 %v3083_v22  ;;  %v3089_v35 = vld [vmem:[#allocation10 + $0xa8] sm:$0xff]  ;;  %v3101_v56 = vld [vmem:[#allocation10 + $0xa0] sm:$0xff] }
 0x399   :  { %1431 = vmatpush.msra.mxu0 %v2967_v54  ;;  %1535 = vmatpush.msra.mxu2 %v3091_v40  ;;  %v3103_v0 = vld [vmem:[#allocation10 + $0x120] sm:$0xff] }
 0x39a   :  { %v2963_v49 = vadd.f32 %v1182_v41, %v1181_v14  ;;  %1477 = vmatpush.msra.mxu1 %v3065_v36  ;;  %1591 = vmatpush.msra.mxu3 %v3095_v23 }
 0x39b   :  { %1432 = vmatpush.msra.mxu0 %v2979_v5  ;;  %1536 = vmatpush.msra.mxu2 %v3103_v0 }
 0x39c   :  { %1189 = vst [vmem:[#allocation13 + $0x20] sm:$0xff] %v2963_v49  ;;  %2003 = vtanh.f32 %v2963_v49  ;;  %1478 = vmatpush.msra.mxu1 %v3077_v46 }
 0x39d   :  { %1433 = vmatpush.msra.mxu0 %v2991_v34 }
 0x39e   :  { %1479 = vmatpush.msra.mxu1 %v3089_v35 }
 0x39f   :  { %1434 = vmatpush.msra.mxu0 %v3003_v57 }
 0x3a0   :  { %1480 = vmatpush.msra.mxu1 %v3101_v56 }
 0x3a1   :  { %1435 = vmatpush.msra.mxu0 %v3015_v63 }
 0x3a2   :  { %v2004_v61 = vpop.eup %2003 }
 0x3a3   :  { %v1185_v45 = vmul.f32 %v2004_v61, %v1179_v29  ;;  %1436 = vmatpush.msra.mxu0 %v3027_v10  ;;  %v3105_v61 = vld [vmem:[#allocation10 + $0x1a0] sm:$0xff] }
 0x3a4   :  { %1592 = vmatpush.msra.mxu3 %v3105_v61 }
 0x3a5   :  { %1187 = vst [vmem:[#allocation12 + $0x20] sm:$0xff] %v1185_v45  ;;  %1227 = vmatmul.f32.vlgmr.msrb.gmra.mxu0 %v1185_v45  ;;  %1265 = vmatmul.f32.vlgmr.msrb.gmra.mxu1 %v1185_v45 }
 0x3a6   :  { %1321 = vmatmul.f32.vlgmr.msrb.gmra.mxu2 %v1185_v45  ;;  %1377 = vmatmul.f32.vlgmr.msrb.gmra.mxu3 %v1185_v45  ;;  %v3111_v45 = vld [vmem:[#allocation10 + $0x18] sm:$0xff] }
 0x3a7   :  { %1437 = vmatpush.msra.mxu0 %v3039_v17 }
 0x3a9   :  { %1438 = vmatpush.msra.mxu0 %v3051_v25 }
 0x3ab   :  { %1439 = vmatpush.msra.mxu0 %v3063_v33 }
 0x3ad   :  { %1440 = vmatpush.msra.mxu0 %v3075_v44 }
 0x3af   :  { %1441 = vmatpush.msra.mxu0 %v3087_v30 }
 0x3b1   :  { %1442 = vmatpush.msra.mxu0 %v3097_v12 }
 0x3b3   :  { %1443 = vmatpush.msra.mxu0 %v3111_v45 }
 0x422   :  { %v1266_v15 = vpop.f32.mrf.mxu1 }
 0x423   :  { %v1269_v16 = vadd.f32 %v1266_v15, %v1192_v6  ;;  %v3113_v6 = vld [vmem:[#allocation10 + $0x98] sm:$0xff] }
 0x424   :  { %3375 = vst [vmem:[#allocation29_spill] sm:$0xff] %v3113_v6  ;;  %v3115_v15 = vld [vmem:[#allocation10 + $0x118] sm:$0xff]  ;;  %1481 = vmatpush.msra.mxu1 %v3113_v6 }
 0x425   :  { %v1906_v24 = vmul.f32 -1.442695, %v1269_v16  ;;  %3376 = vst [vmem:[#allocation30_spill] sm:$0xff] %v3115_v15  ;;  %v3119_v16 = vld [vmem:[#allocation10 + $0x198] sm:$0xff]  ;;  %1537 = vmatpush.msra.mxu2 %v3115_v15 }
 0x426   :  { %3377 = vst [vmem:[#allocation31_spill] sm:$0xff] %v3119_v16  ;;  %1593 = vmatpush.msra.mxu3 %v3119_v16 }
 0x427   :  { %2005 = vpow2.f32 %v1906_v24  ;;  %v3121_v24 = vld [vmem:[#allocation10 + $0x10] sm:$0xff] }
 0x428   :  { %3378 = vst [vmem:[#allocation32_spill] sm:$0xff] %v3121_v24  ;;  %1444 = vmatpush.msra.mxu0 %v3121_v24  ;;  %v3152_v24 = vld [vmem:[#allocation10 + $0x100] sm:$0xff] }
 0x429   :  { %v1322_v39 = vpop.f32.mrf.mxu2  ;;  %v1378_v43 = vpop.f32.mrf.mxu3  ;;  %3384 = vst [vmem:[#allocation38_spill] sm:$0xff] %v3152_v24 }
 0x42a   :  { %v1325_v48 = vadd.f32 %v1322_v39, %v1193_v28  ;;  %v1381_v51 = vadd.f32 %v1378_v43, %v1194_v31  ;;  %v3123_v28 = vld [vmem:[#allocation10 + $0x90] sm:$0xff]  ;;  %v3134_v43 = vld [vmem:[#allocation10 + $0x8] sm:$0xff] }
 0x42b   :  { %3379 = vst [vmem:[#allocation33_spill] sm:$0xff] %v3123_v28  ;;  %v3128_v31 = vld [vmem:[#allocation10 + $0x110] sm:$0xff]  ;;  %1482 = vmatpush.msra.mxu1 %v3123_v28  ;;  %1445 = vmatpush.msra.mxu0 %v3134_v43  ;;  %v3154_v28 = vld [vmem:[#allocation10 + $0x180] sm:$0xff] }
 0x42c   :  { %v1907_v41 = vmul.f32 -1.442695, %v1325_v48  ;;  %v1908_v14 = vmul.f32 -1.442695, %v1381_v51  ;;  %3380 = vst [vmem:[#allocation34_spill] sm:$0xff] %v3128_v31  ;;  %v3130_v39 = vld [vmem:[#allocation10 + $0x190] sm:$0xff]  ;;  %1538 = vmatpush.msra.mxu2 %v3128_v31 }
 0x42d   :  { %v2006_v53 = vpop.eup %2005  ;;  %3381 = vst [vmem:[#allocation35_spill] sm:$0xff] %v3130_v39  ;;  %v3136_v48 = vld [vmem:[#allocation10 + $0x88] sm:$0xff]  ;;  %1594 = vmatpush.msra.mxu3 %v3130_v39 }
 0x42e   :  { %v3107_v29 = vadd.f32 1.0, %v2006_v53  ;;  %2007 = vpow2.f32 %v1907_v41  ;;  %3382 = vst [vmem:[#allocation36_spill] sm:$0xff] %v3136_v48  ;;  %v3140_v51 = vld [vmem:[#allocation10 + $0x108] sm:$0xff]  ;;  %v3148_v53 = vld [vmem:[#allocation10 + $0x80] sm:$0xff]  ;;  %1483 = vmatpush.msra.mxu1 %v3136_v48 }
 0x42f   :  { %2009 = vpow2.f32 %v1908_v14  ;;  %v3142_v41 = vld [vmem:[#allocation10 + $0x188] sm:$0xff]  ;;  %v3146_v14 = vld [vmem:[#allocation10] sm:$0xff]  ;;  %3383 = vst [vmem:[#allocation37_spill] sm:$0xff] %v3148_v53  ;;  %1539 = vmatpush.msra.mxu2 %v3140_v51 }
 0x430   :  { %2011 = vrcp.f32 %v3107_v29  ;;  %1595 = vmatpush.msra.mxu3 %v3142_v41  ;;  %1446 = vmatpush.msra.mxu0 %v3146_v14  ;;  %vm1279_vm13 = vweird.f32 %v3107_v29 }
 0x431   :  { %1484 = vmatpush.msra.mxu1 %v3148_v53  ;;  %1540 = vmatpush.msra.mxu2 %v3152_v24  ;;  %v1228_v53 = vpop.f32.mrf.mxu0 }
 0x432   :  { %1596 = vmatpush.msra.mxu3 %v3154_v28  ;;  %1651 = vmatpush.msrb.mxu0 %v2967_v54 }
 0x433   :  { %1689 = vmatpush.msrb.mxu1 %v2969_v7  ;;  %1745 = vmatpush.msrb.mxu2 %v2971_v18 }
 0x434   :  { %v2008_v16 = vpop.eup %2007  ;;  %1801 = vmatpush.msrb.mxu3 %v2975_v58  ;;  %1652 = vmatpush.msrb.mxu0 %v2979_v5 }
 0x435   :  { %v2010_v15 = vpop.eup %2009  ;;  %v3156_v6 = vadd.f32 1.0, %v2008_v16  ;;  %v1191_v16 = vld [vmem:[#allocation4 + $0xa0] sm:$0xff]  ;;  %1690 = vmatpush.msrb.mxu1 %v2981_v42  ;;  %1746 = vmatpush.msrb.mxu2 %v2983_v8  ;;  %v1285_v42 = vand.u32 2147483648, %v3107_v29 }
 0x436   :  { %v3160_v39 = vpop.eup %2011  ;;  %v3162_v31 = vadd.f32 1.0, %v2010_v15  ;;  %1802 = vmatpush.msrb.mxu3 %v2987_v4  ;;  %1653 = vmatpush.msrb.mxu0 %v2991_v34  ;;  %v1231_v7 = vadd.f32 %v1228_v53, %v1191_v16  ;;  %v1283_v4 = vand.u32 2147483647, %v3107_v29 }
 0x437   :  { %v1275_v48 = vmul.f32 %v3160_v39, %v3107_v29  ;;  %2013 = vrcp.f32 %v3156_v6  ;;  %1691 = vmatpush.msrb.mxu1 %v2993_v50  ;;  %1747 = vmatpush.msrb.mxu2 %v2995_v52  ;;  %vm1280_vm12 = vweird.f32 %v3160_v39  ;;  %v1341_v52 = vand.u32 2147483648, %v3156_v6  ;;  %v1414_v29 = vld [vmem:[#allocation4 + $0xd8] sm:$0xff] }
 0x438   :  { %2015 = vrcp.f32 %v3162_v31  ;;  %1803 = vmatpush.msrb.mxu3 %v2999_v55  ;;  %1654 = vmatpush.msrb.mxu0 %v3003_v57  ;;  %vm3201_vm14 = vmor %vm1279_vm13, %vm1280_vm12  ;;  %vm1284_vm0 = vcmp.eq.f32.partialorder %v1283_v4, 8.507059e+37  ;;  %vm1335_vm1 = vweird.f32 %v3156_v6  ;;  %vm1391_vm5 = vweird.f32 %v3162_v31 }
 0x439   :  { %v1276_v15 = vsub.f32 1.0, %v1275_v48  ;;  %1692 = vmatpush.msrb.mxu1 %v3005_v59  ;;  %1748 = vmatpush.msrb.mxu2 %v3007_v60  ;;  %2017 = vtanh.f32 %v1231_v7  ;;  %v1339_v59 = vand.u32 2147483647, %v3156_v6  ;;  %v1286_v60 = vor.u32 1.1754944e-38, %v1285_v42  ;;  %v1411_v7 = vld [vmem:[#allocation4 + $0xc0] sm:$0xff] }
 0x43a   :  { %1804 = vmatpush.msrb.mxu3 %v3011_v62  ;;  %1655 = vmatpush.msrb.mxu0 %v3015_v63 }
 0x43b   :  { %v1277_v24 = vmul.f32 %v3160_v39, %v1276_v15  ;;  %1693 = vmatpush.msrb.mxu1 %v3017_v1  ;;  %1749 = vmatpush.msrb.mxu2 %v3019_v2  ;;  %v1342_v2 = vor.u32 1.1754944e-38, %v1341_v52  ;;  %vm1340_vm3 = vcmp.eq.f32.partialorder %v1339_v59, 8.507059e+37 }
 0x43c   :  { %1805 = vmatpush.msrb.mxu3 %v3023_v9  ;;  %1656 = vmatpush.msrb.mxu0 %v3027_v10 }
 0x43d   :  { %v2014_v54 = vpop.eup %2013  ;;  %v1278_v58 = vadd.f32 %v3160_v39, %v1277_v24  ;;  %1694 = vmatpush.msrb.mxu1 %v3029_v11  ;;  %1750 = vmatpush.msrb.mxu2 %v3031_v13 }
 0x43e   :  { %v3185_v18 = vpop.eup %2015  ;;  %v1331_v5 = vmul.f32 %v2014_v54, %v3156_v6  ;;  %vm1336_vm15 = vweird.f32 %v2014_v54  ;;  %1806 = vmatpush.msrb.mxu3 %v3035_v3  ;;  %1657 = vmatpush.msrb.mxu0 %v3039_v17 }
 0x43f   :  { %v1387_v8 = vmul.f32 %v3185_v18, %v3162_v31  ;;  %v1282_v55 = vsel %vm3201_vm14, %v3160_v39, %v1278_v58  ;;  %1695 = vmatpush.msrb.mxu1 %v3041_v19  ;;  %vm1337_vm2 = vmor %vm1335_vm1, %vm1336_vm15  ;;  %1751 = vmatpush.msrb.mxu2 %v3043_v20  ;;  %v2018_v10 = vpop.eup %2017  ;;  %vm1392_vm4 = vweird.f32 %v3185_v18 }
 0x440   :  { %v1332_v34 = vsub.f32 1.0, %v1331_v5  ;;  %v1287_v1 = vsel %vm1284_vm0, %v1286_v60, %v1282_v55  ;;  %1807 = vmatpush.msrb.mxu3 %v3047_v21  ;;  %1658 = vmatpush.msrb.mxu0 %v3051_v25  ;;  %v1395_v21 = vand.u32 2147483647, %v3162_v31  ;;  %vm1393_vm6 = vmor %vm1391_vm5, %vm1392_vm4 }
 0x441   :  { %v1388_v62 = vsub.f32 1.0, %v1387_v8  ;;  %1696 = vmatpush.msrb.mxu1 %v3053_v26  ;;  %1752 = vmatpush.msrb.mxu2 %v3055_v27  ;;  %v1402_v3 = vmul.f32 %v2018_v10, %v1287_v1  ;;  %v3387_v27 = vld [vmem:[#allocation29_spill] sm:$0xff] }
 0x442   :  { %v1333_v57 = vmul.f32 %v2014_v54, %v1332_v34  ;;  %1808 = vmatpush.msrb.mxu3 %v3059_v32  ;;  %1659 = vmatpush.msrb.mxu0 %v3063_v33  ;;  %vm1396_vm7 = vcmp.eq.f32.partialorder %v1395_v21, 8.507059e+37  ;;  %v3388_v32 = vld [vmem:[#allocation30_spill] sm:$0xff]  ;;  %v3389_v33 = vld [vmem:[#allocation31_spill] sm:$0xff] }
 0x443   :  { %v1389_v13 = vmul.f32 %v3185_v18, %v1388_v62  ;;  %1697 = vmatpush.msrb.mxu1 %v3065_v36  ;;  %1753 = vmatpush.msrb.mxu2 %v3067_v37 }
 0x444   :  { %v1334_v63 = vadd.f32 %v2014_v54, %v1333_v57  ;;  %1809 = vmatpush.msrb.mxu3 %v3071_v38  ;;  %1660 = vmatpush.msrb.mxu0 %v3075_v44  ;;  %v3390_v38 = vld [vmem:[#allocation32_spill] sm:$0xff]  ;;  %v3391_v44 = vld [vmem:[#allocation33_spill] sm:$0xff] }
 0x445   :  { %1698 = vmatpush.msrb.mxu1 %v3077_v46  ;;  %v1390_v20 = vadd.f32 %v3185_v18, %v1389_v13  ;;  %1754 = vmatpush.msrb.mxu2 %v3079_v47  ;;  %v3392_v47 = vld [vmem:[#allocation34_spill] sm:$0xff] }
 0x446   :  { %v1338_v9 = vsel %vm1337_vm2, %v2014_v54, %v1334_v63  ;;  %1810 = vmatpush.msrb.mxu3 %v3083_v22  ;;  %1661 = vmatpush.msrb.mxu0 %v3087_v30  ;;  %v3393_v22 = vld [vmem:[#allocation35_spill] sm:$0xff]  ;;  %v3394_v30 = vld [vmem:[#allocation36_spill] sm:$0xff] }
 0x447   :  { %v1343_v11 = vsel %vm1340_vm3, %v1342_v2, %v1338_v9  ;;  %1699 = vmatpush.msrb.mxu1 %v3089_v35  ;;  %1755 = vmatpush.msrb.mxu2 %v3091_v40  ;;  %v1394_v25 = vsel %vm1393_vm6, %v3185_v18, %v1390_v20  ;;  %v3395_v35 = vld [vmem:[#allocation37_spill] sm:$0xff]  ;;  %v3396_v40 = vld [vmem:[#allocation38_spill] sm:$0xff] }
 0x448   :  { %v1401_v17 = vmul.f32 %v1343_v11, %v2963_v49  ;;  %v1397_v49 = vand.u32 2147483648, %v3162_v31  ;;  %1811 = vmatpush.msrb.mxu3 %v3095_v23  ;;  %1662 = vmatpush.msrb.mxu0 %v3097_v12  ;;  %v1412_v23 = vld [vmem:[#allocation4 + $0xc8] sm:$0xff] }
 0x449   :  { %1700 = vmatpush.msrb.mxu1 %v3101_v56  ;;  %1756 = vmatpush.msrb.mxu2 %v3103_v0 }
 0x44a   :  { %v3231_v19 = vadd.f32 %v1402_v3, %v1401_v17  ;;  %1812 = vmatpush.msrb.mxu3 %v3105_v61  ;;  %v1398_v26 = vor.u32 1.1754944e-38, %v1397_v49  ;;  %1663 = vmatpush.msrb.mxu0 %v3111_v45  ;;  %v1413_v61 = vld [vmem:[#allocation4 + $0xd0] sm:$0xff] }
 0x44b   :  { %1701 = vmatpush.msrb.mxu1 %v3387_v27  ;;  %1757 = vmatpush.msrb.mxu2 %v3388_v32 }
 0x44c   :  { %1409 = vst [vmem:[#allocation13 + $0x28] sm:$0xff] %v3231_v19  ;;  %2019 = vtanh.f32 %v3231_v19  ;;  %1813 = vmatpush.msrb.mxu3 %v3389_v33  ;;  %v1399_v37 = vsel %vm1396_vm7, %v1398_v26, %v1394_v25  ;;  %1664 = vmatpush.msrb.mxu0 %v3390_v38 }
 0x44d   :  { %1702 = vmatpush.msrb.mxu1 %v3391_v44  ;;  %1758 = vmatpush.msrb.mxu2 %v3392_v47 }
 0x44e   :  { %1814 = vmatpush.msrb.mxu3 %v3393_v22  ;;  %1665 = vmatpush.msrb.mxu0 %v3134_v43 }
 0x44f   :  { %1703 = vmatpush.msrb.mxu1 %v3394_v30  ;;  %1759 = vmatpush.msrb.mxu2 %v3140_v51  ;;  %v1633_v30 = vld [vmem:[#allocation4 + $0xf0] sm:$0xff] }
 0x450   :  { %1815 = vmatpush.msrb.mxu3 %v3142_v41  ;;  %1666 = vmatpush.msrb.mxu0 %v3146_v14 }
 0x451   :  { %1704 = vmatpush.msrb.mxu1 %v3395_v35  ;;  %1760 = vmatpush.msrb.mxu2 %v3396_v40  ;;  %v1634_v35 = vld [vmem:[#allocation4 + $0xf8] sm:$0xff] }
 0x452   :  { %v2020_v36 = vpop.eup %2019  ;;  %1816 = vmatpush.msrb.mxu3 %v3154_v28 }
 0x453   :  { %v1405_v46 = vmul.f32 %v2020_v36, %v1399_v37 }
 0x455   :  { %1407 = vst [vmem:[#allocation12 + $0x28] sm:$0xff] %v1405_v46  ;;  %1447 = vmatmul.f32.vlgmr.msra.gmra.mxu0 %v1405_v46  ;;  %1485 = vmatmul.f32.vlgmr.msra.gmra.mxu1 %v1405_v46 }
 0x456   :  { %1541 = vmatmul.f32.vlgmr.msra.gmra.mxu2 %v1405_v46  ;;  %1597 = vmatmul.f32.vlgmr.msra.gmra.mxu3 %v1405_v46 }
 0x4d2   :  { %v1486_v12 = vpop.f32.mrf.mxu1  ;;  %v1448_v18 = vpop.f32.mrf.mxu0 }
 0x4d3   :  { %v1489_v56 = vadd.f32 %v1486_v12, %v1412_v23  ;;  %v1451_v42 = vadd.f32 %v1448_v18, %v1411_v7 }
 0x4d5   :  { %v1909_v0 = vmul.f32 -1.442695, %v1489_v56 }
 0x4d7   :  { %2021 = vpow2.f32 %v1909_v0 }
 0x4d9   :  { %v1542_v45 = vpop.f32.mrf.mxu2  ;;  %v1598_v6 = vpop.f32.mrf.mxu3 }
 0x4da   :  { %v1545_v24 = vadd.f32 %v1542_v45, %v1413_v61  ;;  %v1601_v31 = vadd.f32 %v1598_v6, %v1414_v29 }
 0x4dc   :  { %v1910_v39 = vmul.f32 -1.442695, %v1545_v24  ;;  %v1911_v43 = vmul.f32 -1.442695, %v1601_v31 }
 0x4dd   :  { %v2022_v48 = vpop.eup %2021 }
 0x4de   :  { %v1493_v51 = vadd.f32 1.0, %v2022_v48  ;;  %2023 = vpow2.f32 %v1910_v39 }
 0x4df   :  { %2025 = vpow2.f32 %v1911_v43 }
 0x4e0   :  { %2027 = vrcp.f32 %v1493_v51  ;;  %v1505_v50 = vand.u32 2147483648, %v1493_v51  ;;  %vm1499_vm9 = vweird.f32 %v1493_v51  ;;  %v1503_v55 = vand.u32 2147483647, %v1493_v51 }
 0x4e2   :  { %v1506_v1 = vor.u32 1.1754944e-38, %v1505_v50  ;;  %vm1504_vm12 = vcmp.eq.f32.partialorder %v1503_v55, 8.507059e+37 }
 0x4e4   :  { %v2024_v41 = vpop.eup %2023 }
 0x4e5   :  { %v2026_v28 = vpop.eup %2025  ;;  %v1549_v14 = vadd.f32 1.0, %v2024_v41  ;;  %v1631_v41 = vld [vmem:[#allocation4 + $0xe0] sm:$0xff] }
 0x4e6   :  { %v2028_v53 = vpop.eup %2027  ;;  %v1605_v15 = vadd.f32 1.0, %v2026_v28 }
 0x4e7   :  { %v1495_v16 = vmul.f32 %v2028_v53, %v1493_v51  ;;  %2029 = vrcp.f32 %v1549_v14  ;;  %vm1500_vm8 = vweird.f32 %v2028_v53  ;;  %v1561_v59 = vand.u32 2147483648, %v1549_v14 }
 0x4e8   :  { %2031 = vrcp.f32 %v1605_v15  ;;  %vm1501_vm10 = vmor %vm1499_vm9, %vm1500_vm8  ;;  %v1559_v63 = vand.u32 2147483647, %v1549_v14  ;;  %vm1555_vm13 = vweird.f32 %v1549_v14  ;;  %v1617_v27 = vand.u32 2147483648, %v1605_v15 }
 0x4e9   :  { %v1496_v54 = vsub.f32 1.0, %v1495_v16  ;;  %2033 = vtanh.f32 %v1451_v42  ;;  %v1562_v11 = vor.u32 1.1754944e-38, %v1561_v59  ;;  %vm1611_vm1 = vweird.f32 %v1605_v15 }
 0x4ea   :  { %vm1560_vm15 = vcmp.eq.f32.partialorder %v1559_v63, 8.507059e+37  ;;  %v1615_v32 = vand.u32 2147483647, %v1605_v15  ;;  %v1618_v36 = vor.u32 1.1754944e-38, %v1617_v27 }
 0x4eb   :  { %v1497_v58 = vmul.f32 %v2028_v53, %v1496_v54 }
 0x4ec   :  { %vm1616_vm3 = vcmp.eq.f32.partialorder %v1615_v32, 8.507059e+37 }
 0x4ed   :  { %v2030_v5 = vpop.eup %2029  ;;  %v1498_v4 = vadd.f32 %v2028_v53, %v1497_v58 }
 0x4ee   :  { %v2032_v8 = vpop.eup %2031  ;;  %v1551_v34 = vmul.f32 %v2030_v5, %v1549_v14  ;;  %vm1556_vm11 = vweird.f32 %v2030_v5 }
 0x4ef   :  { %v1607_v52 = vmul.f32 %v2032_v8, %v1605_v15  ;;  %v1502_v60 = vsel %vm1501_vm10, %v2028_v53, %v1498_v4  ;;  %vm1557_vm14 = vmor %vm1555_vm13, %vm1556_vm11  ;;  %v2034_v3 = vpop.eup %2033  ;;  %vm1612_vm0 = vweird.f32 %v2032_v8 }
 0x4f0   :  { %v1552_v57 = vsub.f32 1.0, %v1551_v34  ;;  %v1507_v10 = vsel %vm1504_vm12, %v1506_v1, %v1502_v60  ;;  %vm1613_vm2 = vmor %vm1611_vm1, %vm1612_vm0 }
 0x4f1   :  { %v1608_v2 = vsub.f32 1.0, %v1607_v52  ;;  %v1622_v49 = vmul.f32 %v2034_v3, %v1507_v10 }
 0x4f2   :  { %v1553_v62 = vmul.f32 %v2030_v5, %v1552_v57 }
 0x4f3   :  { %v1609_v20 = vmul.f32 %v2032_v8, %v1608_v2 }
 0x4f4   :  { %v1554_v9 = vadd.f32 %v2030_v5, %v1553_v62 }
 0x4f5   :  { %v1610_v26 = vadd.f32 %v2032_v8, %v1609_v20 }
 0x4f6   :  { %v1558_v13 = vsel %vm1557_vm14, %v2030_v5, %v1554_v9 }
 0x4f7   :  { %v1563_v17 = vsel %vm1560_vm15, %v1562_v11, %v1558_v13  ;;  %v1614_v33 = vsel %vm1613_vm2, %v2032_v8, %v1610_v26 }
 0x4f8   :  { %v1621_v21 = vmul.f32 %v1563_v17, %v3231_v19  ;;  %v1619_v38 = vsel %vm1616_vm3, %v1618_v36, %v1614_v33  ;;  %v1632_v19 = vld [vmem:[#allocation4 + $0xe8] sm:$0xff] }
 0x4fa   :  { %v3270_v25 = vadd.f32 %v1622_v49, %v1621_v21 }
 0x4fc   :  { %1629 = vst [vmem:[#allocation13 + $0x30] sm:$0xff] %v3270_v25  ;;  %2035 = vtanh.f32 %v3270_v25 }
 0x502   :  { %v2036_v37 = vpop.eup %2035 }
 0x503   :  { %v1625_v44 = vmul.f32 %v2036_v37, %v1619_v38 }
 0x505   :  { %1627 = vst [vmem:[#allocation12 + $0x30] sm:$0xff] %v1625_v44  ;;  %1667 = vmatmul.f32.vlgmr.msrb.gmra.mxu0 %v1625_v44  ;;  %1705 = vmatmul.f32.vlgmr.msrb.gmra.mxu1 %v1625_v44 }
 0x506   :  { %1761 = vmatmul.f32.vlgmr.msrb.gmra.mxu2 %v1625_v44  ;;  %1817 = vmatmul.f32.vlgmr.msrb.gmra.mxu3 %v1625_v44 }
 0x582   :  { %v1706_v46 = vpop.f32.mrf.mxu1  ;;  %v1668_v28 = vpop.f32.mrf.mxu0 }
 0x583   :  { %v1709_v47 = vadd.f32 %v1706_v46, %v1632_v19  ;;  %v1671_v15 = vadd.f32 %v1668_v28, %v1631_v41 }
 0x585   :  { %v1912_v22 = vmul.f32 -1.442695, %v1709_v47 }
 0x587   :  { %2037 = vpow2.f32 %v1912_v22 }
 0x589   :  { %v1762_v40 = vpop.f32.mrf.mxu2  ;;  %v1818_v23 = vpop.f32.mrf.mxu3 }
 0x58a   :  { %v1765_v12 = vadd.f32 %v1762_v40, %v1633_v30  ;;  %v1821_v56 = vadd.f32 %v1818_v23, %v1634_v35 }
 0x58c   :  { %v1913_v0 = vmul.f32 -1.442695, %v1765_v12  ;;  %v1914_v61 = vmul.f32 -1.442695, %v1821_v56 }
 0x58d   :  { %v2038_v29 = vpop.eup %2037 }
 0x58e   :  { %v1713_v45 = vadd.f32 1.0, %v2038_v29  ;;  %2039 = vpow2.f32 %v1913_v0 }
 0x58f   :  { %2041 = vpow2.f32 %v1914_v61 }
 0x590   :  { %2043 = vrcp.f32 %v1713_v45  ;;  %v1725_v18 = vand.u32 2147483648, %v1713_v45  ;;  %vm1719_vm5 = vweird.f32 %v1713_v45  ;;  %v1723_v5 = vand.u32 2147483647, %v1713_v45 }
 0x592   :  { %v1726_v52 = vor.u32 1.1754944e-38, %v1725_v18  ;;  %vm1724_vm8 = vcmp.eq.f32.partialorder %v1723_v5, 8.507059e+37 }
 0x594   :  { %v2040_v6 = vpop.eup %2039 }
 0x595   :  { %v2042_v24 = vpop.eup %2041  ;;  %v1769_v31 = vadd.f32 1.0, %v2040_v6 }
 0x596   :  { %v2044_v39 = vpop.eup %2043  ;;  %v1825_v43 = vadd.f32 1.0, %v2042_v24 }
 0x597   :  { %v1715_v48 = vmul.f32 %v2044_v39, %v1713_v45  ;;  %2045 = vrcp.f32 %v1769_v31  ;;  %vm1720_vm4 = vweird.f32 %v2044_v39  ;;  %v1781_v8 = vand.u32 2147483648, %v1769_v31 }
 0x598   :  { %2047 = vrcp.f32 %v1825_v43  ;;  %vm1721_vm6 = vmor %vm1719_vm5, %vm1720_vm4  ;;  %v1779_v50 = vand.u32 2147483647, %v1769_v31  ;;  %vm1775_vm9 = vweird.f32 %v1769_v31  ;;  %v1837_v3 = vand.u32 2147483648, %v1825_v43 }
 0x599   :  { %v1716_v51 = vsub.f32 1.0, %v1715_v48  ;;  %2049 = vtanh.f32 %v1671_v15  ;;  %v1782_v60 = vor.u32 1.1754944e-38, %v1781_v8  ;;  %vm1831_vm13 = vweird.f32 %v1825_v43 }
 0x59a   :  { %vm1780_vm11 = vcmp.eq.f32.partialorder %v1779_v50, 8.507059e+37  ;;  %v1835_v17 = vand.u32 2147483647, %v1825_v43  ;;  %v1838_v49 = vor.u32 1.1754944e-38, %v1837_v3 }
 0x59b   :  { %v1717_v14 = vmul.f32 %v2044_v39, %v1716_v51 }
 0x59c   :  { %vm1836_vm15 = vcmp.eq.f32.partialorder %v1835_v17, 8.507059e+37 }
 0x59d   :  { %v2046_v53 = vpop.eup %2045  ;;  %v1718_v54 = vadd.f32 %v2044_v39, %v1717_v14 }
 0x59e   :  { %v2048_v16 = vpop.eup %2047  ;;  %v1771_v7 = vmul.f32 %v2046_v53, %v1769_v31  ;;  %vm1776_vm7 = vweird.f32 %v2046_v53 }
 0x59f   :  { %v1827_v58 = vmul.f32 %v2048_v16, %v1825_v43  ;;  %v1722_v4 = vsel %vm1721_vm6, %v2044_v39, %v1718_v54  ;;  %vm1777_vm10 = vmor %vm1775_vm9, %vm1776_vm7  ;;  %v2050_v63 = vpop.eup %2049  ;;  %vm1832_vm12 = vweird.f32 %v2048_v16 }
 0x5a0   :  { %v1772_v42 = vsub.f32 1.0, %v1771_v7  ;;  %v1727_v59 = vsel %vm1724_vm8, %v1726_v52, %v1722_v4  ;;  %vm1833_vm14 = vmor %vm1831_vm13, %vm1832_vm12 }
 0x5a1   :  { %v1828_v55 = vsub.f32 1.0, %v1827_v58  ;;  %v1842_v9 = vmul.f32 %v2050_v63, %v1727_v59 }
 0x5a2   :  { %v1773_v34 = vmul.f32 %v2046_v53, %v1772_v42 }
 0x5a3   :  { %v1829_v2 = vmul.f32 %v2048_v16, %v1828_v55 }
 0x5a4   :  { %v1774_v57 = vadd.f32 %v2046_v53, %v1773_v34 }
 0x5a5   :  { %v1830_v13 = vadd.f32 %v2048_v16, %v1829_v2 }
 0x5a6   :  { %v1778_v62 = vsel %vm1777_vm10, %v2046_v53, %v1774_v57 }
 0x5a7   :  { %v1783_v1 = vsel %vm1780_vm11, %v1782_v60, %v1778_v62  ;;  %v1834_v20 = vsel %vm1833_vm14, %v2048_v16, %v1830_v13 }
 0x5a8   :  { %v1841_v10 = vmul.f32 %v1783_v1, %v3270_v25  ;;  %v1839_v25 = vsel %vm1836_vm15, %v1838_v49, %v1834_v20 }
 0x5aa   :  { %v1843_v11 = vadd.f32 %v1842_v9, %v1841_v10 }
 0x5ac   :  { %2051 = vtanh.f32 %v1843_v11  ;;  %1849 = vst [vmem:[#allocation13 + $0x38] sm:$0xff] %v1843_v11 }
 0x5ad   :  { %1877 = dma.vmem_to_hbm [thread:$0]  %s1870_s3, 1024, %s1872_s17, [#allocation14], %s2213_s13, %s2213_s13, %s2214_s14  }
 0x5b2   :  { %v2052_v21 = vpop.eup %2051 }
 0x5b3   :  { %v1845_v26 = vmul.f32 %v2052_v21, %v1839_v25 }
 0x5b5   :  { %1847 = vst [vmem:[#allocation12 + $0x38] sm:$0xff] %v1845_v26 }
 0x5b6   :  { %1864 = dma.vmem_to_hbm [thread:$0]  %s1857_s18, 1024, %s1859_s21, [#allocation6], %s2213_s13, %s2213_s13, %s2214_s14  }
 0x5b7   :  { %2203 = dma.done.wait [#allocation6], 1024  }
 0x5b8   :  { %2204 = vsyncadd [#allocation6], 4294966272 }
 0x5b9   :  { %2205 = dma.done.wait [#allocation14], 1024  }
 0x5ba   :  { %2206 = vsyncadd [#allocation14], 4294966272 }
 0x5bb   :  { %1886 = vsyncpa [#allocation5], 1 }
 0x5bc   :  { %1887 = vsyncpa [#allocation8], 1 }
 0x5bd   :  { %1888 = vsyncpa [#allocation11], 1 }
 0x5be   :  { %1889 = vsyncpa [#allocation6], 1 }
 0x5bf   :  { %1890 = vsyncpa [#allocation14], 1 }

</bundles_post_ra>
